<compile_context>
chip_gen: v5e
topology: v5e:2x2
jax: 0.10.0
libtpu: 0.0.40
codegen_flags: <defaults>
</compile_context>

<pallas_src>
import functools

import jax
import jax.numpy as jnp
from jax import lax
from jax.experimental import pallas as pl
from jax.experimental.pallas import tpu as pltpu


_CPAD = 128  # pad every conv's Cout to a full 128-lane vreg width


# ----------------------------------------------------------------------------
# Fused Pallas kernel: conv1 (pre-im2col'd) + conv2 + conv3, each + bias + ReLU
# One batch element per grid step; everything resident in VMEM.
# ----------------------------------------------------------------------------
def _encoder_kernel(p1_ref, w1_ref, b1_ref, w2_ref, b2_ref, w3_ref, b3_ref,
                    out_ref, act1_ref, act2_ref, *,
                    W1, H2, W2, H3, W3, k2, k3):
    Wh = W1 // 2  # half-width of the layer-1 output (even/odd column split)

    # ---- Layer 1: a single MXU matmul over the pre-extracted im2col patches.
    # Patch rows arrive ordered (row, column-parity, column//2) so that the
    # stride-2 gather of layer 2 below only needs contiguous slices.
    y1 = jnp.dot(p1_ref[...], w1_ref[...], preferred_element_type=jnp.float32)
    act1_ref[...] = jnp.maximum(y1 + b1_ref[...], 0.0)

    # ---- Layer 2: k2 x k2, stride 2.  For output row `oh` and tap (i, j)
    # with j = 2*jh + pj, the needed layer-1 columns are 2*(ow + jh) + pj for
    # ow = 0..W2-1, i.e. a contiguous run of W2 rows in act1's
    # (row, parity, halfcol) layout starting at r*W1 + pj*Wh + jh.
    for oh in range(H2):
        pieces = []
        for i in range(k2):
            r = 2 * oh + i
            for jh in range(k2 // 2):
                for pj in range(2):
                    base = r * W1 + pj * Wh + jh
                    pieces.append(act1_ref[base:base + W2, :])      # (W2, 128)
        patch = jnp.concatenate(pieces, axis=-1)                    # (W2, k2*k2*128)
        y2 = jnp.dot(patch, w2_ref[...], preferred_element_type=jnp.float32)
        act2_ref[oh * W2:(oh + 1) * W2, :] = jnp.maximum(y2 + b2_ref[...], 0.0)

    # ---- Layer 3: k3 x k3, stride 1 (act2 stored plain row-major).
    for oh in range(H3):
        pieces = []
        for i in range(k3):
            for j in range(k3):
                base = (oh + i) * W2 + j
                pieces.append(act2_ref[base:base + W3, :])          # (W3, 128)
        patch = jnp.concatenate(pieces, axis=-1)                    # (W3, k3*k3*128)
        y3 = jnp.dot(patch, w3_ref[...], preferred_element_type=jnp.float32)
        out_ref[oh * W3:(oh + 1) * W3, :] = jnp.maximum(y3 + b3_ref[...], 0.0)


# ----------------------------------------------------------------------------
# Wrapper-side (XLA) preparation: layer-1 im2col + weight reshuffle/padding
# ----------------------------------------------------------------------------
def _layer1_patches(x_nhwc, k, s):
    """im2col for layer 1; rows reordered to (row, col-parity, col//2)."""
    n, h, w, c = x_nhwc.shape
    oh = (h - k) // s + 1
    ow = (w - k) // s + 1
    assert ow % 2 == 0, "layer-1 output width must be even for the parity layout"
    cols = []
    for i in range(k):
        for j in range(k):
            cols.append(x_nhwc[:, i:i + s * oh:s, j:j + s * ow:s, :])
    p = jnp.concatenate(cols, axis=-1)            # (N, OH, OW, k*k*C), (i,j,c) order
    p = p.reshape(n, oh, ow // 2, 2, k * k * c)   # split columns -> (halfcol, parity)
    p = p.transpose(0, 1, 3, 2, 4)                # (N, OH, parity, halfcol, K1)
    return p.reshape(n, oh * ow, k * k * c), oh, ow


def _pad_weights(params):
    """HWIO conv weights -> matmul form with Cout (and downstream Cin) padded
    to 128 lanes.  Padded channels carry zeros end-to-end, so results match."""
    (w1, b1), (w2, b2), (w3, b3) = params
    k1, _, c0, c1 = w1.shape
    k2, _, _, c2 = w2.shape
    k3, _, _, c3 = w3.shape
    w1m = jnp.pad(w1.reshape(k1 * k1 * c0, c1), ((0, 0), (0, _CPAD - c1)))
    b1m = jnp.pad(b1, (0, _CPAD - c1)).reshape(1, _CPAD)
    w2m = jnp.pad(w2, ((0, 0), (0, 0), (0, _CPAD - c1), (0, _CPAD - c2)))
    w2m = w2m.reshape(k2 * k2 * _CPAD, _CPAD)
    b2m = jnp.pad(b2, (0, _CPAD - c2)).reshape(1, _CPAD)
    w3m = jnp.pad(w3, ((0, 0), (0, 0), (0, _CPAD - c2), (0, _CPAD - c3)))
    w3m = w3m.reshape(k3 * k3 * _CPAD, _CPAD)
    b3m = jnp.pad(b3, (0, _CPAD - c3)).reshape(1, _CPAD)
    return w1m, b1m, w2m, b2m, w3m, b3m


# ----------------------------------------------------------------------------
# Encoder forward (NCHW in / NCHW out, matching the PyTorch module)
# ----------------------------------------------------------------------------
@jax.jit
def encoder_forward(x_nchw, params):
    x = jnp.transpose(x_nchw, (0, 2, 3, 1)).astype(jnp.float32)   # NCHW -> NHWC
    n = x.shape[0]
    (w1, _), (w2, _), (w3, _) = params
    k1, k2, k3 = w1.shape[0], w2.shape[0], w3.shape[0]
    c0 = w1.shape[2]
    c3 = w3.shape[3]
    assert k2 % 2 == 0

    patches, h1, w1sp = _layer1_patches(x, k1, 4)      # stride-4 conv
    h2 = (h1 - k2) // 2 + 1                            # stride-2 conv
    w2sp = (w1sp - k2) // 2 + 1
    h3 = h2 - (k3 - 1)                                 # stride-1 conv
    w3sp = w2sp - (k3 - 1)

    w1m, b1m, w2m, b2m, w3m, b3m = _pad_weights(params)
    k1feat = k1 * k1 * c0

    kernel = functools.partial(
        _encoder_kernel, W1=w1sp, H2=h2, W2=w2sp, H3=h3, W3=w3sp, k2=k2, k3=k3)

    out = pl.pallas_call(
        kernel,
        out_shape=jax.ShapeDtypeStruct((n, h3 * w3sp, _CPAD), jnp.float32),
        grid_spec=pltpu.PrefetchScalarGridSpec(
            num_scalar_prefetch=0,
            grid=(n,),
            in_specs=[
                pl.BlockSpec((None, h1 * w1sp, k1feat), lambda b: (b, 0, 0)),
                pl.BlockSpec((k1feat, _CPAD), lambda b: (0, 0)),
                pl.BlockSpec((1, _CPAD), lambda b: (0, 0)),
                pl.BlockSpec((k2 * k2 * _CPAD, _CPAD), lambda b: (0, 0)),
                pl.BlockSpec((1, _CPAD), lambda b: (0, 0)),
                pl.BlockSpec((k3 * k3 * _CPAD, _CPAD), lambda b: (0, 0)),
                pl.BlockSpec((1, _CPAD), lambda b: (0, 0)),
            ],
            out_specs=pl.BlockSpec((None, h3 * w3sp, _CPAD), lambda b: (b, 0, 0)),
            scratch_shapes=[
                pltpu.VMEM((h1 * w1sp, _CPAD), jnp.float32),   # layer-1 activations
                pltpu.VMEM((h2 * w2sp, _CPAD), jnp.float32),   # layer-2 activations
            ]),
        compiler_params=pltpu.CompilerParams(
            dimension_semantics=("parallel",)),
    )(patches, w1m, b1m, w2m, b2m, w3m, b3m)

    out = out[:, :, :c3].reshape(n, h3, w3sp, c3)
    return jnp.transpose(out, (0, 3, 1, 2))            # NHWC -> NCHW


def init_params(key, in_channels=4):
    """Deterministic synthetic init (shapes match layer_init'd Conv2d's)."""
    ks = jax.random.split(key, 6)

    def mk(kw_key, kb_key, kh, kw, cin, cout):
        w = jax.random.normal(kw_key, (kh, kw, cin, cout), jnp.float32) * 0.05
        b = jax.random.normal(kb_key, (cout,), jnp.float32) * 0.01
        return w, b

    return (
        mk(ks[0], ks[1], 8, 8, in_channels, 32),
        mk(ks[2], ks[3], 4, 4, 32, 64),
        mk(ks[4], ks[5], 3, 3, 64, 64),
    )


def _reference_forward(x_nchw, params):
    """Pure-JAX reference (lax.conv) for the correctness check."""
    x = jnp.transpose(x_nchw, (0, 2, 3, 1))
    strides = (4, 2, 1)
    for (w, b), s in zip(params, strides):
        x = lax.conv_general_dilated(
            x, w, window_strides=(s, s), padding="VALID",
            dimension_numbers=("NHWC", "HWIO", "NHWC"))
        x = jnp.maximum(x + b, 0.0)
    return jnp.transpose(x, (0, 3, 1, 2))


if __name__ == "__main__":
    key = jax.random.PRNGKey(0)
    k_x, k_p = jax.random.split(key)

    # Small NCHW input: batch=2, channels=4, spatial=44
    # (44 -> 10 -> 4 -> 2 through the 8/4/3-kernel, 4/2/1-stride conv stack;
    #  spatial must be >= 36 for the stack to be valid).
    x = jax.random.normal(k_x, (2, 4, 44, 44), jnp.float32)
    params = init_params(k_p, in_channels=4)

    out = encoder_forward(x, params)
    out = jax.block_until_ready(out)

    assert out.shape == (2, 64, 2, 2), out.shape

    ref = _reference_forward(x, params)
    assert jnp.allclose(out, ref, rtol=1e-3, atol=1e-3), "mismatch vs reference"

    print("KERNEL_OK")
</pallas_src>

<mosaic_0001>
module attributes {stable_mosaic.version = 11 : i64} {
  func.func @_encoder_kernel(%arg0: i32, %arg1: memref<1x100x256xf32, #tpu.memory_space<vmem>>, %arg2: memref<256x128xf32, #tpu.memory_space<vmem>>, %arg3: memref<1x128xf32, #tpu.memory_space<vmem>>, %arg4: memref<2048x128xf32, #tpu.memory_space<vmem>>, %arg5: memref<1x128xf32, #tpu.memory_space<vmem>>, %arg6: memref<1152x128xf32, #tpu.memory_space<vmem>>, %arg7: memref<1x128xf32, #tpu.memory_space<vmem>>, %arg8: memref<1x4x128xf32, #tpu.memory_space<vmem>>, %arg9: memref<100x128xf32, #tpu.memory_space<vmem>>, %arg10: memref<16x128xf32, #tpu.memory_space<vmem>>) attributes {dimension_semantics = [#tpu.dimension_semantics<parallel>], iteration_bounds = array<i64: 2>, scalar_prefetch = 0 : i64, scratch_operands = 2 : i64, tpu.core_type = #tpu.core_type<tc>, window_params = [{transform_indices = @transform_0, window_bounds = array<i64: 1, 100, 256>}, {pipeline_mode = #tpu.pipeline_mode<synchronous>, transform_indices = @transform_1, window_bounds = array<i64: 256, 128>}, {pipeline_mode = #tpu.pipeline_mode<synchronous>, transform_indices = @transform_2, window_bounds = array<i64: 1, 128>}, {pipeline_mode = #tpu.pipeline_mode<synchronous>, transform_indices = @transform_3, window_bounds = array<i64: 2048, 128>}, {pipeline_mode = #tpu.pipeline_mode<synchronous>, transform_indices = @transform_4, window_bounds = array<i64: 1, 128>}, {pipeline_mode = #tpu.pipeline_mode<synchronous>, transform_indices = @transform_5, window_bounds = array<i64: 1152, 128>}, {pipeline_mode = #tpu.pipeline_mode<synchronous>, transform_indices = @transform_6, window_bounds = array<i64: 1, 128>}, {transform_indices = @transform_7, window_bounds = array<i64: 1, 4, 128>}]} {
    %c0 = arith.constant 0 : index
    %c0_0 = arith.constant 0 : index
    %c0_1 = arith.constant 0 : index
    %0 = vector.load %arg1[%c0, %c0_0, %c0_1] : memref<1x100x256xf32, #tpu.memory_space<vmem>>, vector<1x100x256xf32>
    %1 = vector.shape_cast %0 : vector<1x100x256xf32> to vector<100x256xf32>
    %c0_2 = arith.constant 0 : index
    %c0_3 = arith.constant 0 : index
    %2 = vector.load %arg2[%c0_2, %c0_3] : memref<256x128xf32, #tpu.memory_space<vmem>>, vector<256x128xf32>
    %cst = arith.constant dense<0.000000e+00> : vector<100x128xf32>
    %3 = tpu.matmul %1, %2, %cst {dimension_numbers = #tpu.dot_dimension_numbers<[1], [0], [0], [1], [0, 0, 1, 1], [], []>} : vector<100x256xf32>, vector<256x128xf32>, vector<100x128xf32> -> vector<100x128xf32>
    %c0_4 = arith.constant 0 : index
    %c0_5 = arith.constant 0 : index
    %4 = vector.load %arg3[%c0_4, %c0_5] : memref<1x128xf32, #tpu.memory_space<vmem>>, vector<1x128xf32>
    %5 = vector.broadcast %4 : vector<1x128xf32> to vector<100x128xf32>
    %6 = arith.addf %3, %5 : vector<100x128xf32>
    %cst_6 = arith.constant 0.000000e+00 : f32
    %7 = vector.broadcast %cst_6 : f32 to vector<100x128xf32>
    %8 = arith.maximumf %6, %7 : vector<100x128xf32>
    %c0_7 = arith.constant 0 : index
    %c0_8 = arith.constant 0 : index
    %9 = vector.load %arg9[%c0_7, %c0_8] : memref<100x128xf32, #tpu.memory_space<vmem>>, vector<100x128xf32>
    tpu.vector_store %arg9[%c0_7, %c0_8], %8 {strides = array<i32>} : memref<100x128xf32, #tpu.memory_space<vmem>>, vector<100x128xf32>,
    %c0_9 = arith.constant 0 : index
    %c0_10 = arith.constant 0 : index
    %10 = vector.load %arg9[%c0_9, %c0_10] : memref<100x128xf32, #tpu.memory_space<vmem>>, vector<4x128xf32>
    %c5 = arith.constant 5 : index
    %c0_11 = arith.constant 0 : index
    %11 = vector.load %arg9[%c5, %c0_11] : memref<100x128xf32, #tpu.memory_space<vmem>>, vector<4x128xf32>
    %c1 = arith.constant 1 : index
    %c0_12 = arith.constant 0 : index
    %12 = vector.load %arg9[%c1, %c0_12] : memref<100x128xf32, #tpu.memory_space<vmem>>, vector<4x128xf32>
    %c6 = arith.constant 6 : index
    %c0_13 = arith.constant 0 : index
    %13 = vector.load %arg9[%c6, %c0_13] : memref<100x128xf32, #tpu.memory_space<vmem>>, vector<4x128xf32>
    %c10 = arith.constant 10 : index
    %c0_14 = arith.constant 0 : index
    %14 = vector.load %arg9[%c10, %c0_14] : memref<100x128xf32, #tpu.memory_space<vmem>>, vector<4x128xf32>
    %c15 = arith.constant 15 : index
    %c0_15 = arith.constant 0 : index
    %15 = vector.load %arg9[%c15, %c0_15] : memref<100x128xf32, #tpu.memory_space<vmem>>, vector<4x128xf32>
    %c11 = arith.constant 11 : index
    %c0_16 = arith.constant 0 : index
    %16 = vector.load %arg9[%c11, %c0_16] : memref<100x128xf32, #tpu.memory_space<vmem>>, vector<4x128xf32>
    %c16 = arith.constant 16 : index
    %c0_17 = arith.constant 0 : index
    %17 = vector.load %arg9[%c16, %c0_17] : memref<100x128xf32, #tpu.memory_space<vmem>>, vector<4x128xf32>
    %c20 = arith.constant 20 : index
    %c0_18 = arith.constant 0 : index
    %18 = vector.load %arg9[%c20, %c0_18] : memref<100x128xf32, #tpu.memory_space<vmem>>, vector<4x128xf32>
    %c25 = arith.constant 25 : index
    %c0_19 = arith.constant 0 : index
    %19 = vector.load %arg9[%c25, %c0_19] : memref<100x128xf32, #tpu.memory_space<vmem>>, vector<4x128xf32>
    %c21 = arith.constant 21 : index
    %c0_20 = arith.constant 0 : index
    %20 = vector.load %arg9[%c21, %c0_20] : memref<100x128xf32, #tpu.memory_space<vmem>>, vector<4x128xf32>
    %c26 = arith.constant 26 : index
    %c0_21 = arith.constant 0 : index
    %21 = vector.load %arg9[%c26, %c0_21] : memref<100x128xf32, #tpu.memory_space<vmem>>, vector<4x128xf32>
    %c30 = arith.constant 30 : index
    %c0_22 = arith.constant 0 : index
    %22 = vector.load %arg9[%c30, %c0_22] : memref<100x128xf32, #tpu.memory_space<vmem>>, vector<4x128xf32>
    %c35 = arith.constant 35 : index
    %c0_23 = arith.constant 0 : index
    %23 = vector.load %arg9[%c35, %c0_23] : memref<100x128xf32, #tpu.memory_space<vmem>>, vector<4x128xf32>
    %c31 = arith.constant 31 : index
    %c0_24 = arith.constant 0 : index
    %24 = vector.load %arg9[%c31, %c0_24] : memref<100x128xf32, #tpu.memory_space<vmem>>, vector<4x128xf32>
    %c36 = arith.constant 36 : index
    %c0_25 = arith.constant 0 : index
    %25 = vector.load %arg9[%c36, %c0_25] : memref<100x128xf32, #tpu.memory_space<vmem>>, vector<4x128xf32>
    %26 = tpu.concatenate %10, %11, %12, %13, %14, %15, %16, %17, %18, %19, %20, %21, %22, %23, %24, %25 in 1 : vector<4x128xf32>, vector<4x128xf32>, vector<4x128xf32>, vector<4x128xf32>, vector<4x128xf32>, vector<4x128xf32>, vector<4x128xf32>, vector<4x128xf32>, vector<4x128xf32>, vector<4x128xf32>, vector<4x128xf32>, vector<4x128xf32>, vector<4x128xf32>, vector<4x128xf32>, vector<4x128xf32>, vector<4x128xf32> -> vector<4x2048xf32>
    %c0_26 = arith.constant 0 : index
    %c0_27 = arith.constant 0 : index
    %27 = vector.load %arg4[%c0_26, %c0_27] : memref<2048x128xf32, #tpu.memory_space<vmem>>, vector<2048x128xf32>
    %cst_28 = arith.constant dense<0.000000e+00> : vector<4x128xf32>
    %28 = tpu.matmul %26, %27, %cst_28 {dimension_numbers = #tpu.dot_dimension_numbers<[1], [0], [0], [1], [0, 0, 1, 1], [], []>} : vector<4x2048xf32>, vector<2048x128xf32>, vector<4x128xf32> -> vector<4x128xf32>
    %c0_29 = arith.constant 0 : index
    %c0_30 = arith.constant 0 : index
    %29 = vector.load %arg5[%c0_29, %c0_30] : memref<1x128xf32, #tpu.memory_space<vmem>>, vector<1x128xf32>
    %30 = vector.broadcast %29 : vector<1x128xf32> to vector<4x128xf32>
    %31 = arith.addf %28, %30 : vector<4x128xf32>
    %cst_31 = arith.constant 0.000000e+00 : f32
    %32 = vector.broadcast %cst_31 : f32 to vector<4x128xf32>
    %33 = arith.maximumf %31, %32 : vector<4x128xf32>
    %c0_32 = arith.constant 0 : index
    %c0_33 = arith.constant 0 : index
    %34 = vector.load %arg10[%c0_32, %c0_33] : memref<16x128xf32, #tpu.memory_space<vmem>>, vector<4x128xf32>
    tpu.vector_store %arg10[%c0_32, %c0_33], %33 {strides = array<i32>} : memref<16x128xf32, #tpu.memory_space<vmem>>, vector<4x128xf32>,
    %c20_34 = arith.constant 20 : index
    %c0_35 = arith.constant 0 : index
    %35 = vector.load %arg9[%c20_34, %c0_35] : memref<100x128xf32, #tpu.memory_space<vmem>>, vector<4x128xf32>
    %c25_36 = arith.constant 25 : index
    %c0_37 = arith.constant 0 : index
    %36 = vector.load %arg9[%c25_36, %c0_37] : memref<100x128xf32, #tpu.memory_space<vmem>>, vector<4x128xf32>
    %c21_38 = arith.constant 21 : index
    %c0_39 = arith.constant 0 : index
    %37 = vector.load %arg9[%c21_38, %c0_39] : memref<100x128xf32, #tpu.memory_space<vmem>>, vector<4x128xf32>
    %c26_40 = arith.constant 26 : index
    %c0_41 = arith.constant 0 : index
    %38 = vector.load %arg9[%c26_40, %c0_41] : memref<100x128xf32, #tpu.memory_space<vmem>>, vector<4x128xf32>
    %c30_42 = arith.constant 30 : index
    %c0_43 = arith.constant 0 : index
    %39 = vector.load %arg9[%c30_42, %c0_43] : memref<100x128xf32, #tpu.memory_space<vmem>>, vector<4x128xf32>
    %c35_44 = arith.constant 35 : index
    %c0_45 = arith.constant 0 : index
    %40 = vector.load %arg9[%c35_44, %c0_45] : memref<100x128xf32, #tpu.memory_space<vmem>>, vector<4x128xf32>
    %c31_46 = arith.constant 31 : index
    %c0_47 = arith.constant 0 : index
    %41 = vector.load %arg9[%c31_46, %c0_47] : memref<100x128xf32, #tpu.memory_space<vmem>>, vector<4x128xf32>
    %c36_48 = arith.constant 36 : index
    %c0_49 = arith.constant 0 : index
    %42 = vector.load %arg9[%c36_48, %c0_49] : memref<100x128xf32, #tpu.memory_space<vmem>>, vector<4x128xf32>
    %c40 = arith.constant 40 : index
    %c0_50 = arith.constant 0 : index
    %43 = vector.load %arg9[%c40, %c0_50] : memref<100x128xf32, #tpu.memory_space<vmem>>, vector<4x128xf32>
    %c45 = arith.constant 45 : index
    %c0_51 = arith.constant 0 : index
    %44 = vector.load %arg9[%c45, %c0_51] : memref<100x128xf32, #tpu.memory_space<vmem>>, vector<4x128xf32>
    %c41 = arith.constant 41 : index
    %c0_52 = arith.constant 0 : index
    %45 = vector.load %arg9[%c41, %c0_52] : memref<100x128xf32, #tpu.memory_space<vmem>>, vector<4x128xf32>
    %c46 = arith.constant 46 : index
    %c0_53 = arith.constant 0 : index
    %46 = vector.load %arg9[%c46, %c0_53] : memref<100x128xf32, #tpu.memory_space<vmem>>, vector<4x128xf32>
    %c50 = arith.constant 50 : index
    %c0_54 = arith.constant 0 : index
    %47 = vector.load %arg9[%c50, %c0_54] : memref<100x128xf32, #tpu.memory_space<vmem>>, vector<4x128xf32>
    %c55 = arith.constant 55 : index
    %c0_55 = arith.constant 0 : index
    %48 = vector.load %arg9[%c55, %c0_55] : memref<100x128xf32, #tpu.memory_space<vmem>>, vector<4x128xf32>
    %c51 = arith.constant 51 : index
    %c0_56 = arith.constant 0 : index
    %49 = vector.load %arg9[%c51, %c0_56] : memref<100x128xf32, #tpu.memory_space<vmem>>, vector<4x128xf32>
    %c56 = arith.constant 56 : index
    %c0_57 = arith.constant 0 : index
    %50 = vector.load %arg9[%c56, %c0_57] : memref<100x128xf32, #tpu.memory_space<vmem>>, vector<4x128xf32>
    %51 = tpu.concatenate %35, %36, %37, %38, %39, %40, %41, %42, %43, %44, %45, %46, %47, %48, %49, %50 in 1 : vector<4x128xf32>, vector<4x128xf32>, vector<4x128xf32>, vector<4x128xf32>, vector<4x128xf32>, vector<4x128xf32>, vector<4x128xf32>, vector<4x128xf32>, vector<4x128xf32>, vector<4x128xf32>, vector<4x128xf32>, vector<4x128xf32>, vector<4x128xf32>, vector<4x128xf32>, vector<4x128xf32>, vector<4x128xf32> -> vector<4x2048xf32>
    %c0_58 = arith.constant 0 : index
    %c0_59 = arith.constant 0 : index
    %52 = vector.load %arg4[%c0_58, %c0_59] : memref<2048x128xf32, #tpu.memory_space<vmem>>, vector<2048x128xf32>
    %cst_60 = arith.constant dense<0.000000e+00> : vector<4x128xf32>
    %53 = tpu.matmul %51, %52, %cst_60 {dimension_numbers = #tpu.dot_dimension_numbers<[1], [0], [0], [1], [0, 0, 1, 1], [], []>} : vector<4x2048xf32>, vector<2048x128xf32>, vector<4x128xf32> -> vector<4x128xf32>
    %c0_61 = arith.constant 0 : index
    %c0_62 = arith.constant 0 : index
    %54 = vector.load %arg5[%c0_61, %c0_62] : memref<1x128xf32, #tpu.memory_space<vmem>>, vector<1x128xf32>
    %55 = vector.broadcast %54 : vector<1x128xf32> to vector<4x128xf32>
    %56 = arith.addf %53, %55 : vector<4x128xf32>
    %cst_63 = arith.constant 0.000000e+00 : f32
    %57 = vector.broadcast %cst_63 : f32 to vector<4x128xf32>
    %58 = arith.maximumf %56, %57 : vector<4x128xf32>
    %c4 = arith.constant 4 : index
    %c0_64 = arith.constant 0 : index
    %59 = vector.load %arg10[%c4, %c0_64] : memref<16x128xf32, #tpu.memory_space<vmem>>, vector<4x128xf32>
    tpu.vector_store %arg10[%c4, %c0_64], %58 {strides = array<i32>} : memref<16x128xf32, #tpu.memory_space<vmem>>, vector<4x128xf32>,
    %c40_65 = arith.constant 40 : index
    %c0_66 = arith.constant 0 : index
    %60 = vector.load %arg9[%c40_65, %c0_66] : memref<100x128xf32, #tpu.memory_space<vmem>>, vector<4x128xf32>
    %c45_67 = arith.constant 45 : index
    %c0_68 = arith.constant 0 : index
    %61 = vector.load %arg9[%c45_67, %c0_68] : memref<100x128xf32, #tpu.memory_space<vmem>>, vector<4x128xf32>
    %c41_69 = arith.constant 41 : index
    %c0_70 = arith.constant 0 : index
    %62 = vector.load %arg9[%c41_69, %c0_70] : memref<100x128xf32, #tpu.memory_space<vmem>>, vector<4x128xf32>
    %c46_71 = arith.constant 46 : index
    %c0_72 = arith.constant 0 : index
    %63 = vector.load %arg9[%c46_71, %c0_72] : memref<100x128xf32, #tpu.memory_space<vmem>>, vector<4x128xf32>
    %c50_73 = arith.constant 50 : index
    %c0_74 = arith.constant 0 : index
    %64 = vector.load %arg9[%c50_73, %c0_74] : memref<100x128xf32, #tpu.memory_space<vmem>>, vector<4x128xf32>
    %c55_75 = arith.constant 55 : index
    %c0_76 = arith.constant 0 : index
    %65 = vector.load %arg9[%c55_75, %c0_76] : memref<100x128xf32, #tpu.memory_space<vmem>>, vector<4x128xf32>
    %c51_77 = arith.constant 51 : index
    %c0_78 = arith.constant 0 : index
    %66 = vector.load %arg9[%c51_77, %c0_78] : memref<100x128xf32, #tpu.memory_space<vmem>>, vector<4x128xf32>
    %c56_79 = arith.constant 56 : index
    %c0_80 = arith.constant 0 : index
    %67 = vector.load %arg9[%c56_79, %c0_80] : memref<100x128xf32, #tpu.memory_space<vmem>>, vector<4x128xf32>
    %c60 = arith.constant 60 : index
    %c0_81 = arith.constant 0 : index
    %68 = vector.load %arg9[%c60, %c0_81] : memref<100x128xf32, #tpu.memory_space<vmem>>, vector<4x128xf32>
    %c65 = arith.constant 65 : index
    %c0_82 = arith.constant 0 : index
    %69 = vector.load %arg9[%c65, %c0_82] : memref<100x128xf32, #tpu.memory_space<vmem>>, vector<4x128xf32>
    %c61 = arith.constant 61 : index
    %c0_83 = arith.constant 0 : index
    %70 = vector.load %arg9[%c61, %c0_83] : memref<100x128xf32, #tpu.memory_space<vmem>>, vector<4x128xf32>
    %c66 = arith.constant 66 : index
    %c0_84 = arith.constant 0 : index
    %71 = vector.load %arg9[%c66, %c0_84] : memref<100x128xf32, #tpu.memory_space<vmem>>, vector<4x128xf32>
    %c70 = arith.constant 70 : index
    %c0_85 = arith.constant 0 : index
    %72 = vector.load %arg9[%c70, %c0_85] : memref<100x128xf32, #tpu.memory_space<vmem>>, vector<4x128xf32>
    %c75 = arith.constant 75 : index
    %c0_86 = arith.constant 0 : index
    %73 = vector.load %arg9[%c75, %c0_86] : memref<100x128xf32, #tpu.memory_space<vmem>>, vector<4x128xf32>
    %c71 = arith.constant 71 : index
    %c0_87 = arith.constant 0 : index
    %74 = vector.load %arg9[%c71, %c0_87] : memref<100x128xf32, #tpu.memory_space<vmem>>, vector<4x128xf32>
    %c76 = arith.constant 76 : index
    %c0_88 = arith.constant 0 : index
    %75 = vector.load %arg9[%c76, %c0_88] : memref<100x128xf32, #tpu.memory_space<vmem>>, vector<4x128xf32>
    %76 = tpu.concatenate %60, %61, %62, %63, %64, %65, %66, %67, %68, %69, %70, %71, %72, %73, %74, %75 in 1 : vector<4x128xf32>, vector<4x128xf32>, vector<4x128xf32>, vector<4x128xf32>, vector<4x128xf32>, vector<4x128xf32>, vector<4x128xf32>, vector<4x128xf32>, vector<4x128xf32>, vector<4x128xf32>, vector<4x128xf32>, vector<4x128xf32>, vector<4x128xf32>, vector<4x128xf32>, vector<4x128xf32>, vector<4x128xf32> -> vector<4x2048xf32>
    %c0_89 = arith.constant 0 : index
    %c0_90 = arith.constant 0 : index
    %77 = vector.load %arg4[%c0_89, %c0_90] : memref<2048x128xf32, #tpu.memory_space<vmem>>, vector<2048x128xf32>
    %cst_91 = arith.constant dense<0.000000e+00> : vector<4x128xf32>
    %78 = tpu.matmul %76, %77, %cst_91 {dimension_numbers = #tpu.dot_dimension_numbers<[1], [0], [0], [1], [0, 0, 1, 1], [], []>} : vector<4x2048xf32>, vector<2048x128xf32>, vector<4x128xf32> -> vector<4x128xf32>
    %c0_92 = arith.constant 0 : index
    %c0_93 = arith.constant 0 : index
    %79 = vector.load %arg5[%c0_92, %c0_93] : memref<1x128xf32, #tpu.memory_space<vmem>>, vector<1x128xf32>
    %80 = vector.broadcast %79 : vector<1x128xf32> to vector<4x128xf32>
    %81 = arith.addf %78, %80 : vector<4x128xf32>
    %cst_94 = arith.constant 0.000000e+00 : f32
    %82 = vector.broadcast %cst_94 : f32 to vector<4x128xf32>
    %83 = arith.maximumf %81, %82 : vector<4x128xf32>
    %c8 = arith.constant 8 : index
    %c0_95 = arith.constant 0 : index
    %84 = vector.load %arg10[%c8, %c0_95] : memref<16x128xf32, #tpu.memory_space<vmem>>, vector<4x128xf32>
    tpu.vector_store %arg10[%c8, %c0_95], %83 {strides = array<i32>} : memref<16x128xf32, #tpu.memory_space<vmem>>, vector<4x128xf32>,
    %c60_96 = arith.constant 60 : index
    %c0_97 = arith.constant 0 : index
    %85 = vector.load %arg9[%c60_96, %c0_97] : memref<100x128xf32, #tpu.memory_space<vmem>>, vector<4x128xf32>
    %c65_98 = arith.constant 65 : index
    %c0_99 = arith.constant 0 : index
    %86 = vector.load %arg9[%c65_98, %c0_99] : memref<100x128xf32, #tpu.memory_space<vmem>>, vector<4x128xf32>
    %c61_100 = arith.constant 61 : index
    %c0_101 = arith.constant 0 : index
    %87 = vector.load %arg9[%c61_100, %c0_101] : memref<100x128xf32, #tpu.memory_space<vmem>>, vector<4x128xf32>
    %c66_102 = arith.constant 66 : index
    %c0_103 = arith.constant 0 : index
    %88 = vector.load %arg9[%c66_102, %c0_103] : memref<100x128xf32, #tpu.memory_space<vmem>>, vector<4x128xf32>
    %c70_104 = arith.constant 70 : index
    %c0_105 = arith.constant 0 : index
    %89 = vector.load %arg9[%c70_104, %c0_105] : memref<100x128xf32, #tpu.memory_space<vmem>>, vector<4x128xf32>
    %c75_106 = arith.constant 75 : index
    %c0_107 = arith.constant 0 : index
    %90 = vector.load %arg9[%c75_106, %c0_107] : memref<100x128xf32, #tpu.memory_space<vmem>>, vector<4x128xf32>
    %c71_108 = arith.constant 71 : index
    %c0_109 = arith.constant 0 : index
    %91 = vector.load %arg9[%c71_108, %c0_109] : memref<100x128xf32, #tpu.memory_space<vmem>>, vector<4x128xf32>
    %c76_110 = arith.constant 76 : index
    %c0_111 = arith.constant 0 : index
    %92 = vector.load %arg9[%c76_110, %c0_111] : memref<100x128xf32, #tpu.memory_space<vmem>>, vector<4x128xf32>
    %c80 = arith.constant 80 : index
    %c0_112 = arith.constant 0 : index
    %93 = vector.load %arg9[%c80, %c0_112] : memref<100x128xf32, #tpu.memory_space<vmem>>, vector<4x128xf32>
    %c85 = arith.constant 85 : index
    %c0_113 = arith.constant 0 : index
    %94 = vector.load %arg9[%c85, %c0_113] : memref<100x128xf32, #tpu.memory_space<vmem>>, vector<4x128xf32>
    %c81 = arith.constant 81 : index
    %c0_114 = arith.constant 0 : index
    %95 = vector.load %arg9[%c81, %c0_114] : memref<100x128xf32, #tpu.memory_space<vmem>>, vector<4x128xf32>
    %c86 = arith.constant 86 : index
    %c0_115 = arith.constant 0 : index
    %96 = vector.load %arg9[%c86, %c0_115] : memref<100x128xf32, #tpu.memory_space<vmem>>, vector<4x128xf32>
    %c90 = arith.constant 90 : index
    %c0_116 = arith.constant 0 : index
    %97 = vector.load %arg9[%c90, %c0_116] : memref<100x128xf32, #tpu.memory_space<vmem>>, vector<4x128xf32>
    %c95 = arith.constant 95 : index
    %c0_117 = arith.constant 0 : index
    %98 = vector.load %arg9[%c95, %c0_117] : memref<100x128xf32, #tpu.memory_space<vmem>>, vector<4x128xf32>
    %c91 = arith.constant 91 : index
    %c0_118 = arith.constant 0 : index
    %99 = vector.load %arg9[%c91, %c0_118] : memref<100x128xf32, #tpu.memory_space<vmem>>, vector<4x128xf32>
    %c96 = arith.constant 96 : index
    %c0_119 = arith.constant 0 : index
    %100 = vector.load %arg9[%c96, %c0_119] : memref<100x128xf32, #tpu.memory_space<vmem>>, vector<4x128xf32>
    %101 = tpu.concatenate %85, %86, %87, %88, %89, %90, %91, %92, %93, %94, %95, %96, %97, %98, %99, %100 in 1 : vector<4x128xf32>, vector<4x128xf32>, vector<4x128xf32>, vector<4x128xf32>, vector<4x128xf32>, vector<4x128xf32>, vector<4x128xf32>, vector<4x128xf32>, vector<4x128xf32>, vector<4x128xf32>, vector<4x128xf32>, vector<4x128xf32>, vector<4x128xf32>, vector<4x128xf32>, vector<4x128xf32>, vector<4x128xf32> -> vector<4x2048xf32>
    %c0_120 = arith.constant 0 : index
    %c0_121 = arith.constant 0 : index
    %102 = vector.load %arg4[%c0_120, %c0_121] : memref<2048x128xf32, #tpu.memory_space<vmem>>, vector<2048x128xf32>
    %cst_122 = arith.constant dense<0.000000e+00> : vector<4x128xf32>
    %103 = tpu.matmul %101, %102, %cst_122 {dimension_numbers = #tpu.dot_dimension_numbers<[1], [0], [0], [1], [0, 0, 1, 1], [], []>} : vector<4x2048xf32>, vector<2048x128xf32>, vector<4x128xf32> -> vector<4x128xf32>
    %c0_123 = arith.constant 0 : index
    %c0_124 = arith.constant 0 : index
    %104 = vector.load %arg5[%c0_123, %c0_124] : memref<1x128xf32, #tpu.memory_space<vmem>>, vector<1x128xf32>
    %105 = vector.broadcast %104 : vector<1x128xf32> to vector<4x128xf32>
    %106 = arith.addf %103, %105 : vector<4x128xf32>
    %cst_125 = arith.constant 0.000000e+00 : f32
    %107 = vector.broadcast %cst_125 : f32 to vector<4x128xf32>
    %108 = arith.maximumf %106, %107 : vector<4x128xf32>
    %c12 = arith.constant 12 : index
    %c0_126 = arith.constant 0 : index
    %109 = vector.load %arg10[%c12, %c0_126] : memref<16x128xf32, #tpu.memory_space<vmem>>, vector<4x128xf32>
    tpu.vector_store %arg10[%c12, %c0_126], %108 {strides = array<i32>} : memref<16x128xf32, #tpu.memory_space<vmem>>, vector<4x128xf32>,
    %c0_127 = arith.constant 0 : index
    %c0_128 = arith.constant 0 : index
    %110 = vector.load %arg10[%c0_127, %c0_128] : memref<16x128xf32, #tpu.memory_space<vmem>>, vector<2x128xf32>
    %c1_129 = arith.constant 1 : index
    %c0_130 = arith.constant 0 : index
    %111 = vector.load %arg10[%c1_129, %c0_130] : memref<16x128xf32, #tpu.memory_space<vmem>>, vector<2x128xf32>
    %c2 = arith.constant 2 : index
    %c0_131 = arith.constant 0 : index
    %112 = vector.load %arg10[%c2, %c0_131] : memref<16x128xf32, #tpu.memory_space<vmem>>, vector<2x128xf32>
    %c4_132 = arith.constant 4 : index
    %c0_133 = arith.constant 0 : index
    %113 = vector.load %arg10[%c4_132, %c0_133] : memref<16x128xf32, #tpu.memory_space<vmem>>, vector<2x128xf32>
    %c5_134 = arith.constant 5 : index
    %c0_135 = arith.constant 0 : index
    %114 = vector.load %arg10[%c5_134, %c0_135] : memref<16x128xf32, #tpu.memory_space<vmem>>, vector<2x128xf32>
    %c6_136 = arith.constant 6 : index
    %c0_137 = arith.constant 0 : index
    %115 = vector.load %arg10[%c6_136, %c0_137] : memref<16x128xf32, #tpu.memory_space<vmem>>, vector<2x128xf32>
    %c8_138 = arith.constant 8 : index
    %c0_139 = arith.constant 0 : index
    %116 = vector.load %arg10[%c8_138, %c0_139] : memref<16x128xf32, #tpu.memory_space<vmem>>, vector<2x128xf32>
    %c9 = arith.constant 9 : index
    %c0_140 = arith.constant 0 : index
    %117 = vector.load %arg10[%c9, %c0_140] : memref<16x128xf32, #tpu.memory_space<vmem>>, vector<2x128xf32>
    %c10_141 = arith.constant 10 : index
    %c0_142 = arith.constant 0 : index
    %118 = vector.load %arg10[%c10_141, %c0_142] : memref<16x128xf32, #tpu.memory_space<vmem>>, vector<2x128xf32>
    %119 = tpu.concatenate %110, %111, %112, %113, %114, %115, %116, %117, %118 in 1 : vector<2x128xf32>, vector<2x128xf32>, vector<2x128xf32>, vector<2x128xf32>, vector<2x128xf32>, vector<2x128xf32>, vector<2x128xf32>, vector<2x128xf32>, vector<2x128xf32> -> vector<2x1152xf32>
    %c0_143 = arith.constant 0 : index
    %c0_144 = arith.constant 0 : index
    %120 = vector.load %arg6[%c0_143, %c0_144] : memref<1152x128xf32, #tpu.memory_space<vmem>>, vector<1152x128xf32>
    %cst_145 = arith.constant dense<0.000000e+00> : vector<2x128xf32>
    %121 = tpu.matmul %119, %120, %cst_145 {dimension_numbers = #tpu.dot_dimension_numbers<[1], [0], [0], [1], [0, 0, 1, 1], [], []>} : vector<2x1152xf32>, vector<1152x128xf32>, vector<2x128xf32> -> vector<2x128xf32>
    %c0_146 = arith.constant 0 : index
    %c0_147 = arith.constant 0 : index
    %122 = vector.load %arg7[%c0_146, %c0_147] : memref<1x128xf32, #tpu.memory_space<vmem>>, vector<1x128xf32>
    %123 = vector.broadcast %122 : vector<1x128xf32> to vector<2x128xf32>
    %124 = arith.addf %121, %123 : vector<2x128xf32>
    %cst_148 = arith.constant 0.000000e+00 : f32
    %125 = vector.broadcast %cst_148 : f32 to vector<2x128xf32>
    %126 = arith.maximumf %124, %125 : vector<2x128xf32>
    %c0_149 = arith.constant 0 : index
    %c0_150 = arith.constant 0 : index
    %c0_151 = arith.constant 0 : index
    %127 = vector.load %arg8[%c0_149, %c0_150, %c0_151] : memref<1x4x128xf32, #tpu.memory_space<vmem>>, vector<1x2x128xf32>
    %128 = vector.shape_cast %127 : vector<1x2x128xf32> to vector<2x128xf32>
    %129 = vector.shape_cast %126 : vector<2x128xf32> to vector<1x2x128xf32>
    tpu.vector_store %arg8[%c0_149, %c0_150, %c0_151], %129 {strides = array<i32>} : memref<1x4x128xf32, #tpu.memory_space<vmem>>, vector<1x2x128xf32>,
    %c4_152 = arith.constant 4 : index
    %c0_153 = arith.constant 0 : index
    %130 = vector.load %arg10[%c4_152, %c0_153] : memref<16x128xf32, #tpu.memory_space<vmem>>, vector<2x128xf32>
    %c5_154 = arith.constant 5 : index
    %c0_155 = arith.constant 0 : index
    %131 = vector.load %arg10[%c5_154, %c0_155] : memref<16x128xf32, #tpu.memory_space<vmem>>, vector<2x128xf32>
    %c6_156 = arith.constant 6 : index
    %c0_157 = arith.constant 0 : index
    %132 = vector.load %arg10[%c6_156, %c0_157] : memref<16x128xf32, #tpu.memory_space<vmem>>, vector<2x128xf32>
    %c8_158 = arith.constant 8 : index
    %c0_159 = arith.constant 0 : index
    %133 = vector.load %arg10[%c8_158, %c0_159] : memref<16x128xf32, #tpu.memory_space<vmem>>, vector<2x128xf32>
    %c9_160 = arith.constant 9 : index
    %c0_161 = arith.constant 0 : index
    %134 = vector.load %arg10[%c9_160, %c0_161] : memref<16x128xf32, #tpu.memory_space<vmem>>, vector<2x128xf32>
    %c10_162 = arith.constant 10 : index
    %c0_163 = arith.constant 0 : index
    %135 = vector.load %arg10[%c10_162, %c0_163] : memref<16x128xf32, #tpu.memory_space<vmem>>, vector<2x128xf32>
    %c12_164 = arith.constant 12 : index
    %c0_165 = arith.constant 0 : index
    %136 = vector.load %arg10[%c12_164, %c0_165] : memref<16x128xf32, #tpu.memory_space<vmem>>, vector<2x128xf32>
    %c13 = arith.constant 13 : index
    %c0_166 = arith.constant 0 : index
    %137 = vector.load %arg10[%c13, %c0_166] : memref<16x128xf32, #tpu.memory_space<vmem>>, vector<2x128xf32>
    %c14 = arith.constant 14 : index
    %c0_167 = arith.constant 0 : index
    %138 = vector.load %arg10[%c14, %c0_167] : memref<16x128xf32, #tpu.memory_space<vmem>>, vector<2x128xf32>
    %139 = tpu.concatenate %130, %131, %132, %133, %134, %135, %136, %137, %138 in 1 : vector<2x128xf32>, vector<2x128xf32>, vector<2x128xf32>, vector<2x128xf32>, vector<2x128xf32>, vector<2x128xf32>, vector<2x128xf32>, vector<2x128xf32>, vector<2x128xf32> -> vector<2x1152xf32>
    %c0_168 = arith.constant 0 : index
    %c0_169 = arith.constant 0 : index
    %140 = vector.load %arg6[%c0_168, %c0_169] : memref<1152x128xf32, #tpu.memory_space<vmem>>, vector<1152x128xf32>
    %cst_170 = arith.constant dense<0.000000e+00> : vector<2x128xf32>
    %141 = tpu.matmul %139, %140, %cst_170 {dimension_numbers = #tpu.dot_dimension_numbers<[1], [0], [0], [1], [0, 0, 1, 1], [], []>} : vector<2x1152xf32>, vector<1152x128xf32>, vector<2x128xf32> -> vector<2x128xf32>
    %c0_171 = arith.constant 0 : index
    %c0_172 = arith.constant 0 : index
    %142 = vector.load %arg7[%c0_171, %c0_172] : memref<1x128xf32, #tpu.memory_space<vmem>>, vector<1x128xf32>
    %143 = vector.broadcast %142 : vector<1x128xf32> to vector<2x128xf32>
    %144 = arith.addf %141, %143 : vector<2x128xf32>
    %cst_173 = arith.constant 0.000000e+00 : f32
    %145 = vector.broadcast %cst_173 : f32 to vector<2x128xf32>
    %146 = arith.maximumf %144, %145 : vector<2x128xf32>
    %c0_174 = arith.constant 0 : index
    %c2_175 = arith.constant 2 : index
    %c0_176 = arith.constant 0 : index
    %147 = vector.load %arg8[%c0_174, %c2_175, %c0_176] : memref<1x4x128xf32, #tpu.memory_space<vmem>>, vector<1x2x128xf32>
    %148 = vector.shape_cast %147 : vector<1x2x128xf32> to vector<2x128xf32>
    %149 = vector.shape_cast %146 : vector<2x128xf32> to vector<1x2x128xf32>
    tpu.vector_store %arg8[%c0_174, %c2_175, %c0_176], %149 {strides = array<i32>} : memref<1x4x128xf32, #tpu.memory_space<vmem>>, vector<1x2x128xf32>,
    return
  }
  func.func @transform_0(%arg0: i32) -> (i32, i32, i32) {
    %c0_i32 = arith.constant 0 : i32
    %c0_i32_0 = arith.constant 0 : i32
    %c0_i32_1 = arith.constant 0 : i32
    return %arg0, %c0_i32, %c0_i32_0 : i32, i32, i32
  }
  func.func @transform_1(%arg0: i32) -> (i32, i32) {
    %c0_i32 = arith.constant 0 : i32
    %c0_i32_0 = arith.constant 0 : i32
    %c0_i32_1 = arith.constant 0 : i32
    return %c0_i32, %c0_i32_0 : i32, i32
  }
  func.func @transform_2(%arg0: i32) -> (i32, i32) {
    %c0_i32 = arith.constant 0 : i32
    %c0_i32_0 = arith.constant 0 : i32
    %c0_i32_1 = arith.constant 0 : i32
    return %c0_i32, %c0_i32_0 : i32, i32
  }
  func.func @transform_3(%arg0: i32) -> (i32, i32) {
    %c0_i32 = arith.constant 0 : i32
    %c0_i32_0 = arith.constant 0 : i32
    %c0_i32_1 = arith.constant 0 : i32
    return %c0_i32, %c0_i32_0 : i32, i32
  }
  func.func @transform_4(%arg0: i32) -> (i32, i32) {
    %c0_i32 = arith.constant 0 : i32
    %c0_i32_0 = arith.constant 0 : i32
    %c0_i32_1 = arith.constant 0 : i32
    return %c0_i32, %c0_i32_0 : i32, i32
  }
  func.func @transform_5(%arg0: i32) -> (i32, i32) {
    %c0_i32 = arith.constant 0 : i32
    %c0_i32_0 = arith.constant 0 : i32
    %c0_i32_1 = arith.constant 0 : i32
    return %c0_i32, %c0_i32_0 : i32, i32
  }
  func.func @transform_6(%arg0: i32) -> (i32, i32) {
    %c0_i32 = arith.constant 0 : i32
    %c0_i32_0 = arith.constant 0 : i32
    %c0_i32_1 = arith.constant 0 : i32
    return %c0_i32, %c0_i32_0 : i32, i32
  }
  func.func @transform_7(%arg0: i32) -> (i32, i32, i32) {
    %c0_i32 = arith.constant 0 : i32
    %c0_i32_0 = arith.constant 0 : i32
    %c0_i32_1 = arith.constant 0 : i32
    return %arg0, %c0_i32, %c0_i32_0 : i32, i32, i32
  }
}

</mosaic_0001>

<bundles_post_ra>
// kernel: encoder_forward.1
= control target key start
LH: loop header
LB: loop body
LE: loop exit
PB: predicated region body
PF: predicated region fallthrough
CT: control target
= control target key end

     0   :  { %12 = vsyncpa [#allocation5], 0  ;;  %s8060_s0 = inlined_call_operand.vmem [shape: f32[2,100,256], index: 0, kind: input, shape index: {}]   ;;  %s8061_s1 = inlined_call_operand.vmem [shape: f32[256,128], index: 1, kind: input, shape index: {}]   ;;  %s8062_s2 = inlined_call_operand.vmem [shape: f32[1,128], index: 2, kind: input, shape index: {}]   ;;  %s8063_s3 = inlined_call_operand.vmem [shape: f32[2048,128], index: 3, kind: input, shape index: {}]   ;;  %s8064_s4 = inlined_call_operand.vmem [shape: f32[1,128], index: 4, kind: input, shape index: {}]   ;;  %s8065_s5 = inlined_call_operand.vmem [shape: f32[1152,128], index: 5, kind: input, shape index: {}]   ;;  %s8066_s6 = inlined_call_operand.vmem [shape: f32[1,128], index: 6, kind: input, shape index: {}]   ;;  %s8067_s7 = inlined_call_operand.hbm [shape: f32[2,4,128], index: 7, kind: output, shape index: {}]  }
   0x1   :  { %14 = vsyncpa [#allocation5 + $0x1], 0  ;;  %s3784_s24 = smov 0   ;;  %s3786_s25 = smov 0  }
   0x2   :  { %s3788_s26 = smov 0   ;;  %s3790_s27 = smov 0  }
   0x3 LB: > { %s3805_s28 = sadd.s32 4294967295, %s3742_s27   ;;  %s3622_s29 = sadd.s32 4294967294, %s3742_s27   ;;  %s3742_s27 = sphi %s3790_s27, %s8073_s27   ;;  %s3738_s26 = sphi %s3788_s26, %s8072_s26   ;;  %s3734_s25 = sphi %s3786_s25, %s8071_s25   ;;  %s3730_s24 = sphi %s3784_s24, %s8070_s24  }
   0x4   : > { %s3809_s30 = sadd.s32 1, %s3742_s27   ;;  %s179_s8 = sadd.s32 1, %s3738_s26 }
   0x5   : > { %s176_s9 = ssub.s32 %s3742_s27, %s3809_s30  ;;  %p189_p0 = scmp.ne.s32.totalorder %s3738_s26, %s3734_s25 }
   0x6   : > { %p177_p1 = scmp.eq.s32.totalorder %s176_s9, 0  ;;  %p190_p2 = scmp.eq.s32.totalorder %s3805_s28, 1 }
   0x7   : > { %p195_p3 = scmp.ne.s32.totalorder %s3734_s25, %s3730_s24  ;;  %p196_p4 = scmp.eq.s32.totalorder %s3622_s29, 1 }
   0x8   : > { %s3820_s10 = scalar_select %p177_p1, %s3738_s26, %s179_s8  }
   0x9   : > { %p3822_p5 = por %p190_p2, %p189_p0  ;;  %p3826_p6 = por %p196_p4, %p195_p3 }
   0xa   : > { %p3625_p7 = scmp.ge.s32.totalorder %s3742_s27, 1  ;;  %p240_p8 = scmp.lt.s32.totalorder %s3742_s27, 3 }
   0xc   : > { %p241_p9 = pnand %p3625_p7, %p240_p8 }
   0xd   : > { %p272_p10 = scmp.lt.s32.totalorder (!%p241_p9), %s3805_s28, 1  ;;  %s269_s20 = sand.u32 (!%p241_p9), 1, %s3734_s25  }
   0xe   : > { %244 = sbr.rel (%p241_p9) target bundleno = 1027 (0x403), region = 48  ;;  %s3626_s22 = sshll.u32 (!%p241_p9), %s269_s20, 2 }
   0xf   : > { %s271_s23 = scalar_lea.vmem (!%p241_p9), [#allocation4], %s3626_s22  ;;  %s3700_s8 = scalar_lea.hbm (!%p241_p9), %s8067_s7, 8 }
  0x10   : > { %s3560_s17 = sshll.u32 (!%p241_p9), %s271_s23, 4  ;;  %s3561_s17 = int_to_ptr.vmem [resolvable:$true] %s3560_s17 }
  0x13   : > { %v318_v0 = vld [vmem:[%s8061_s1 + $0x78] sm:$0xff]  ;;  %v317_v1 = vld [vmem:[%s8061_s1 + $0x70] sm:$0xff]  ;;  %v316_v4 = vld [vmem:[%s8061_s1 + $0x68] sm:$0xff]  ;;  %s273_s15 = scalar_select %p272_p10, %s3805_s28, 1 }
  0x14   : > { %v334_v2 = vld [vmem:[%s8061_s1 + $0xf8] sm:$0xff]  ;;  %339 = vmatpush.msra.mxu0 %v318_v0  ;;  %v333_v3 = vld [vmem:[%s8061_s1 + $0xf0] sm:$0xff]  ;;  %v332_v5 = vld [vmem:[%s8061_s1 + $0xe8] sm:$0xff] }
  0x15   : > { %395 = vmatpush.msra.mxu1 %v334_v2  ;;  %v315_v6 = vld [vmem:[%s8061_s1 + $0x60] sm:$0xff]  ;;  %v314_v8 = vld [vmem:[%s8061_s1 + $0x58] sm:$0xff]  ;;  %v313_v10 = vld [vmem:[%s8061_s1 + $0x50] sm:$0xff]  ;;  %s3632_s29 = smul.u32 208, %s273_s15 }
  0x16   : > { %340 = vmatpush.msra.mxu0 %v317_v1  ;;  %v331_v7 = vld [vmem:[%s8061_s1 + $0xe0] sm:$0xff]  ;;  %v330_v9 = vld [vmem:[%s8061_s1 + $0xd8] sm:$0xff]  ;;  %v329_v11 = vld [vmem:[%s8061_s1 + $0xd0] sm:$0xff] }
  0x17   : > { %396 = vmatpush.msra.mxu1 %v333_v3  ;;  %v312_v12 = vld [vmem:[%s8061_s1 + $0x48] sm:$0xff]  ;;  %v311_v14 = vld [vmem:[%s8061_s1 + $0x40] sm:$0xff]  ;;  %v310_v15 = vld [vmem:[%s8061_s1 + $0x38] sm:$0xff]  ;;  %s3927_s21 = scalar_lea.vmem %s8060_s0, %s3632_s29  ;;  %s3629_s29 = sshll.u32 %s3805_s28, 2 }
  0x18   : > { %341 = vmatpush.msra.mxu0 %v316_v4  ;;  %v328_v13 = vld [vmem:[%s8061_s1 + $0xc8] sm:$0xff]  ;;  %v327_v16 = vld [vmem:[%s8061_s1 + $0xc0] sm:$0xff]  ;;  %v326_v17 = vld [vmem:[%s8061_s1 + $0xb8] sm:$0xff]  ;;  %s3558_s16 = scalar_lea.hbm %s8067_s7, %s3629_s29  ;;  %s3548_s28 = scalar_lea.sflag [#allocation5], %s269_s20 }
  0x19   : > { %397 = vmatpush.msra.mxu1 %v332_v5  ;;  %v309_v18 = vld [vmem:[%s8061_s1 + $0x30] sm:$0xff]  ;;  %v308_v20 = vld [vmem:[%s8061_s1 + $0x28] sm:$0xff]  ;;  %v307_v22 = vld [vmem:[%s8061_s1 + $0x20] sm:$0xff]  ;;  %s3562_s18 = sshll.u32 %s3558_s16, 4  ;;  %s3563_s18 = int_to_ptr.hbm [resolvable:$true] %s3562_s18 }
  0x1a   : > { %342 = vmatpush.msra.mxu0 %v315_v6  ;;  %v325_v19 = vld [vmem:[%s8061_s1 + $0xb0] sm:$0xff]  ;;  %v324_v21 = vld [vmem:[%s8061_s1 + $0xa8] sm:$0xff]  ;;  %v323_v23 = vld [vmem:[%s8061_s1 + $0xa0] sm:$0xff]  ;;  %s3694_s19 = sshra.s32 %s3563_s18, 4  ;;  %s3695_s19 = int_to_ptr.hbm [resolvable:$true] %s3694_s19 }
  0x1b   : > { %398 = vmatpush.msra.mxu1 %v331_v7  ;;  %v306_v24 = vld [vmem:[%s8061_s1 + $0x18] sm:$0xff]  ;;  %v305_v26 = vld [vmem:[%s8061_s1 + $0x10] sm:$0xff]  ;;  %v304_v28 = vld [vmem:[%s8061_s1 + $0x8] sm:$0xff]  ;;  %p3701_p0 = scmp.lt.s32.totalorder %s3695_s19, %s8067_s7 }
  0x1c   : > { %343 = vmatpush.msra.mxu0 %v314_v8  ;;  %v322_v25 = vld [vmem:[%s8061_s1 + $0x98] sm:$0xff]  ;;  %v321_v27 = vld [vmem:[%s8061_s1 + $0x90] sm:$0xff]  ;;  %v320_v29 = vld [vmem:[%s8061_s1 + $0x88] sm:$0xff] }
  0x1d   : > { %399 = vmatpush.msra.mxu1 %v330_v9  ;;  %v303_v30 = vld [vmem:[%s8061_s1] sm:$0xff]  ;;  %v278_v33 = vld [vmem:[%s3927_s21 + $0x8] sm:$0xff]  ;;  %v3940_v34 = vld [vmem:[%s8063_s3 + $0x78] sm:$0xff] }
  0x1e   : > { %344 = vmatpush.msra.mxu0 %v313_v10  ;;  %v319_v31 = vld [vmem:[%s8061_s1 + $0x80] sm:$0xff]  ;;  %v3945_v35 = vld [vmem:[%s8063_s3 + $0x70] sm:$0xff]  ;;  %753 = vmatpush.msra.mxu2 %v3940_v34  ;;  %v3951_v36 = vld [vmem:[%s8063_s3 + $0x68] sm:$0xff] }
  0x1f   : > { %400 = vmatpush.msra.mxu1 %v329_v11  ;;  %v277_v32 = vld [vmem:[%s3927_s21] sm:$0xff]  ;;  %v3956_v37 = vld [vmem:[%s8063_s3 + $0xf8] sm:$0xff]  ;;  %v3961_v38 = vld [vmem:[%s8063_s3 + $0xf0] sm:$0xff] }
  0x20   : > { %345 = vmatpush.msra.mxu0 %v312_v12  ;;  %754 = vmatpush.msra.mxu2 %v3945_v35  ;;  %v3968_v39 = vld [vmem:[%s8063_s3 + $0x60] sm:$0xff]  ;;  %v3973_v40 = vld [vmem:[%s8063_s3 + $0xe8] sm:$0xff]  ;;  %v279_v41 = vld [vmem:[%s3927_s21 + $0x10] sm:$0xff] }
  0x21   : > { %401 = vmatpush.msra.mxu1 %v328_v13  ;;  %773 = vmatpush.msra.mxu3 %v3956_v37  ;;  %v280_v42 = vld [vmem:[%s3927_s21 + $0x18] sm:$0xff]  ;;  %v3989_v44 = vld [vmem:[%s8063_s3 + $0x50] sm:$0xff]  ;;  %v3994_v45 = vld [vmem:[%s8063_s3 + $0xe0] sm:$0xff] }
  0x22   : > { %346 = vmatpush.msra.mxu0 %v311_v14  ;;  %755 = vmatpush.msra.mxu2 %v3951_v36  ;;  %v3982_v43 = vld [vmem:[%s8063_s3 + $0x58] sm:$0xff]  ;;  %v4009_v48 = vld [vmem:[%s8063_s3 + $0x48] sm:$0xff]  ;;  %v4014_v49 = vld [vmem:[%s8063_s3 + $0xd0] sm:$0xff] }
  0x23   : > { %402 = vmatpush.msra.mxu1 %v327_v16  ;;  %774 = vmatpush.msra.mxu3 %v3961_v38  ;;  %v4001_v46 = vld [vmem:[%s8063_s3 + $0xd8] sm:$0xff]  ;;  %v635_v50 = vld [vmem:[%s8063_s3 + $0x470] sm:$0xff]  ;;  %v634_v51 = vld [vmem:[%s8063_s3 + $0x468] sm:$0xff] }
  0x24   : > { %347 = vmatpush.msra.mxu0 %v310_v15  ;;  %756 = vmatpush.msra.mxu2 %v3968_v39  ;;  %v636_v47 = vld [vmem:[%s8063_s3 + $0x478] sm:$0xff]  ;;  %v4027_v52 = vld [vmem:[%s8063_s3 + $0x40] sm:$0xff]  ;;  %v4032_v53 = vld [vmem:[%s8063_s3 + $0xc8] sm:$0xff] }
  0x25   : > { %403 = vmatpush.msra.mxu1 %v326_v17  ;;  %775 = vmatpush.msra.mxu3 %v3973_v40  ;;  %v281_v54 = vld [vmem:[%s3927_s21 + $0x20] sm:$0xff]  ;;  %v282_v55 = vld [vmem:[%s3927_s21 + $0x28] sm:$0xff]  ;;  %v4041_v56 = vld [vmem:[%s8063_s3 + $0x38] sm:$0xff] }
  0x26   : > { %348 = vmatpush.msra.mxu0 %v309_v18  ;;  %757 = vmatpush.msra.mxu2 %v3982_v43  ;;  %v4048_v57 = vld [vmem:[%s8063_s3 + $0x30] sm:$0xff]  ;;  %v4053_v58 = vld [vmem:[%s8063_s3 + $0xc0] sm:$0xff]  ;;  %v4063_v60 = vld [vmem:[%s8063_s3 + $0xb8] sm:$0xff] }
  0x27   : > { %404 = vmatpush.msra.mxu1 %v325_v19  ;;  %776 = vmatpush.msra.mxu3 %v3994_v45  ;;  %v633_v59 = vld [vmem:[%s8063_s3 + $0x460] sm:$0xff]  ;;  %v4068_v61 = vld [vmem:[%s8063_s3 + $0x28] sm:$0xff]  ;;  %v632_v62 = vld [vmem:[%s8063_s3 + $0x458] sm:$0xff] }
  0x28   : > { %349 = vmatpush.msra.mxu0 %v308_v20  ;;  %758 = vmatpush.msra.mxu2 %v3989_v44  ;;  %v652_v63 = vld [vmem:[%s8063_s3 + $0x4f8] sm:$0xff]  ;;  %v4081_v0 = vld [vmem:[%s8063_s3 + $0xb0] sm:$0xff]  ;;  %v4092_v3 = vld [vmem:[%s8063_s3 + $0x20] sm:$0xff] }
  0x29   : > { %405 = vmatpush.msra.mxu1 %v324_v21  ;;  %777 = vmatpush.msra.mxu3 %v4001_v46  ;;  %v631_v1 = vld [vmem:[%s8063_s3 + $0x450] sm:$0xff]  ;;  %v4097_v4 = vld [vmem:[%s8063_s3 + $0xa8] sm:$0xff]  ;;  %v284_v6 = vld [vmem:[%s3927_s21 + $0x38] sm:$0xff] }
  0x2a   : > { %350 = vmatpush.msra.mxu0 %v307_v22  ;;  %759 = vmatpush.msra.mxu2 %v4009_v48  ;;  %v651_v2 = vld [vmem:[%s8063_s3 + $0x4f0] sm:$0xff]  ;;  %v4106_v7 = vld [vmem:[%s8063_s3 + $0x18] sm:$0xff]  ;;  %v630_v8 = vld [vmem:[%s8063_s3 + $0x448] sm:$0xff] }
  0x2b   : > { %406 = vmatpush.msra.mxu1 %v323_v23  ;;  %778 = vmatpush.msra.mxu3 %v4014_v49  ;;  %v283_v5 = vld [vmem:[%s3927_s21 + $0x30] sm:$0xff]  ;;  %v650_v9 = vld [vmem:[%s8063_s3 + $0x4e8] sm:$0xff]  ;;  %v4124_v11 = vld [vmem:[%s8063_s3 + $0xa0] sm:$0xff] }
  0x2c   : > { %351 = vmatpush.msra.mxu0 %v306_v24  ;;  %760 = vmatpush.msra.mxu2 %v4027_v52  ;;  %v4119_v10 = vld [vmem:[%s8063_s3 + $0x10] sm:$0xff]  ;;  %v629_v12 = vld [vmem:[%s8063_s3 + $0x440] sm:$0xff]  ;;  %v4136_v14 = vld [vmem:[%s8063_s3 + $0x8] sm:$0xff] }
  0x2d   : > { %407 = vmatpush.msra.mxu1 %v322_v25  ;;  %779 = vmatpush.msra.mxu3 %v4032_v53  ;;  %v649_v13 = vld [vmem:[%s8063_s3 + $0x4e0] sm:$0xff]  ;;  %v4142_v15 = vld [vmem:[%s8063_s3 + $0x98] sm:$0xff]  ;;  %v4154_v18 = vld [vmem:[%s8063_s3 + $0x90] sm:$0xff] }
  0x2e   : > { %352 = vmatpush.msra.mxu0 %v305_v26  ;;  %761 = vmatpush.msra.mxu2 %v4041_v56  ;;  %v628_v16 = vld [vmem:[%s8063_s3 + $0x438] sm:$0xff]  ;;  %v4159_v19 = vld [vmem:[%s8063_s3] sm:$0xff]  ;;  %v627_v20 = vld [vmem:[%s8063_s3 + $0x430] sm:$0xff] }
  0x2f   : > { %408 = vmatpush.msra.mxu1 %v321_v27  ;;  %780 = vmatpush.msra.mxu3 %v4053_v58  ;;  %v648_v17 = vld [vmem:[%s8063_s3 + $0x4d8] sm:$0xff]  ;;  %v285_v21 = vld [vmem:[%s3927_s21 + $0x40] sm:$0xff]  ;;  %v286_v22 = vld [vmem:[%s3927_s21 + $0x48] sm:$0xff] }
  0x30   : > { %353 = vmatpush.msra.mxu0 %v304_v28  ;;  %762 = vmatpush.msra.mxu2 %v4048_v57  ;;  %v540_v23 = vld [vmem:[%s8063_s3 + $0x178] sm:$0xff]  ;;  %v647_v24 = vld [vmem:[%s8063_s3 + $0x4d0] sm:$0xff]  ;;  %v4179_v25 = vld [vmem:[%s8063_s3 + $0x88] sm:$0xff] }
  0x31   : > { %409 = vmatpush.msra.mxu1 %v320_v29  ;;  %781 = vmatpush.msra.mxu3 %v4063_v60  ;;  %v626_v26 = vld [vmem:[%s8063_s3 + $0x428] sm:$0xff]  ;;  %v539_v27 = vld [vmem:[%s8063_s3 + $0x170] sm:$0xff]  ;;  %v4193_v29 = vld [vmem:[%s8063_s3 + $0x80] sm:$0xff] }
  0x32   : > { %354 = vmatpush.msra.mxu0 %v303_v30  ;;  %763 = vmatpush.msra.mxu2 %v4068_v61  ;;  %v646_v28 = vld [vmem:[%s8063_s3 + $0x4c8] sm:$0xff]  ;;  %v625_v30 = vld [vmem:[%s8063_s3 + $0x420] sm:$0xff] }
  0x33   : > { %410 = vmatpush.msra.mxu1 %v319_v31  ;;  %355 = vmatmul.f32.vlgmr.msra.gmra.mxu0 %v277_v32  ;;  %v538_v31 = vld [vmem:[%s8063_s3 + $0x168] sm:$0xff]  ;;  %v645_v32 = vld [vmem:[%s8063_s3 + $0x4c0] sm:$0xff] }
  0x34   : > { %411 = vmatmul.f32.vlgmr.msra.gmra.mxu1 %v278_v33  ;;  %913 = vmatpush.msrb.mxu0 %v636_v47  ;;  %v556_v33 = vld [vmem:[%s8063_s3 + $0x1f8] sm:$0xff] }
  0x35   : > { %933 = vmatpush.msrb.mxu1 %v652_v63  ;;  %782 = vmatpush.msra.mxu3 %v4081_v0  ;;  %v644_v47 = vld [vmem:[%s8063_s3 + $0x4b8] sm:$0xff]  ;;  %v535_v63 = vld [vmem:[%s8063_s3 + $0x150] sm:$0xff] }
  0x36   : > { %914 = vmatpush.msrb.mxu0 %v635_v50  ;;  %764 = vmatpush.msra.mxu2 %v4092_v3  ;;  %v287_v50 = vld [vmem:[%s3927_s21 + $0x50] sm:$0xff] }
  0x37   : > { %934 = vmatpush.msrb.mxu1 %v651_v2  ;;  %783 = vmatpush.msra.mxu3 %v4097_v4  ;;  %v622_v2 = vld [vmem:[%s8063_s3 + $0x408] sm:$0xff] }
  0x38   : > { %915 = vmatpush.msrb.mxu0 %v634_v51  ;;  %765 = vmatpush.msra.mxu2 %v4106_v7  ;;  %v288_v51 = vld [vmem:[%s3927_s21 + $0x58] sm:$0xff] }
  0x39   : > { %935 = vmatpush.msrb.mxu1 %v650_v9  ;;  %784 = vmatpush.msra.mxu3 %v4124_v11  ;;  %v621_v9 = vld [vmem:[%s8063_s3 + $0x400] sm:$0xff] }
  0x3a   : > { %916 = vmatpush.msrb.mxu0 %v633_v59  ;;  %766 = vmatpush.msra.mxu2 %v4119_v10  ;;  %v623_v59 = vld [vmem:[%s8063_s3 + $0x410] sm:$0xff] }
  0x3b   : > { %358 = vmatmul.f32.gmra.mxu0 %v279_v41  ;;  %936 = vmatpush.msrb.mxu1 %v649_v13  ;;  %v624_v41 = vld [vmem:[%s8063_s3 + $0x418] sm:$0xff]  ;;  %v533_v13 = vld [vmem:[%s8063_s3 + $0x140] sm:$0xff] }
  0x3c   : > { %414 = vmatmul.f32.gmra.mxu1 %v280_v42  ;;  %917 = vmatpush.msrb.mxu0 %v632_v62  ;;  %v537_v42 = vld [vmem:[%s8063_s3 + $0x160] sm:$0xff]  ;;  %v643_v62 = vld [vmem:[%s8063_s3 + $0x4b0] sm:$0xff] }
  0x3d   : > { %785 = vmatpush.msra.mxu3 %v4142_v15  ;;  %767 = vmatpush.msra.mxu2 %v4136_v14 }
  0x3e   : > { %918 = vmatpush.msrb.mxu0 %v631_v1  ;;  %937 = vmatpush.msrb.mxu1 %v648_v17  ;;  %v554_v1 = vld [vmem:[%s8063_s3 + $0x1e8] sm:$0xff] }
  0x3f   : > { %786 = vmatpush.msra.mxu3 %v4154_v18  ;;  %768 = vmatpush.msra.mxu2 %v4159_v19  ;;  %v290_v17 = vld [vmem:[%s3927_s21 + $0x68] sm:$0xff] }
  0x40   : > { %919 = vmatpush.msrb.mxu0 %v630_v8  ;;  %938 = vmatpush.msrb.mxu1 %v647_v24  ;;  %v553_v8 = vld [vmem:[%s8063_s3 + $0x1e0] sm:$0xff]  ;;  %v295_v24 = vld [vmem:[%s3927_s21 + $0x90] sm:$0xff] }
  0x41   : > { %793 = vmatpush.msrb.mxu2 %v540_v23  ;;  %787 = vmatpush.msra.mxu3 %v4179_v25  ;;  %v294_v23 = vld [vmem:[%s3927_s21 + $0x88] sm:$0xff] }
  0x42   : > { %920 = vmatpush.msrb.mxu0 %v629_v12  ;;  %939 = vmatpush.msrb.mxu1 %v646_v28  ;;  %v641_v12 = vld [vmem:[%s8063_s3 + $0x4a0] sm:$0xff]  ;;  %v700_v28 = vld [vmem:[%s8063_s3 + $0x678] sm:$0xff] }
  0x43   : > { %361 = vmatmul.f32.gmra.mxu0 %v281_v54  ;;  %794 = vmatpush.msrb.mxu2 %v539_v27  ;;  %v536_v54 = vld [vmem:[%s8063_s3 + $0x158] sm:$0xff] }
  0x44   : > { %417 = vmatmul.f32.gmra.mxu1 %v282_v55  ;;  %921 = vmatpush.msrb.mxu0 %v628_v16  ;;  %v555_v55 = vld [vmem:[%s8063_s3 + $0x1f0] sm:$0xff]  ;;  %v289_v16 = vld [vmem:[%s3927_s21 + $0x60] sm:$0xff]  ;;  %v552_v27 = vld [vmem:[%s8063_s3 + $0x1d8] sm:$0xff] }
  0x45   : > { %788 = vmatpush.msra.mxu3 %v4193_v29  ;;  %795 = vmatpush.msrb.mxu2 %v538_v31  ;;  %v531_v31 = vld [vmem:[%s8063_s3 + $0x130] sm:$0xff] }
  0x46   : > { %922 = vmatpush.msrb.mxu0 %v627_v20  ;;  %940 = vmatpush.msrb.mxu1 %v645_v32  ;;  %v291_v20 = vld [vmem:[%s3927_s21 + $0x70] sm:$0xff] }
  0x47   : > { %813 = vmatpush.msrb.mxu3 %v556_v33  ;;  %796 = vmatpush.msrb.mxu2 %v537_v42  ;;  %v551_v32 = vld [vmem:[%s8063_s3 + $0x1d0] sm:$0xff]  ;;  %v530_v42 = vld [vmem:[%s8063_s3 + $0x128] sm:$0xff] }
  0x48   : > { %923 = vmatpush.msrb.mxu0 %v626_v26  ;;  %941 = vmatpush.msrb.mxu1 %v644_v47  ;;  %v532_v26 = vld [vmem:[%s8063_s3 + $0x138] sm:$0xff]  ;;  %v699_v33 = vld [vmem:[%s8063_s3 + $0x670] sm:$0xff]  ;;  %v550_v47 = vld [vmem:[%s8063_s3 + $0x1c8] sm:$0xff] }
  0x49   : > { %797 = vmatpush.msrb.mxu2 %v536_v54  ;;  %814 = vmatpush.msrb.mxu3 %v555_v55  ;;  %v529_v54 = vld [vmem:[%s8063_s3 + $0x120] sm:$0xff] }
  0x4a   : > { %924 = vmatpush.msrb.mxu0 %v625_v30  ;;  %942 = vmatpush.msrb.mxu1 %v643_v62  ;;  %v640_v30 = vld [vmem:[%s8063_s3 + $0x498] sm:$0xff]  ;;  %v549_v55 = vld [vmem:[%s8063_s3 + $0x1c0] sm:$0xff] }
  0x4b   : > { %364 = vmatmul.f32.gmra.mxu0 %v283_v5  ;;  %v642_v5 = vld [vmem:[%s8063_s3 + $0x4a8] sm:$0xff]  ;;  %798 = vmatpush.msrb.mxu2 %v535_v63  ;;  %v297_v62 = vld [vmem:[%s3927_s21 + $0xa0] sm:$0xff]  ;;  %v296_v63 = vld [vmem:[%s3927_s21 + $0x98] sm:$0xff] }
  0x4c   : > { %420 = vmatmul.f32.gmra.mxu1 %v284_v6  ;;  %925 = vmatpush.msrb.mxu0 %v624_v41  ;;  %v534_v6 = vld [vmem:[%s8063_s3 + $0x148] sm:$0xff]  ;;  %v639_v41 = vld [vmem:[%s8063_s3 + $0x490] sm:$0xff] }
  0x4d   : > { %815 = vmatpush.msrb.mxu3 %v554_v1  ;;  %943 = vmatpush.msrb.mxu1 %v642_v5  ;;  %v637_v1 = vld [vmem:[%s8063_s3 + $0x480] sm:$0xff]  ;;  %v548_v5 = vld [vmem:[%s8063_s3 + $0x1b8] sm:$0xff] }
  0x4e   : > { %926 = vmatpush.msrb.mxu0 %v623_v59  ;;  %799 = vmatpush.msrb.mxu2 %v534_v6  ;;  %v697_v59 = vld [vmem:[%s8063_s3 + $0x660] sm:$0xff]  ;;  %v696_v6 = vld [vmem:[%s8063_s3 + $0x658] sm:$0xff] }
  0x4f   : > { %816 = vmatpush.msrb.mxu3 %v553_v8  ;;  %944 = vmatpush.msrb.mxu1 %v641_v12  ;;  %v716_v8 = vld [vmem:[%s8063_s3 + $0x6f8] sm:$0xff]  ;;  %v547_v12 = vld [vmem:[%s8063_s3 + $0x1b0] sm:$0xff] }
  0x50   : > { %927 = vmatpush.msrb.mxu0 %v622_v2  ;;  %800 = vmatpush.msrb.mxu2 %v533_v13  ;;  %v528_v2 = vld [vmem:[%s8063_s3 + $0x118] sm:$0xff]  ;;  %v695_v13 = vld [vmem:[%s8063_s3 + $0x650] sm:$0xff] }
  0x51   : > { %817 = vmatpush.msrb.mxu3 %v552_v27  ;;  %945 = vmatpush.msrb.mxu1 %v640_v30  ;;  %v713_v27 = vld [vmem:[%s8063_s3 + $0x6e0] sm:$0xff]  ;;  %v298_v30 = vld [vmem:[%s3927_s21 + $0xa8] sm:$0xff] }
  0x52   : > { %928 = vmatpush.msrb.mxu0 %v621_v9  ;;  %801 = vmatpush.msrb.mxu2 %v532_v26  ;;  %v527_v9 = vld [vmem:[%s8063_s3 + $0x110] sm:$0xff]  ;;  %v693_v26 = vld [vmem:[%s8063_s3 + $0x640] sm:$0xff] }
  0x53   : > { %367 = vmatmul.f32.gmra.mxu0 %v285_v21  ;;  %v292_v21 = vld [vmem:[%s3927_s21 + $0x78] sm:$0xff]  ;;  %818 = vmatpush.msrb.mxu3 %v551_v32 }
  0x54   : > { %423 = vmatmul.f32.gmra.mxu1 %v286_v22  ;;  %v293_v22 = vld [vmem:[%s3927_s21 + $0x80] sm:$0xff]  ;;  %993 = vmatpush.msra.mxu0 %v700_v28  ;;  %v299_v28 = vld [vmem:[%s3927_s21 + $0xb0] sm:$0xff]  ;;  %v692_v32 = vld [vmem:[%s8063_s3 + $0x638] sm:$0xff] }
  0x55   : > { %802 = vmatpush.msrb.mxu2 %v531_v31  ;;  %946 = vmatpush.msrb.mxu1 %v639_v41  ;;  %v544_v31 = vld [vmem:[%s8063_s3 + $0x198] sm:$0xff]  ;;  %v543_v41 = vld [vmem:[%s8063_s3 + $0x190] sm:$0xff] }
  0x56   : > { %994 = vmatpush.msra.mxu0 %v699_v33  ;;  %819 = vmatpush.msrb.mxu3 %v550_v47  ;;  %v712_v33 = vld [vmem:[%s8063_s3 + $0x6d8] sm:$0xff]  ;;  %v711_v47 = vld [vmem:[%s8063_s3 + $0x6d0] sm:$0xff] }
  0x57   : > { %803 = vmatpush.msrb.mxu2 %v530_v42  ;;  %v691_v42 = vld [vmem:[%s8063_s3 + $0x630] sm:$0xff] }
  0x58   : > { %820 = vmatpush.msrb.mxu3 %v549_v55  ;;  %v541_v55 = vld [vmem:[%s8063_s3 + $0x180] sm:$0xff] }
  0x59   : > { %804 = vmatpush.msrb.mxu2 %v529_v54  ;;  %v710_v54 = vld [vmem:[%s8063_s3 + $0x6c8] sm:$0xff] }
  0x5a   : > { %821 = vmatpush.msrb.mxu3 %v548_v5  ;;  %v708_v5 = vld [vmem:[%s8063_s3 + $0x6b8] sm:$0xff] }
  0x5b   : > { %370 = vmatmul.f32.gmra.mxu0 %v287_v50  ;;  %v698_v50 = vld [vmem:[%s8063_s3 + $0x668] sm:$0xff]  ;;  %805 = vmatpush.msrb.mxu2 %v528_v2  ;;  %v688_v2 = vld [vmem:[%s8063_s3 + $0x618] sm:$0xff] }
  0x5c   : > { %426 = vmatmul.f32.gmra.mxu1 %v288_v51  ;;  %v638_v51 = vld [vmem:[%s8063_s3 + $0x488] sm:$0xff]  ;;  %995 = vmatpush.msra.mxu0 %v698_v50 }
  0x5d   : > { %947 = vmatpush.msrb.mxu1 %v638_v51  ;;  %806 = vmatpush.msrb.mxu2 %v527_v9  ;;  %v542_v50 = vld [vmem:[%s8063_s3 + $0x188] sm:$0xff] }
  0x5e   : > { %996 = vmatpush.msra.mxu0 %v697_v59  ;;  %822 = vmatpush.msrb.mxu3 %v547_v12  ;;  %v690_v51 = vld [vmem:[%s8063_s3 + $0x628] sm:$0xff]  ;;  %v689_v59 = vld [vmem:[%s8063_s3 + $0x620] sm:$0xff] }
  0x5f   : > { %948 = vmatpush.msrb.mxu1 %v637_v1  ;;  %v300_v1 = vld [vmem:[%s3927_s21 + $0xb8] sm:$0xff]  ;;  %v686_v9 = vld [vmem:[%s8063_s3 + $0x608] sm:$0xff] }
  0x60   : > { %997 = vmatpush.msra.mxu0 %v696_v6  ;;  %v687_v6 = vld [vmem:[%s8063_s3 + $0x610] sm:$0xff]  ;;  %v706_v12 = vld [vmem:[%s8063_s3 + $0x6a8] sm:$0xff] }
  0x61   : > { %1013 = vmatpush.msra.mxu1 %v716_v8  ;;  %v707_v8 = vld [vmem:[%s8063_s3 + $0x6b0] sm:$0xff] }
  0x62   : > { %998 = vmatpush.msra.mxu0 %v695_v13  ;;  %v4425_v13 = vld [vmem:[%s8062_s2] ss:$0 sm:$0xff] }
  0x63   : > { %373 = vmatmul.f32.gmra.mxu0 %v289_v16  ;;  %v715_v16 = vld [vmem:[%s8063_s3 + $0x6f0] sm:$0xff] }
  0x64   : > { %429 = vmatmul.f32.gmra.mxu1 %v290_v17  ;;  %v526_v17 = vld [vmem:[%s8063_s3 + $0x108] sm:$0xff] }
  0x65   : > { %1014 = vmatpush.msra.mxu1 %v715_v16  ;;  %807 = vmatpush.msrb.mxu2 %v526_v17  ;;  %v685_v16 = vld [vmem:[%s8063_s3 + $0x600] sm:$0xff] }
  0x66   : > { %v705_v17 = vld [vmem:[%s8063_s3 + $0x6a0] sm:$0xff] }
  0x6b   : > { %376 = vmatmul.f32.gmra.mxu0 %v291_v20  ;;  %v546_v20 = vld [vmem:[%s8063_s3 + $0x1a8] sm:$0xff] }
  0x6c   : > { %432 = vmatmul.f32.gmra.mxu1 %v292_v21  ;;  %v694_v21 = vld [vmem:[%s8063_s3 + $0x648] sm:$0xff]  ;;  %823 = vmatpush.msrb.mxu3 %v546_v20 }
  0x6d   : > { %999 = vmatpush.msra.mxu0 %v694_v21  ;;  %v302_v20 = vld [vmem:[%s3927_s21 + $0xc8] sm:$0xf] }
  0x6f   : > { %1000 = vmatpush.msra.mxu0 %v693_v26 }
  0x71   : > { %1001 = vmatpush.msra.mxu0 %v692_v32 }
  0x73   : > { %379 = vmatmul.f32.gmra.mxu0 %v293_v22  ;;  %v714_v22 = vld [vmem:[%s8063_s3 + $0x6e8] sm:$0xff] }
  0x74   : > { %435 = vmatmul.f32.gmra.mxu1 %v294_v23  ;;  %v525_v23 = vld [vmem:[%s8063_s3 + $0x100] sm:$0xff]  ;;  %1002 = vmatpush.msra.mxu0 %v691_v42 }
  0x75   : > { %1015 = vmatpush.msra.mxu1 %v714_v22  ;;  %808 = vmatpush.msrb.mxu2 %v525_v23 }
  0x76   : > { %1003 = vmatpush.msra.mxu0 %v690_v51 }
  0x77   : > { %1016 = vmatpush.msra.mxu1 %v713_v27  ;;  %v703_v27 = vld [vmem:[%s8063_s3 + $0x690] sm:$0xff] }
  0x78   : > { %1004 = vmatpush.msra.mxu0 %v689_v59 }
  0x79   : > { %1017 = vmatpush.msra.mxu1 %v712_v33 }
  0x7a   : > { %1005 = vmatpush.msra.mxu0 %v688_v2  ;;  %v4469_v2 = vld [vmem:[%s8063_s3 + $0x260] sm:$0xff] }
  0x7b   : > { %382 = vmatmul.f32.gmra.mxu0 %v295_v24  ;;  %v545_v24 = vld [vmem:[%s8063_s3 + $0x1a0] sm:$0xff]  ;;  %1018 = vmatpush.msra.mxu1 %v711_v47 }
  0x7c   : > { %438 = vmatmul.f32.gmra.mxu1 %v296_v63  ;;  %824 = vmatpush.msrb.mxu3 %v545_v24  ;;  %v301_v63 = vld [vmem:[%s3927_s21 + $0xc0] sm:$0xf]  ;;  %v704_v24 = vld [vmem:[%s8063_s3 + $0x698] sm:$0xff]  ;;  %s3696_s21 = scalar_lea.hbm %s3695_s19, 4 }
  0x7d   : > { %1019 = vmatpush.msra.mxu1 %v710_v54  ;;  %1006 = vmatpush.msra.mxu0 %v687_v6  ;;  %v4456_v54 = vld [vmem:[%s8063_s3 + $0x270] sm:$0xff]  ;;  %v4475_v6 = vld [vmem:[%s8063_s3 + $0x258] sm:$0xff]  ;;  %p3697_p11 = scmp.ne.s32.totalorder %s3695_s19, %s3696_s21  ;;  %p3702_p1 = scmp.lt.s32.totalorder %s3700_s8, %s3696_s21 }
  0x7e   : > { %825 = vmatpush.msrb.mxu3 %v544_v31  ;;  %v701_v31 = vld [vmem:[%s8063_s3 + $0x680] sm:$0xff] }
  0x7f   : > { %1007 = vmatpush.msra.mxu0 %v686_v9  ;;  %p3698_p12 = pnand %p3697_p11, %p3822_p5  ;;  %p3703_p2 = por %p3702_p1, %p3701_p0 }
  0x80   : > { %826 = vmatpush.msrb.mxu3 %v543_v41 }
  0x81   : > { %1008 = vmatpush.msra.mxu0 %v685_v16  ;;  %v4486_v16 = vld [vmem:[%s8063_s3 + $0x250] sm:$0xff]  ;;  %p3699_p13 = pneg %p3698_p12 }
  0x82   : > { %827 = vmatpush.msrb.mxu3 %v542_v50  ;;  %v4451_v50 = vld [vmem:[%s8063_s3 + $0x278] sm:$0xff] }
  0x83   : > { %385 = vmatmul.f32.gmra.mxu0 %v297_v62  ;;  %v709_v62 = vld [vmem:[%s8063_s3 + $0x6c0] sm:$0xff]  ;;  %p3704_p3 = pnand %p3703_p2, %p3699_p13 }
  0x84   : > { %441 = vmatmul.f32.gmra.mxu1 %v298_v30  ;;  %828 = vmatpush.msrb.mxu3 %v541_v55  ;;  %v702_v30 = vld [vmem:[%s8063_s3 + $0x688] sm:$0xff] }
  0x85   : > { %1020 = vmatpush.msra.mxu1 %v709_v62 }
  0x87   : > { %1021 = vmatpush.msra.mxu1 %v708_v5 }
  0x89   : > { %1022 = vmatpush.msra.mxu1 %v707_v8  ;;  %v4480_v8 = vld [vmem:[%s8063_s3 + $0x2f8] sm:$0xff] }
  0x8b   : > { %388 = vmatmul.f32.gmra.mxu0 %v299_v28  ;;  %1023 = vmatpush.msra.mxu1 %v706_v12 }
  0x8c   : > { %444 = vmatmul.f32.gmra.mxu1 %v300_v1 }
  0x8d   : > { %1024 = vmatpush.msra.mxu1 %v705_v17  ;;  %v4491_v17 = vld [vmem:[%s8063_s3 + $0x2f0] sm:$0xff] }
  0x8f   : > { %1025 = vmatpush.msra.mxu1 %v704_v24  ;;  %v4504_v24 = vld [vmem:[%s8063_s3 + $0x2e8] sm:$0xff] }
  0x91   : > { %1026 = vmatpush.msra.mxu1 %v703_v27  ;;  %v4511_v27 = vld [vmem:[%s8063_s3 + $0x240] sm:$0xff] }
  0x93   : > { %391 = vmatmul.f32.gmra.mxu0 %v301_v63  ;;  %1027 = vmatpush.msra.mxu1 %v702_v30  ;;  %v4463_v63 = vld [vmem:[%s8063_s3 + $0x268] sm:$0xff] }
  0x94   : > { %447 = vmatmul.f32.gmra.mxu1 %v302_v20 }
  0x95   : > { %1028 = vmatpush.msra.mxu1 %v701_v31  ;;  %v4523_v31 = vld [vmem:[%s8063_s3 + $0x238] sm:$0xff] }
  0xb0   : > { %v356_v21 = vpop.f32.mrf.mxu0 }
  0xb1   : > { %v412_v22 = vpop.f32.mrf.mxu1  ;;  %v357_v23 = vadd.f32 %v4425_v13, %v356_v21 }
  0xb3   : > { %v413_v26 = vadd.f32 %v412_v22, %v357_v23  ;;  %v4499_v23 = vld [vmem:[%s8063_s3 + $0x248] sm:$0xff] }
  0xb5   : > { %v451_v28 = vmax.f32 %v413_v26, 0.0 }
  0xb7   : > { %464 = vst [vmem:[#allocation2] sm:$0xff] %v451_v28  ;;  %v4516_v28 = vld [vmem:[%s8063_s3 + $0x2e0] sm:$0xff] }
  0xb8   : > { %v359_v32 = vpop.f32.mrf.mxu0 }
  0xb9   : > { %v415_v33 = vpop.f32.mrf.mxu1  ;;  %v360_v41 = vadd.f32 %v4425_v13, %v359_v32  ;;  %v4528_v32 = vld [vmem:[%s8063_s3 + $0x2d8] sm:$0xff] }
  0xbb   : > { %v416_v42 = vadd.f32 %v415_v33, %v360_v41 }
  0xbd   : > { %v452_v47 = vmax.f32 %v416_v42, 0.0  ;;  %v4535_v42 = vld [vmem:[%s8063_s3 + $0x230] sm:$0xff] }
  0xbe   : > { %v477_v51 = vld [vmem:[#allocation2] sm:$0xf] }
  0xbf   : > { %465 = vst [vmem:[#allocation2 + $0x8] sm:$0xff] %v452_v47  ;;  %769 = vmatmul.f32.vlgmr.msra.gmra.mxu2 %v477_v51  ;;  %v479_v12 = vld [vmem:[#allocation2 + $0x1] sm:$0xf]  ;;  %v4540_v47 = vld [vmem:[%s8063_s3 + $0x2d0] sm:$0xff] }
  0xc0   : > { %833 = vmatpush.msra.mxu2 %v4451_v50  ;;  %v362_v55 = vpop.f32.mrf.mxu0 }
  0xc1   : > { %v418_v59 = vpop.f32.mrf.mxu1  ;;  %v363_v62 = vadd.f32 %v4425_v13, %v362_v55 }
  0xc2   : > { %834 = vmatpush.msra.mxu2 %v4456_v54 }
  0xc3   : > { %v419_v1 = vadd.f32 %v418_v59, %v363_v62  ;;  %v4548_v59 = vld [vmem:[%s8063_s3 + $0x228] sm:$0xff] }
  0xc4   : > { %835 = vmatpush.msra.mxu2 %v4463_v63  ;;  %v4553_v62 = vld [vmem:[%s8063_s3 + $0x2c8] sm:$0xff] }
  0xc5   : > { %v453_v5 = vmax.f32 %v419_v1, 0.0 }
  0xc6   : > { %836 = vmatpush.msra.mxu2 %v4469_v2  ;;  %v478_v9 = vld [vmem:[#allocation2 + $0x5] sm:$0xf] }
  0xc7   : > { %466 = vst [vmem:[#allocation2 + $0x10] sm:$0xff] %v453_v5  ;;  %789 = vmatmul.f32.vlgmr.msra.gmra.mxu3 %v478_v9  ;;  %809 = vmatmul.f32.vlgmr.msrb.gmra.mxu2 %v479_v12  ;;  %v480_v33 = vld [vmem:[#allocation2 + $0x6] sm:$0xf]  ;;  %v4580_v12 = vld [vmem:[%s8063_s3 + $0x2b8] sm:$0xff] }
  0xc8   : > { %837 = vmatpush.msra.mxu2 %v4475_v6  ;;  %853 = vmatpush.msra.mxu3 %v4480_v8  ;;  %v365_v20 = vpop.f32.mrf.mxu0  ;;  %v4567_v5 = vld [vmem:[%s8063_s3 + $0x2c0] sm:$0xff] }
  0xc9   : > { %v421_v21 = vpop.f32.mrf.mxu1  ;;  %v366_v22 = vadd.f32 %v4425_v13, %v365_v20 }
  0xca   : > { %838 = vmatpush.msra.mxu2 %v4486_v16  ;;  %854 = vmatpush.msra.mxu3 %v4491_v17 }
  0xcb   : > { %v422_v26 = vadd.f32 %v421_v21, %v366_v22  ;;  %v4593_v22 = vld [vmem:[%s8063_s3 + $0x2b0] sm:$0xff] }
  0xcc   : > { %839 = vmatpush.msra.mxu2 %v4499_v23  ;;  %855 = vmatpush.msra.mxu3 %v4504_v24 }
  0xcd   : > { %v454_v30 = vmax.f32 %v422_v26, 0.0  ;;  %v4607_v26 = vld [vmem:[%s8063_s3 + $0x2a8] sm:$0xff] }
  0xce   : > { %840 = vmatpush.msra.mxu2 %v4511_v27  ;;  %856 = vmatpush.msra.mxu3 %v4516_v28  ;;  %v485_v41 = vld [vmem:[#allocation2 + $0x14] sm:$0xf] }
  0xcf   : > { %467 = vst [vmem:[#allocation2 + $0x18] sm:$0xff] %v454_v30  ;;  %829 = vmatmul.f32.vlgmr.msrb.gmra.mxu3 %v480_v33  ;;  %929 = vmatmul.f32.vlgmr.msrb.gmra.mxu0 %v485_v41  ;;  %v603_v30 = vld [vmem:[%s8063_s3 + $0x370] sm:$0xff] }
  0xd0   : > { %841 = vmatpush.msra.mxu2 %v4523_v31  ;;  %857 = vmatpush.msra.mxu3 %v4528_v32  ;;  %v368_v51 = vpop.f32.mrf.mxu0  ;;  %v482_v33 = vld [vmem:[#allocation2 + $0xf] sm:$0xf] }
  0xd1   : > { %v424_v55 = vpop.f32.mrf.mxu1  ;;  %1351 = vmatpush.msrb.mxu0 %v3940_v34  ;;  %v369_v1 = vadd.f32 %v4425_v13, %v368_v51  ;;  %v4562_v34 = vld [vmem:[%s8063_s3 + $0x220] sm:$0xff]  ;;  %v594_v51 = vld [vmem:[%s8063_s3 + $0x328] sm:$0xff] }
  0xd2   : > { %842 = vmatpush.msra.mxu2 %v4535_v42  ;;  %858 = vmatpush.msra.mxu3 %v4540_v47 }
  0xd3   : > { %1352 = vmatpush.msrb.mxu0 %v3945_v35  ;;  %v425_v9 = vadd.f32 %v424_v55, %v369_v1  ;;  %v4575_v35 = vld [vmem:[%s8063_s3 + $0x218] sm:$0xff]  ;;  %v483_v55 = vld [vmem:[#allocation2 + $0xb] sm:$0xf]  ;;  %v605_v1 = vld [vmem:[%s8063_s3 + $0x380] sm:$0xff] }
  0xd4   : > { %843 = vmatpush.msra.mxu2 %v4548_v59  ;;  %859 = vmatpush.msra.mxu3 %v4553_v62 }
  0xd5   : > { %1353 = vmatpush.msrb.mxu0 %v3951_v36  ;;  %v455_v20 = vmax.f32 %v425_v9, 0.0  ;;  %v4588_v36 = vld [vmem:[%s8063_s3 + $0x210] sm:$0xff] }
  0xd6   : > { %844 = vmatpush.msra.mxu2 %v4562_v34  ;;  %860 = vmatpush.msra.mxu3 %v4567_v5  ;;  %v486_v21 = vld [vmem:[#allocation2 + $0x19] sm:$0xf]  ;;  %v1075_v9 = vld [vmem:[#allocation2 + $0x14] sm:$0xf] }
  0xd7   : > { %1354 = vmatpush.msrb.mxu0 %v3968_v39  ;;  %949 = vmatmul.f32.vlgmr.msrb.gmra.mxu1 %v486_v21  ;;  %468 = vst [vmem:[#allocation2 + $0x20] sm:$0xff] %v455_v20  ;;  %v4602_v39 = vld [vmem:[%s8063_s3 + $0x208] sm:$0xff]  ;;  %v1076_v20 = vld [vmem:[#allocation2 + $0x19] sm:$0xf] }
  0xd8   : > { %845 = vmatpush.msra.mxu2 %v4575_v35  ;;  %861 = vmatpush.msra.mxu3 %v4580_v12  ;;  %v660_v21 = vld [vmem:[%s8063_s3 + $0x538] sm:$0xff] }
  0xd9   : > { %1355 = vmatpush.msrb.mxu0 %v3982_v43  ;;  %1371 = vmatpush.msrb.mxu1 %v3956_v37  ;;  %v4616_v37 = vld [vmem:[%s8063_s3 + $0x200] sm:$0xff] }
  0xda   : > { %846 = vmatpush.msra.mxu2 %v4588_v36  ;;  %862 = vmatpush.msra.mxu3 %v4593_v22  ;;  %v4621_v43 = vld [vmem:[%s8063_s3 + $0x2a0] sm:$0xff] }
  0xdb   : > { %1356 = vmatpush.msrb.mxu0 %v3989_v44  ;;  %1372 = vmatpush.msrb.mxu1 %v3961_v38  ;;  %v4630_v38 = vld [vmem:[%s8063_s3 + $0x298] sm:$0xff] }
  0xdc   : > { %847 = vmatpush.msra.mxu2 %v4602_v39  ;;  %863 = vmatpush.msra.mxu3 %v4607_v26  ;;  %v604_v44 = vld [vmem:[%s8063_s3 + $0x378] sm:$0xff] }
  0xdd   : > { %1357 = vmatpush.msrb.mxu0 %v4009_v48  ;;  %1373 = vmatpush.msrb.mxu1 %v3973_v40  ;;  %v481_v48 = vld [vmem:[#allocation2 + $0xa] sm:$0xf]  ;;  %v4642_v40 = vld [vmem:[%s8063_s3 + $0x290] sm:$0xff] }
  0xde   : > { %848 = vmatpush.msra.mxu2 %v4616_v37  ;;  %864 = vmatpush.msra.mxu3 %v4621_v43  ;;  %v489_v41 = vld [vmem:[#allocation2 + $0x1e] sm:$0xf] }
  0xdf   : > { %1358 = vmatpush.msrb.mxu0 %v4027_v52  ;;  %1374 = vmatpush.msrb.mxu1 %v3994_v45  ;;  %v4652_v45 = vld [vmem:[%s8063_s3 + $0x288] sm:$0xff] }
  0xe0   : > { %849 = vmatmul.f32.vlgmr.msra.gmra.mxu2 %v481_v48  ;;  %865 = vmatpush.msra.mxu3 %v4630_v38  ;;  %v602_v52 = vld [vmem:[%s8063_s3 + $0x368] sm:$0xff] }
  0xe1   : > { %873 = vmatpush.msrb.mxu2 %v604_v44  ;;  %1359 = vmatpush.msrb.mxu0 %v4041_v56  ;;  %v4663_v56 = vld [vmem:[%s8063_s3 + $0x280] sm:$0xff]  ;;  %v1233_v44 = vld [vmem:[%s8063_s3 + $0x470] sm:$0xff]  ;;  %v1232_v48 = vld [vmem:[%s8063_s3 + $0x468] sm:$0xff] }
  0xe2   : > { %1375 = vmatpush.msrb.mxu1 %v4001_v46  ;;  %866 = vmatpush.msra.mxu3 %v4642_v40  ;;  %v601_v46 = vld [vmem:[%s8063_s3 + $0x360] sm:$0xff] }
  0xe3   : > { %874 = vmatpush.msrb.mxu2 %v603_v30  ;;  %1360 = vmatpush.msrb.mxu0 %v4048_v57  ;;  %v600_v57 = vld [vmem:[%s8063_s3 + $0x358] sm:$0xff]  ;;  %v677_v30 = vld [vmem:[%s8063_s3 + $0x5c0] sm:$0xff] }
  0xe4   : > { %1376 = vmatpush.msrb.mxu1 %v4014_v49  ;;  %867 = vmatpush.msra.mxu3 %v4652_v45  ;;  %v620_v49 = vld [vmem:[%s8063_s3 + $0x3f8] sm:$0xff] }
  0xe5   : > { %875 = vmatpush.msrb.mxu2 %v602_v52  ;;  %1361 = vmatpush.msrb.mxu0 %v4068_v61  ;;  %v619_v61 = vld [vmem:[%s8063_s3 + $0x3f0] sm:$0xff]  ;;  %v1231_v52 = vld [vmem:[%s8063_s3 + $0x460] sm:$0xff] }
  0xe6   : > { %1377 = vmatpush.msrb.mxu1 %v4032_v53  ;;  %868 = vmatpush.msra.mxu3 %v4663_v56  ;;  %v599_v53 = vld [vmem:[%s8063_s3 + $0x350] sm:$0xff] }
  0xe7   : > { %876 = vmatpush.msrb.mxu2 %v601_v46  ;;  %1362 = vmatpush.msrb.mxu0 %v4092_v3  ;;  %v598_v3 = vld [vmem:[%s8063_s3 + $0x348] sm:$0xff]  ;;  %v676_v46 = vld [vmem:[%s8063_s3 + $0x5b8] sm:$0xff] }
  0xe8   : > { %1378 = vmatpush.msrb.mxu1 %v4053_v58  ;;  %869 = vmatmul.f32.vlgmr.msra.gmra.mxu3 %v482_v33  ;;  %v618_v58 = vld [vmem:[%s8063_s3 + $0x3e8] sm:$0xff]  ;;  %v675_v33 = vld [vmem:[%s8063_s3 + $0x5b0] sm:$0xff] }
  0xe9   : > { %877 = vmatpush.msrb.mxu2 %v600_v57  ;;  %893 = vmatpush.msrb.mxu3 %v620_v49  ;;  %v1230_v57 = vld [vmem:[%s8063_s3 + $0x458] sm:$0xff] }
  0xea   : > { %1363 = vmatpush.msrb.mxu0 %v4106_v7  ;;  %1379 = vmatpush.msrb.mxu1 %v4063_v60  ;;  %v597_v7 = vld [vmem:[%s8063_s3 + $0x340] sm:$0xff]  ;;  %v1250_v49 = vld [vmem:[%s8063_s3 + $0x4f8] sm:$0xff] }
  0xeb   : > { %878 = vmatpush.msrb.mxu2 %v599_v53  ;;  %894 = vmatpush.msrb.mxu3 %v619_v61  ;;  %v617_v60 = vld [vmem:[%s8063_s3 + $0x3e0] sm:$0xff]  ;;  %v371_v53 = vpop.f32.mrf.mxu0  ;;  %v1229_v61 = vld [vmem:[%s8063_s3 + $0x450] sm:$0xff] }
  0xec   : > { %1364 = vmatpush.msrb.mxu0 %v4119_v10  ;;  %1380 = vmatpush.msrb.mxu1 %v4081_v0  ;;  %v596_v10 = vld [vmem:[%s8063_s3 + $0x338] sm:$0xff] }
  0xed   : > { %879 = vmatpush.msrb.mxu2 %v598_v3  ;;  %895 = vmatpush.msrb.mxu3 %v618_v58  ;;  %v616_v0 = vld [vmem:[%s8063_s3 + $0x3d8] sm:$0xff]  ;;  %v1249_v3 = vld [vmem:[%s8063_s3 + $0x4f0] sm:$0xff]  ;;  %v654_v58 = vld [vmem:[%s8063_s3 + $0x508] sm:$0xff] }
  0xee   : > { %1365 = vmatpush.msrb.mxu0 %v4136_v14  ;;  %1381 = vmatpush.msrb.mxu1 %v4097_v4  ;;  %v595_v14 = vld [vmem:[%s8063_s3 + $0x330] sm:$0xff] }
  0xef   : > { %880 = vmatpush.msrb.mxu2 %v597_v7  ;;  %896 = vmatpush.msrb.mxu3 %v617_v60  ;;  %v615_v4 = vld [vmem:[%s8063_s3 + $0x3d0] sm:$0xff]  ;;  %v674_v7 = vld [vmem:[%s8063_s3 + $0x5a8] sm:$0xff]  ;;  %v427_v60 = vpop.f32.mrf.mxu1 }
  0xf0   : > { %1366 = vmatpush.msrb.mxu0 %v4159_v19  ;;  %1382 = vmatpush.msrb.mxu1 %v4124_v11  ;;  %v614_v11 = vld [vmem:[%s8063_s3 + $0x3c8] sm:$0xff]  ;;  %v593_v19 = vld [vmem:[%s8063_s3 + $0x320] sm:$0xff] }
  0xf1   : > { %881 = vmatpush.msrb.mxu2 %v596_v10  ;;  %897 = vmatpush.msrb.mxu3 %v616_v0  ;;  %v1228_v10 = vld [vmem:[%s8063_s3 + $0x448] sm:$0xff] }
  0xf2   : > { %1009 = vmatmul.f32.vlgmr.msra.gmra.mxu0 %v489_v41  ;;  %1383 = vmatpush.msrb.mxu1 %v4142_v15  ;;  %v613_v15 = vld [vmem:[%s8063_s3 + $0x3c0] sm:$0xff]  ;;  %v1248_v0 = vld [vmem:[%s8063_s3 + $0x4e8] sm:$0xff] }
  0xf3   : > { %1431 = vmatpush.msra.mxu0 %v4451_v50  ;;  %882 = vmatpush.msrb.mxu2 %v595_v14  ;;  %v592_v50 = vld [vmem:[%s8063_s3 + $0x318] sm:$0xff]  ;;  %v653_v14 = vld [vmem:[%s8063_s3 + $0x500] sm:$0xff] }
  0xf4   : > { %898 = vmatpush.msrb.mxu3 %v615_v4  ;;  %1384 = vmatpush.msrb.mxu1 %v4154_v18  ;;  %v612_v18 = vld [vmem:[%s8063_s3 + $0x3b8] sm:$0xff]  ;;  %v673_v4 = vld [vmem:[%s8063_s3 + $0x5a0] sm:$0xff] }
  0xf5   : > { %1432 = vmatpush.msra.mxu0 %v4456_v54  ;;  %883 = vmatpush.msrb.mxu2 %v594_v51  ;;  %v490_v54 = vld [vmem:[#allocation2 + $0x23] sm:$0xf] }
  0xf6   : > { %899 = vmatpush.msrb.mxu3 %v614_v11  ;;  %1385 = vmatpush.msrb.mxu1 %v4179_v25  ;;  %v591_v25 = vld [vmem:[%s8063_s3 + $0x310] sm:$0xff]  ;;  %v1227_v51 = vld [vmem:[%s8063_s3 + $0x440] sm:$0xff] }
  0xf7   : > { %1433 = vmatpush.msra.mxu0 %v4463_v63  ;;  %884 = vmatpush.msrb.mxu2 %v593_v19  ;;  %v611_v63 = vld [vmem:[%s8063_s3 + $0x3b0] sm:$0xff]  ;;  %v1247_v11 = vld [vmem:[%s8063_s3 + $0x4e0] sm:$0xff] }
  0xf8   : > { %900 = vmatpush.msrb.mxu3 %v613_v15  ;;  %1386 = vmatpush.msrb.mxu1 %v4193_v29  ;;  %v590_v29 = vld [vmem:[%s8063_s3 + $0x308] sm:$0xff]  ;;  %v672_v15 = vld [vmem:[%s8063_s3 + $0x598] sm:$0xff] }
  0xf9   : > { %1434 = vmatpush.msra.mxu0 %v4469_v2  ;;  %885 = vmatpush.msrb.mxu2 %v592_v50  ;;  %v610_v2 = vld [vmem:[%s8063_s3 + $0x3a8] sm:$0xff]  ;;  %v732_v50 = vld [vmem:[%s8063_s3 + $0x778] sm:$0xff] }
  0xfa   : > { %901 = vmatpush.msrb.mxu3 %v612_v18  ;;  %1029 = vmatmul.f32.vlgmr.msra.gmra.mxu1 %v490_v54  ;;  %v1226_v18 = vld [vmem:[%s8063_s3 + $0x438] sm:$0xff] }
  0xfb   : > { %1435 = vmatpush.msra.mxu0 %v4475_v6  ;;  %1451 = vmatpush.msra.mxu1 %v4480_v8  ;;  %v589_v6 = vld [vmem:[%s8063_s3 + $0x300] sm:$0xff]  ;;  %v487_v54 = vld [vmem:[#allocation2 + $0x15] sm:$0xf] }
  0xfc   : > { %886 = vmatpush.msrb.mxu2 %v591_v25  ;;  %902 = vmatpush.msrb.mxu3 %v611_v63  ;;  %v609_v8 = vld [vmem:[%s8063_s3 + $0x3a0] sm:$0xff]  ;;  %v1246_v25 = vld [vmem:[%s8063_s3 + $0x4d8] sm:$0xff]  ;;  %v671_v63 = vld [vmem:[%s8063_s3 + $0x590] sm:$0xff] }
  0xfd   : > { %1436 = vmatpush.msra.mxu0 %v4486_v16  ;;  %1452 = vmatpush.msra.mxu1 %v4491_v17  ;;  %v608_v16 = vld [vmem:[%s8063_s3 + $0x398] sm:$0xff] }
  0xfe   : > { %887 = vmatpush.msrb.mxu2 %v590_v29  ;;  %903 = vmatpush.msrb.mxu3 %v610_v2  ;;  %v668_v17 = vld [vmem:[%s8063_s3 + $0x578] sm:$0xff]  ;;  %v374_v29 = vpop.f32.mrf.mxu0  ;;  %v731_v2 = vld [vmem:[%s8063_s3 + $0x770] sm:$0xff] }
  0xff   : > { %1437 = vmatpush.msra.mxu0 %v4499_v23  ;;  %1453 = vmatpush.msra.mxu1 %v4504_v24  ;;  %v607_v23 = vld [vmem:[%s8063_s3 + $0x390] sm:$0xff] }
 0x100   : > { %888 = vmatpush.msrb.mxu2 %v589_v6  ;;  %904 = vmatpush.msrb.mxu3 %v609_v8  ;;  %v667_v24 = vld [vmem:[%s8063_s3 + $0x570] sm:$0xff]  ;;  %v375_v8 = vadd.f32 %v4425_v13, %v374_v29  ;;  %v1314_v29 = vld [vmem:[%s8063_s3 + $0x6f8] sm:$0xff] }
 0x101   : > { %1438 = vmatpush.msra.mxu0 %v4511_v27  ;;  %1454 = vmatpush.msra.mxu1 %v4516_v28  ;;  %v606_v27 = vld [vmem:[%s8063_s3 + $0x388] sm:$0xff]  ;;  %v1225_v6 = vld [vmem:[%s8063_s3 + $0x430] sm:$0xff] }
 0x102   : > { %889 = vmatmul.f32.vlgmr.msrb.gmra.mxu2 %v483_v55  ;;  %905 = vmatpush.msrb.mxu3 %v608_v16  ;;  %v666_v28 = vld [vmem:[%s8063_s3 + $0x568] sm:$0xff]  ;;  %v1245_v16 = vld [vmem:[%s8063_s3 + $0x4d0] sm:$0xff] }
 0x103   : > { %953 = vmatpush.msra.mxu2 %v668_v17  ;;  %1439 = vmatpush.msra.mxu0 %v4523_v31  ;;  %v665_v31 = vld [vmem:[%s8063_s3 + $0x560] sm:$0xff]  ;;  %v670_v17 = vld [vmem:[%s8063_s3 + $0x588] sm:$0xff] }
 0x104   : > { %1455 = vmatpush.msra.mxu1 %v4528_v32  ;;  %906 = vmatpush.msrb.mxu3 %v607_v23  ;;  %v484_v32 = vld [vmem:[#allocation2 + $0x10] sm:$0xf]  ;;  %v730_v55 = vld [vmem:[%s8063_s3 + $0x768] sm:$0xff] }
 0x105   : > { %954 = vmatpush.msra.mxu2 %v667_v24  ;;  %1440 = vmatpush.msra.mxu0 %v4535_v42  ;;  %v664_v42 = vld [vmem:[%s8063_s3 + $0x558] sm:$0xff]  ;;  %v1224_v23 = vld [vmem:[%s8063_s3 + $0x428] sm:$0xff] }
 0x106   : > { %1456 = vmatpush.msra.mxu1 %v4540_v47  ;;  %907 = vmatpush.msrb.mxu3 %v606_v27  ;;  %v684_v47 = vld [vmem:[%s8063_s3 + $0x5f8] sm:$0xff]  ;;  %v1244_v24 = vld [vmem:[%s8063_s3 + $0x4c8] sm:$0xff]  ;;  %v669_v27 = vld [vmem:[%s8063_s3 + $0x580] sm:$0xff] }
 0x107   : > { %955 = vmatpush.msra.mxu2 %v666_v28  ;;  %1441 = vmatpush.msra.mxu0 %v4548_v59  ;;  %v663_v59 = vld [vmem:[%s8063_s3 + $0x550] sm:$0xff]  ;;  %v430_v28 = vpop.f32.mrf.mxu1 }
 0x108   : > { %1457 = vmatpush.msra.mxu1 %v4553_v62  ;;  %908 = vmatpush.msrb.mxu3 %v605_v1  ;;  %v683_v62 = vld [vmem:[%s8063_s3 + $0x5f0] sm:$0xff]  ;;  %v729_v1 = vld [vmem:[%s8063_s3 + $0x760] sm:$0xff] }
 0x109   : > { %956 = vmatpush.msra.mxu2 %v665_v31  ;;  %1442 = vmatpush.msra.mxu0 %v4562_v34  ;;  %v662_v34 = vld [vmem:[%s8063_s3 + $0x548] sm:$0xff]  ;;  %v1223_v31 = vld [vmem:[%s8063_s3 + $0x420] sm:$0xff] }
 0x10a   : > { %1458 = vmatpush.msra.mxu1 %v4567_v5  ;;  %909 = vmatmul.f32.vlgmr.msrb.gmra.mxu3 %v484_v32  ;;  %v682_v5 = vld [vmem:[%s8063_s3 + $0x5e8] sm:$0xff]  ;;  %v431_v32 = vadd.f32 %v430_v28, %v375_v8  ;;  %v739_v8 = vld [vmem:[%s8063_s3 + $0x7b0] sm:$0xff] }
 0x10b   : > { %957 = vmatpush.msra.mxu2 %v664_v42  ;;  %973 = vmatpush.msra.mxu3 %v684_v47  ;;  %v1243_v42 = vld [vmem:[%s8063_s3 + $0x4c0] sm:$0xff]  ;;  %v488_v47 = vld [vmem:[#allocation2 + $0x1a] sm:$0xf]  ;;  %v1312_v28 = vld [vmem:[%s8063_s3 + $0x6e8] sm:$0xff] }
 0x10c   : > { %1367 = vmatmul.f32.vlgmr.msrb.gmra.mxu0 %v1075_v9  ;;  %1459 = vmatpush.msra.mxu1 %v4580_v12  ;;  %v661_v12 = vld [vmem:[%s8063_s3 + $0x540] sm:$0xff]  ;;  %v728_v9 = vld [vmem:[%s8063_s3 + $0x758] sm:$0xff] }
 0x10d   : > { %1443 = vmatpush.msra.mxu0 %v4575_v35  ;;  %958 = vmatpush.msra.mxu2 %v663_v59  ;;  %v681_v35 = vld [vmem:[%s8063_s3 + $0x5e0] sm:$0xff]  ;;  %v748_v59 = vld [vmem:[%s8063_s3 + $0x7f8] sm:$0xff] }
 0x10e   : > { %974 = vmatpush.msra.mxu3 %v683_v62  ;;  %1387 = vmatmul.f32.vlgmr.msrb.gmra.mxu1 %v1076_v20  ;;  %v457_v62 = vmax.f32 %v431_v32, 0.0  ;;  %v1222_v20 = vld [vmem:[%s8063_s3 + $0x418] sm:$0xff]  ;;  %v737_v32 = vld [vmem:[%s8063_s3 + $0x7a0] sm:$0xff] }
 0x10f   : > { %1444 = vmatpush.msra.mxu0 %v4588_v36  ;;  %1460 = vmatpush.msra.mxu1 %v4593_v22  ;;  %v680_v36 = vld [vmem:[%s8063_s3 + $0x5d8] sm:$0xff] }
 0x110   : > { %959 = vmatpush.msra.mxu2 %v662_v34  ;;  %975 = vmatpush.msra.mxu3 %v682_v5  ;;  %v1234_v22 = vld [vmem:[%s8063_s3 + $0x478] sm:$0xff]  ;;  %v727_v5 = vld [vmem:[%s8063_s3 + $0x750] sm:$0xff]  ;;  %470 = vst [vmem:[#allocation2 + $0x30] sm:$0xff] %v457_v62 }
 0x111   : > { %1445 = vmatpush.msra.mxu0 %v4602_v39  ;;  %1461 = vmatpush.msra.mxu1 %v4607_v26  ;;  %v659_v39 = vld [vmem:[%s8063_s3 + $0x530] sm:$0xff]  ;;  %v1242_v34 = vld [vmem:[%s8063_s3 + $0x4b8] sm:$0xff] }
 0x112   : > { %960 = vmatpush.msra.mxu2 %v661_v12  ;;  %976 = vmatpush.msra.mxu3 %v681_v35  ;;  %v679_v26 = vld [vmem:[%s8063_s3 + $0x5d0] sm:$0xff]  ;;  %v736_v62 = vld [vmem:[%s8063_s3 + $0x798] sm:$0xff] }
 0x113   : > { %1446 = vmatpush.msra.mxu0 %v4616_v37  ;;  %1462 = vmatpush.msra.mxu1 %v4621_v43  ;;  %v658_v37 = vld [vmem:[%s8063_s3 + $0x528] sm:$0xff]  ;;  %v747_v12 = vld [vmem:[%s8063_s3 + $0x7f0] sm:$0xff] }
 0x114   : > { %961 = vmatpush.msra.mxu2 %v660_v21  ;;  %977 = vmatpush.msra.mxu3 %v680_v36  ;;  %v678_v43 = vld [vmem:[%s8063_s3 + $0x5c8] sm:$0xff]  ;;  %v1221_v35 = vld [vmem:[%s8063_s3 + $0x410] sm:$0xff]  ;;  %v377_v36 = vpop.f32.mrf.mxu0 }
 0x115   : > { %1511 = vmatpush.msrb.mxu0 %v1234_v22  ;;  %1463 = vmatpush.msra.mxu1 %v4630_v38  ;;  %v657_v38 = vld [vmem:[%s8063_s3 + $0x520] sm:$0xff]  ;;  %v1241_v21 = vld [vmem:[%s8063_s3 + $0x4b0] sm:$0xff]  ;;  %v726_v22 = vld [vmem:[%s8063_s3 + $0x748] sm:$0xff] }
 0x116   : > { %962 = vmatpush.msra.mxu2 %v659_v39  ;;  %978 = vmatpush.msra.mxu3 %v679_v26  ;;  %v746_v39 = vld [vmem:[%s8063_s3 + $0x7e8] sm:$0xff]  ;;  %v378_v26 = vadd.f32 %v4425_v13, %v377_v36  ;;  %v1289_v36 = vld [vmem:[%s8063_s3 + $0x630] sm:$0xff] }
 0x117   : > { %1512 = vmatpush.msrb.mxu0 %v1233_v44  ;;  %1464 = vmatpush.msra.mxu1 %v4642_v40  ;;  %v656_v40 = vld [vmem:[%s8063_s3 + $0x518] sm:$0xff]  ;;  %v1220_v44 = vld [vmem:[%s8063_s3 + $0x408] sm:$0xff] }
 0x118   : > { %963 = vmatpush.msra.mxu2 %v658_v37  ;;  %979 = vmatpush.msra.mxu3 %v678_v43  ;;  %v1240_v37 = vld [vmem:[%s8063_s3 + $0x4a8] sm:$0xff]  ;;  %v433_v43 = vpop.f32.mrf.mxu1 }
 0x119   : > { %1513 = vmatpush.msrb.mxu0 %v1232_v48  ;;  %1465 = vmatpush.msra.mxu1 %v4652_v45  ;;  %v655_v45 = vld [vmem:[%s8063_s3 + $0x510] sm:$0xff]  ;;  %v725_v48 = vld [vmem:[%s8063_s3 + $0x740] sm:$0xff] }
 0x11a   : > { %964 = vmatpush.msra.mxu2 %v657_v38  ;;  %980 = vmatpush.msra.mxu3 %v677_v30  ;;  %v745_v38 = vld [vmem:[%s8063_s3 + $0x7e0] sm:$0xff]  ;;  %v434_v30 = vadd.f32 %v433_v43, %v378_v26 }
 0x11b   : > { %1514 = vmatpush.msrb.mxu0 %v1231_v52  ;;  %1466 = vmatpush.msra.mxu1 %v4663_v56  ;;  %v372_v56 = vadd.f32 %v4425_v13, %v371_v53  ;;  %v1219_v52 = vld [vmem:[%s8063_s3 + $0x400] sm:$0xff]  ;;  %v1298_v53 = vld [vmem:[%s8063_s3 + $0x678] sm:$0xff] }
 0x11c   : > { %965 = vmatpush.msra.mxu2 %v656_v40  ;;  %981 = vmatpush.msra.mxu3 %v676_v46  ;;  %v1239_v40 = vld [vmem:[%s8063_s3 + $0x4a0] sm:$0xff]  ;;  %v724_v46 = vld [vmem:[%s8063_s3 + $0x738] sm:$0xff] }
 0x11d   : > { %1515 = vmatpush.msrb.mxu0 %v1230_v57  ;;  %1531 = vmatpush.msrb.mxu1 %v1250_v49  ;;  %v428_v41 = vadd.f32 %v427_v60, %v372_v56  ;;  %v744_v57 = vld [vmem:[%s8063_s3 + $0x7d8] sm:$0xff]  ;;  %v458_v49 = vmax.f32 %v434_v30, 0.0  ;;  %v1237_v56 = vld [vmem:[%s8063_s3 + $0x490] sm:$0xff]  ;;  %v722_v60 = vld [vmem:[%s8063_s3 + $0x728] sm:$0xff] }
 0x11e   : > { %966 = vmatpush.msra.mxu2 %v655_v45  ;;  %982 = vmatpush.msra.mxu3 %v675_v33  ;;  %v1079_v45 = vld [vmem:[#allocation2 + $0x1e] sm:$0xf] }
 0x11f   : > { %1516 = vmatpush.msrb.mxu0 %v1229_v61  ;;  %1532 = vmatpush.msrb.mxu1 %v1249_v3  ;;  %v456_v19 = vmax.f32 %v428_v41, 0.0  ;;  %v1238_v33 = vld [vmem:[%s8063_s3 + $0x498] sm:$0xff]  ;;  %v723_v61 = vld [vmem:[%s8063_s3 + $0x730] sm:$0xff]  ;;  %471 = vst [vmem:[#allocation2 + $0x38] sm:$0xff] %v458_v49  ;;  %v1236_v41 = vld [vmem:[%s8063_s3 + $0x488] sm:$0xff] }
 0x120   : > { %967 = vmatpush.msra.mxu2 %v654_v58  ;;  %983 = vmatpush.msra.mxu3 %v674_v7  ;;  %v743_v3 = vld [vmem:[%s8063_s3 + $0x7d0] sm:$0xff]  ;;  %v380_v58 = vpop.f32.mrf.mxu0  ;;  %v5156_v43 = vld [vmem:[%s8062_s2] ss:$0 sm:$0xff] }
 0x121   : > { %1517 = vmatpush.msrb.mxu0 %v1228_v10  ;;  %1533 = vmatpush.msrb.mxu1 %v1248_v0  ;;  %469 = vst [vmem:[#allocation2 + $0x28] sm:$0xff] %v456_v19  ;;  %v1297_v7 = vld [vmem:[%s8063_s3 + $0x670] sm:$0xff]  ;;  %v381_v10 = vadd.f32 %v4425_v13, %v380_v58  ;;  %v742_v0 = vld [vmem:[%s8063_s3 + $0x7c8] sm:$0xff]  ;;  %v436_v19 = vpop.f32.mrf.mxu1  ;;  %v733_v30 = vld [vmem:[%s8063_s3 + $0x780] sm:$0xff] }
 0x122   : > { %968 = vmatpush.msra.mxu2 %v653_v14  ;;  %984 = vmatpush.msra.mxu3 %v673_v4  ;;  %v1296_v14 = vld [vmem:[%s8063_s3 + $0x668] sm:$0xff]  ;;  %v721_v4 = vld [vmem:[%s8063_s3 + $0x720] sm:$0xff]  ;;  %v1153_v58 = vld [vmem:[%s8063_s3 + $0x1f0] sm:$0xff] }
 0x123   : > { %1518 = vmatpush.msrb.mxu0 %v1227_v51  ;;  %1534 = vmatpush.msrb.mxu1 %v1247_v11  ;;  %v741_v51 = vld [vmem:[%s8063_s3 + $0x7c0] sm:$0xff] }
 0x124   : > { %969 = vmatmul.f32.vlgmr.msra.gmra.mxu2 %v487_v54  ;;  %985 = vmatpush.msra.mxu3 %v672_v15  ;;  %v1235_v11 = vld [vmem:[%s8063_s3 + $0x480] sm:$0xff]  ;;  %v740_v54 = vld [vmem:[%s8063_s3 + $0x7b8] sm:$0xff] }
 0x125   : > { %1033 = vmatpush.msrb.mxu2 %v732_v50  ;;  %1519 = vmatpush.msrb.mxu0 %v1226_v18  ;;  %v1295_v15 = vld [vmem:[%s8063_s3 + $0x660] sm:$0xff]  ;;  %v720_v50 = vld [vmem:[%s8063_s3 + $0x718] sm:$0xff]  ;;  %v437_v18 = vadd.f32 %v436_v19, %v381_v10  ;;  %v1305_v10 = vld [vmem:[%s8063_s3 + $0x6b0] sm:$0xff] }
 0x126   : > { %1535 = vmatpush.msrb.mxu1 %v1246_v25  ;;  %986 = vmatpush.msra.mxu3 %v671_v63  ;;  %v1080_v25 = vld [vmem:[#allocation2 + $0x23] sm:$0xf]  ;;  %v1294_v63 = vld [vmem:[%s8063_s3 + $0x658] sm:$0xff] }
 0x127   : > { %1034 = vmatpush.msrb.mxu2 %v731_v2  ;;  %1520 = vmatpush.msrb.mxu0 %v1225_v6  ;;  %v459_v2 = vmax.f32 %v437_v18, 0.0  ;;  %v719_v6 = vld [vmem:[%s8063_s3 + $0x710] sm:$0xff]  ;;  %v1131_v19 = vld [vmem:[%s8063_s3 + $0x140] sm:$0xff] }
 0x128   : > { %1536 = vmatpush.msrb.mxu1 %v1245_v16  ;;  %987 = vmatpush.msra.mxu3 %v670_v17  ;;  %v1293_v16 = vld [vmem:[%s8063_s3 + $0x650] sm:$0xff]  ;;  %v1303_v18 = vld [vmem:[%s8063_s3 + $0x6a0] sm:$0xff] }
 0x129   : > { %1035 = vmatpush.msrb.mxu2 %v730_v55  ;;  %1521 = vmatpush.msrb.mxu0 %v1224_v23  ;;  %v1313_v17 = vld [vmem:[%s8063_s3 + $0x6f0] sm:$0xff]  ;;  %472 = vst [vmem:[#allocation2 + $0x40] sm:$0xff] %v459_v2  ;;  %v718_v55 = vld [vmem:[%s8063_s3 + $0x708] sm:$0xff] }
 0x12a   : > { %1537 = vmatpush.msrb.mxu1 %v1244_v24  ;;  %988 = vmatpush.msra.mxu3 %v669_v27  ;;  %v738_v23 = vld [vmem:[%s8063_s3 + $0x7a8] sm:$0xff]  ;;  %v383_v24 = vpop.f32.mrf.mxu0 }
 0x12b   : > { %1036 = vmatpush.msrb.mxu2 %v729_v1  ;;  %1522 = vmatpush.msrb.mxu0 %v1223_v31  ;;  %v1292_v27 = vld [vmem:[%s8063_s3 + $0x648] sm:$0xff]  ;;  %v384_v1 = vadd.f32 %v4425_v13, %v383_v24  ;;  %v717_v31 = vld [vmem:[%s8063_s3 + $0x700] sm:$0xff]  ;;  %v1703_v24 = vld [vmem:[%s8063_s3 + $0x70] sm:$0xff] }
 0x12c   : > { %1538 = vmatpush.msrb.mxu1 %v1243_v42  ;;  %989 = vmatmul.f32.vlgmr.msra.gmra.mxu3 %v488_v47  ;;  %v439_v42 = vpop.f32.mrf.mxu1  ;;  %v1291_v47 = vld [vmem:[%s8063_s3 + $0x640] sm:$0xff]  ;;  %v1083_v2 = vld [vmem:[#allocation2 + $0x28] sm:$0xf] }
 0x12d   : > { %1037 = vmatpush.msrb.mxu2 %v728_v9  ;;  %1053 = vmatpush.msrb.mxu3 %v748_v59  ;;  %v1311_v13 = vld [vmem:[%s8063_s3 + $0x6e0] sm:$0xff]  ;;  %v440_v9 = vadd.f32 %v439_v42, %v384_v1  ;;  %v1148_v1 = vld [vmem:[%s8063_s3 + $0x1c8] sm:$0xff] }
 0x12e   : > { %1523 = vmatpush.msrb.mxu0 %v1222_v20  ;;  %1539 = vmatpush.msrb.mxu1 %v1242_v34  ;;  %v491_v59 = vld [vmem:[#allocation2 + $0x1f] sm:$0xf]  ;;  %v1702_v42 = vld [vmem:[%s8063_s3 + $0x68] sm:$0xff] }
 0x12f   : > { %1038 = vmatpush.msrb.mxu2 %v727_v5  ;;  %1054 = vmatpush.msrb.mxu3 %v747_v12  ;;  %v1138_v20 = vld [vmem:[%s8063_s3 + $0x178] sm:$0xff]  ;;  %v460_v5 = vmax.f32 %v440_v9, 0.0  ;;  %v1299_v9 = vld [vmem:[%s8063_s3 + $0x680] sm:$0xff] }
 0x130   : > { %1524 = vmatpush.msrb.mxu0 %v1221_v35  ;;  %1540 = vmatpush.msrb.mxu1 %v1241_v21  ;;  %v1290_v34 = vld [vmem:[%s8063_s3 + $0x638] sm:$0xff]  ;;  %v735_v35 = vld [vmem:[%s8063_s3 + $0x790] sm:$0xff] }
 0x131   : > { %1039 = vmatpush.msrb.mxu2 %v726_v22  ;;  %1055 = vmatpush.msrb.mxu3 %v746_v39  ;;  %v1310_v12 = vld [vmem:[%s8063_s3 + $0x6d8] sm:$0xff]  ;;  %v1137_v21 = vld [vmem:[%s8063_s3 + $0x170] sm:$0xff]  ;;  %473 = vst [vmem:[#allocation2 + $0x48] sm:$0xff] %v460_v5  ;;  %v734_v39 = vld [vmem:[%s8063_s3 + $0x788] sm:$0xff] }
 0x132   : > { %1525 = vmatpush.msrb.mxu0 %v1220_v44  ;;  %1541 = vmatpush.msrb.mxu1 %v1240_v37  ;;  %v1309_v22 = vld [vmem:[%s8063_s3 + $0x6d0] sm:$0xff]  ;;  %v386_v26 = vpop.f32.mrf.mxu0  ;;  %v1136_v44 = vld [vmem:[%s8063_s3 + $0x168] sm:$0xff]  ;;  %v1146_v5 = vld [vmem:[%s8063_s3 + $0x1b8] sm:$0xff] }
 0x133   : > { %1040 = vmatpush.msrb.mxu2 %v725_v48  ;;  %1056 = vmatpush.msrb.mxu3 %v745_v38  ;;  %v1288_v37 = vld [vmem:[%s8063_s3 + $0x628] sm:$0xff]  ;;  %v387_v48 = vadd.f32 %v5156_v43, %v386_v26  ;;  %v1699_v26 = vld [vmem:[%s8063_s3 + $0x50] sm:$0xff] }
 0x134   : > { %1526 = vmatpush.msrb.mxu0 %v1219_v52  ;;  %1542 = vmatpush.msrb.mxu1 %v1239_v40  ;;  %v1308_v38 = vld [vmem:[%s8063_s3 + $0x6c8] sm:$0xff]  ;;  %v1135_v52 = vld [vmem:[%s8063_s3 + $0x160] sm:$0xff]  ;;  %v442_v49 = vpop.f32.mrf.mxu1 }
 0x135   : > { %1041 = vmatpush.msrb.mxu2 %v724_v46  ;;  %1057 = vmatpush.msrb.mxu3 %v744_v57  ;;  %v1287_v40 = vld [vmem:[%s8063_s3 + $0x620] sm:$0xff] }
 0x136   : > { %1447 = vmatmul.f32.vlgmr.msra.gmra.mxu0 %v1079_v45  ;;  %1543 = vmatpush.msrb.mxu1 %v1238_v33  ;;  %v1307_v46 = vld [vmem:[%s8063_s3 + $0x6c0] sm:$0xff]  ;;  %v1134_v45 = vld [vmem:[%s8063_s3 + $0x158] sm:$0xff] }
 0x137   : > { %1591 = vmatpush.msra.mxu0 %v1298_v53  ;;  %1042 = vmatpush.msrb.mxu2 %v723_v61  ;;  %v492_v57 = vld [vmem:[#allocation2 + $0x24] sm:$0xf]  ;;  %v1154_v33 = vld [vmem:[%s8063_s3 + $0x1f8] sm:$0xff]  ;;  %v443_v53 = vadd.f32 %v442_v49, %v387_v48  ;;  %v1698_v48 = vld [vmem:[%s8063_s3 + $0x48] sm:$0xff] }
 0x138   : > { %1058 = vmatpush.msrb.mxu3 %v743_v3  ;;  %1544 = vmatpush.msrb.mxu1 %v1237_v56  ;;  %v1286_v61 = vld [vmem:[%s8063_s3 + $0x618] sm:$0xff]  ;;  %v1133_v56 = vld [vmem:[%s8063_s3 + $0x150] sm:$0xff] }
 0x139   : > { %1592 = vmatpush.msra.mxu0 %v1297_v7  ;;  %1043 = vmatpush.msrb.mxu2 %v722_v60  ;;  %v1306_v3 = vld [vmem:[%s8063_s3 + $0x6b8] sm:$0xff]  ;;  %v461_v7 = vmax.f32 %v443_v53, 0.0  ;;  %v1285_v60 = vld [vmem:[%s8063_s3 + $0x610] sm:$0xff] }
 0x13a   : > { %1059 = vmatpush.msrb.mxu3 %v742_v0  ;;  %1545 = vmatpush.msrb.mxu1 %v1236_v41  ;;  %v1132_v0 = vld [vmem:[%s8063_s3 + $0x148] sm:$0xff]  ;;  %v1202_v49 = vld [vmem:[%s8063_s3 + $0x378] sm:$0xff] }
 0x13b   : > { %1593 = vmatpush.msra.mxu0 %v1296_v14  ;;  %1044 = vmatpush.msrb.mxu2 %v721_v4  ;;  %v1152_v41 = vld [vmem:[%s8063_s3 + $0x1e8] sm:$0xff]  ;;  %474 = vst [vmem:[#allocation2 + $0x50] sm:$0xff] %v461_v7  ;;  %v389_v14 = vpop.f32.mrf.mxu0  ;;  %v1716_v53 = vld [vmem:[%s8063_s3 + $0xd8] sm:$0xff] }
 0x13c   : > { %1060 = vmatpush.msrb.mxu3 %v741_v51  ;;  %1546 = vmatpush.msrb.mxu1 %v1235_v11  ;;  %v1284_v4 = vld [vmem:[%s8063_s3 + $0x608] sm:$0xff]  ;;  %v390_v11 = vadd.f32 %v5156_v43, %v389_v14  ;;  %v1199_v14 = vld [vmem:[%s8063_s3 + $0x360] sm:$0xff] }
 0x13d   : > { %1594 = vmatpush.msra.mxu0 %v1295_v15  ;;  %1045 = vmatpush.msrb.mxu2 %v720_v50  ;;  %v1304_v51 = vld [vmem:[%s8063_s3 + $0x6a8] sm:$0xff]  ;;  %v1151_v15 = vld [vmem:[%s8063_s3 + $0x1e0] sm:$0xff] }
 0x13e   : > { %1061 = vmatpush.msrb.mxu3 %v740_v54  ;;  %1467 = vmatmul.f32.vlgmr.msra.gmra.mxu1 %v1080_v25  ;;  %v1283_v50 = vld [vmem:[%s8063_s3 + $0x600] sm:$0xff]  ;;  %v445_v54 = vpop.f32.mrf.mxu1  ;;  %v1130_v25 = vld [vmem:[%s8063_s3 + $0x138] sm:$0xff]  ;;  %v1140_v7 = vld [vmem:[%s8063_s3 + $0x188] sm:$0xff] }
 0x13f   : > { %1595 = vmatpush.msra.mxu0 %v1294_v63  ;;  %1611 = vmatpush.msra.mxu1 %v1314_v29  ;;  %v1150_v63 = vld [vmem:[%s8063_s3 + $0x1d8] sm:$0xff]  ;;  %v446_v29 = vadd.f32 %v445_v54, %v390_v11  ;;  %v1197_v54 = vld [vmem:[%s8063_s3 + $0x350] sm:$0xff] }
 0x140   : > { %1046 = vmatpush.msrb.mxu2 %v719_v6  ;;  %1062 = vmatpush.msrb.mxu3 %v739_v8  ;;  %v1302_v6 = vld [vmem:[%s8063_s3 + $0x698] sm:$0xff] }
 0x141   : > { %1596 = vmatpush.msra.mxu0 %v1293_v16  ;;  %1612 = vmatpush.msra.mxu1 %v1313_v17  ;;  %v1704_v8 = vld [vmem:[%s8063_s3 + $0x78] sm:$0xff]  ;;  %v1129_v16 = vld [vmem:[%s8063_s3 + $0x130] sm:$0xff]  ;;  %v462_v17 = vmax.f32 %v446_v29, 0.0 }
 0x142   : > { %1047 = vmatpush.msrb.mxu2 %v718_v55  ;;  %1063 = vmatpush.msrb.mxu3 %v738_v23  ;;  %v1149_v55 = vld [vmem:[%s8063_s3 + $0x1d0] sm:$0xff]  ;;  %v1198_v11 = vld [vmem:[%s8063_s3 + $0x358] sm:$0xff] }
 0x143   : > { %1597 = vmatpush.msra.mxu0 %v1292_v27  ;;  %1613 = vmatpush.msra.mxu1 %v1312_v28  ;;  %v1301_v23 = vld [vmem:[%s8063_s3 + $0x690] sm:$0xff]  ;;  %v1128_v27 = vld [vmem:[%s8063_s3 + $0x128] sm:$0xff]  ;;  %475 = vst [vmem:[#allocation2 + $0x58] sm:$0xff] %v462_v17  ;;  %v392_v28 = vpop.f32.mrf.mxu0  ;;  %v1195_v17 = vld [vmem:[%s8063_s3 + $0x340] sm:$0xff] }
 0x144   : > { %1048 = vmatpush.msrb.mxu2 %v717_v31  ;;  %1064 = vmatpush.msrb.mxu3 %v737_v32  ;;  %v1300_v31 = vld [vmem:[%s8063_s3 + $0x688] sm:$0xff]  ;;  %v393_v32 = vadd.f32 %v5156_v43, %v392_v28  ;;  %v1711_v29 = vld [vmem:[%s8063_s3 + $0xb0] sm:$0xff]  ;;  %v1214_v28 = vld [vmem:[%s8063_s3 + $0x3d8] sm:$0xff] }
 0x145   : > { %1598 = vmatpush.msra.mxu0 %v1291_v47  ;;  %1614 = vmatpush.msra.mxu1 %v1311_v13  ;;  %v1127_v47 = vld [vmem:[%s8063_s3 + $0x120] sm:$0xff]  ;;  %v1144_v43 = vld [vmem:[%s8063_s3 + $0x1a8] sm:$0xff] }
 0x146   : > { %1049 = vmatmul.f32.vlgmr.msrb.gmra.mxu2 %v491_v59  ;;  %1065 = vmatpush.msrb.mxu3 %v736_v62  ;;  %v1147_v13 = vld [vmem:[%s8063_s3 + $0x1c0] sm:$0xff]  ;;  %v448_v59 = vpop.f32.mrf.mxu1 }
 0x147   : > { %1391 = vmatpush.msra.mxu2 %v1138_v20  ;;  %1599 = vmatpush.msra.mxu0 %v1290_v34  ;;  %v1701_v62 = vld [vmem:[%s8063_s3 + $0x60] sm:$0xff]  ;;  %v1126_v20 = vld [vmem:[%s8063_s3 + $0x118] sm:$0xff]  ;;  %v449_v34 = vadd.f32 %v448_v59, %v393_v32  ;;  %v1192_v59 = vld [vmem:[%s8063_s3 + $0x328] sm:$0xff] }
 0x148   : > { %1615 = vmatpush.msra.mxu1 %v1310_v12  ;;  %1066 = vmatpush.msrb.mxu3 %v735_v35  ;;  %v1084_v12 = vld [vmem:[#allocation2 + $0x2d] sm:$0xf]  ;;  %v1700_v35 = vld [vmem:[%s8063_s3 + $0x58] sm:$0xff] }
 0x149   : > { %1392 = vmatpush.msra.mxu2 %v1137_v21  ;;  %1600 = vmatpush.msra.mxu0 %v1289_v36  ;;  %v1720_v21 = vld [vmem:[%s8063_s3 + $0xf8] sm:$0xff]  ;;  %v463_v36 = vmax.f32 %v449_v34, 0.0  ;;  %v1766_v34 = vld [vmem:[%s8063_s3 + $0x268] sm:$0xff] }
 0x14a   : > { %1616 = vmatpush.msra.mxu1 %v1309_v22  ;;  %1067 = vmatpush.msrb.mxu3 %v734_v39  ;;  %v1125_v22 = vld [vmem:[%s8063_s3 + $0x110] sm:$0xff]  ;;  %v1768_v32 = vld [vmem:[%s8063_s3 + $0x278] sm:$0xff] }
 0x14b   : > { %1393 = vmatpush.msra.mxu2 %v1136_v44  ;;  %1601 = vmatpush.msra.mxu0 %v1288_v37  ;;  %v1145_v39 = vld [vmem:[%s8063_s3 + $0x1b0] sm:$0xff]  ;;  %476 = vst [vmem:[#allocation2 + $0x60] sm:$0xf] %v463_v36  ;;  %v1124_v37 = vld [vmem:[%s8063_s3 + $0x108] sm:$0xff]  ;;  %v1190_v36 = vld [vmem:[%s8063_s3 + $0x318] sm:$0xff] }
 0x14c   : > { %1617 = vmatpush.msra.mxu1 %v1308_v38  ;;  %1068 = vmatpush.msrb.mxu3 %v733_v30  ;;  %v1719_v44 = vld [vmem:[%s8063_s3 + $0xf0] sm:$0xff]  ;;  %v1718_v38 = vld [vmem:[%s8063_s3 + $0xe8] sm:$0xff]  ;;  %v1123_v30 = vld [vmem:[%s8063_s3 + $0x100] sm:$0xff] }
 0x14d   : > { %1394 = vmatpush.msra.mxu2 %v1135_v52  ;;  %1602 = vmatpush.msra.mxu0 %v1287_v40  ;;  %v1143_v52 = vld [vmem:[%s8063_s3 + $0x1a0] sm:$0xff] }
 0x14e   : > { %1618 = vmatpush.msra.mxu1 %v1307_v46  ;;  %1069 = vmatmul.f32.vlgmr.msrb.gmra.mxu3 %v492_v57  ;;  %v1697_v40 = vld [vmem:[%s8063_s3 + $0x40] sm:$0xff]  ;;  %v1142_v57 = vld [vmem:[%s8063_s3 + $0x198] sm:$0xff] }
 0x14f   : > { %1395 = vmatpush.msra.mxu2 %v1134_v45  ;;  %1411 = vmatpush.msra.mxu3 %v1154_v33  ;;  %v1717_v46 = vld [vmem:[%s8063_s3 + $0xe0] sm:$0xff]  ;;  %v1696_v45 = vld [vmem:[%s8063_s3 + $0x38] sm:$0xff] }
 0x150   : > { %1603 = vmatpush.msra.mxu0 %v1286_v61  ;;  %1619 = vmatpush.msra.mxu1 %v1306_v3  ;;  %v1077_v33 = vld [vmem:[#allocation2 + $0x15] sm:$0xf] }
 0x151   : > { %1396 = vmatpush.msra.mxu2 %v1133_v56  ;;  %1412 = vmatpush.msra.mxu3 %v1153_v58  ;;  %v1141_v61 = vld [vmem:[%s8063_s3 + $0x190] sm:$0xff] }
 0x152   : > { %1604 = vmatpush.msra.mxu0 %v1285_v60  ;;  %1620 = vmatpush.msra.mxu1 %v1305_v10  ;;  %v1201_v3 = vld [vmem:[%s8063_s3 + $0x370] sm:$0xff]  ;;  %v1200_v60 = vld [vmem:[%s8063_s3 + $0x368] sm:$0xff] }
 0x153   : > { %1397 = vmatpush.msra.mxu2 %v1132_v0  ;;  %1413 = vmatpush.msra.mxu3 %v1152_v41  ;;  %v1695_v56 = vld [vmem:[%s8063_s3 + $0x30] sm:$0xff]  ;;  %v1694_v10 = vld [vmem:[%s8063_s3 + $0x28] sm:$0xff]  ;;  %v1139_v41 = vld [vmem:[%s8063_s3 + $0x180] sm:$0xff] }
 0x154   : > { %1605 = vmatpush.msra.mxu0 %v1284_v4  ;;  %1621 = vmatpush.msra.mxu1 %v1304_v51  ;;  %v1715_v58 = vld [vmem:[%s8063_s3 + $0xd0] sm:$0xff]  ;;  %v1714_v0 = vld [vmem:[%s8063_s3 + $0xc8] sm:$0xff]  ;;  %v1693_v4 = vld [vmem:[%s8063_s3 + $0x20] sm:$0xff] }
 0x155   : > { %1398 = vmatpush.msra.mxu2 %v1131_v19  ;;  %1414 = vmatpush.msra.mxu3 %v1151_v15  ;;  %v1713_v51 = vld [vmem:[%s8063_s3 + $0xc0] sm:$0xff]  ;;  %v1218_v19 = vld [vmem:[%s8063_s3 + $0x3f8] sm:$0xff] }
 0x156   : > { %1606 = vmatpush.msra.mxu0 %v1283_v50  ;;  %1622 = vmatpush.msra.mxu1 %v1303_v18  ;;  %v1078_v15 = vld [vmem:[#allocation2 + $0x1a] sm:$0xf] }
 0x157   : > { %1399 = vmatpush.msra.mxu2 %v1130_v25  ;;  %1415 = vmatpush.msra.mxu3 %v1150_v63  ;;  %v1692_v50 = vld [vmem:[%s8063_s3 + $0x18] sm:$0xff]  ;;  %v1217_v25 = vld [vmem:[%s8063_s3 + $0x3f0] sm:$0xff] }
 0x158   : > { %1527 = vmatmul.f32.vlgmr.msrb.gmra.mxu0 %v1083_v2  ;;  %1623 = vmatpush.msra.mxu1 %v1302_v6  ;;  %v1712_v18 = vld [vmem:[%s8063_s3 + $0xb8] sm:$0xff]  ;;  %v1691_v63 = vld [vmem:[%s8063_s3 + $0x10] sm:$0xff]  ;;  %v1196_v2 = vld [vmem:[%s8063_s3 + $0x348] sm:$0xff] }
 0x159   : > { %1949 = vmatpush.msrb.mxu0 %v1704_v8  ;;  %1400 = vmatpush.msra.mxu2 %v1129_v16  ;;  %v1216_v6 = vld [vmem:[%s8063_s3 + $0x3e8] sm:$0xff] }
 0x15a   : > { %1416 = vmatpush.msra.mxu3 %v1149_v55  ;;  %1624 = vmatpush.msra.mxu1 %v1301_v23  ;;  %v1690_v8 = vld [vmem:[%s8063_s3 + $0x8] sm:$0xff]  ;;  %v1215_v55 = vld [vmem:[%s8063_s3 + $0x3e0] sm:$0xff] }
 0x15b   : > { %1950 = vmatpush.msrb.mxu0 %v1703_v24  ;;  %1401 = vmatpush.msra.mxu2 %v1128_v27  ;;  %v1710_v16 = vld [vmem:[%s8063_s3 + $0xa8] sm:$0xff]  ;;  %v1689_v23 = vld [vmem:[%s8063_s3] sm:$0xff]  ;;  %v1194_v27 = vld [vmem:[%s8063_s3 + $0x338] sm:$0xff] }
 0x15c   : > { %1417 = vmatpush.msra.mxu3 %v1148_v1  ;;  %1625 = vmatpush.msra.mxu1 %v1300_v31  ;;  %v1709_v24 = vld [vmem:[%s8063_s3 + $0xa0] sm:$0xff]  ;;  %v1087_v1 = vld [vmem:[#allocation2 + $0x32] sm:$0xf]  ;;  %v1708_v31 = vld [vmem:[%s8063_s3 + $0x98] sm:$0xff] }
 0x15d   : > { %1951 = vmatpush.msrb.mxu0 %v1702_v42  ;;  %1402 = vmatpush.msra.mxu2 %v1127_v47  ;;  %v1193_v42 = vld [vmem:[%s8063_s3 + $0x330] sm:$0xff] }
 0x15e   : > { %1418 = vmatpush.msra.mxu3 %v1147_v13  ;;  %1626 = vmatpush.msra.mxu1 %v1299_v9  ;;  %v1213_v47 = vld [vmem:[%s8063_s3 + $0x3d0] sm:$0xff] }
 0x15f   : > { %1952 = vmatpush.msrb.mxu0 %v1701_v62  ;;  %1403 = vmatpush.msra.mxu2 %v1126_v20  ;;  %v1707_v13 = vld [vmem:[%s8063_s3 + $0x90] sm:$0xff]  ;;  %v1212_v62 = vld [vmem:[%s8063_s3 + $0x3c8] sm:$0xff] }
 0x160   : > { %1419 = vmatpush.msra.mxu3 %v1146_v5  ;;  %1547 = vmatmul.f32.vlgmr.msrb.gmra.mxu1 %v1084_v12  ;;  %v1767_v9 = vld [vmem:[%s8063_s3 + $0x270] sm:$0xff]  ;;  %v1706_v20 = vld [vmem:[%s8063_s3 + $0x88] sm:$0xff]  ;;  %v1191_v5 = vld [vmem:[%s8063_s3 + $0x320] sm:$0xff] }
 0x161   : > { %1953 = vmatpush.msrb.mxu0 %v1700_v35  ;;  %1969 = vmatpush.msrb.mxu1 %v1720_v21  ;;  %v1211_v12 = vld [vmem:[%s8063_s3 + $0x3c0] sm:$0xff] }
 0x162   : > { %1404 = vmatpush.msra.mxu2 %v1125_v22  ;;  %1420 = vmatpush.msra.mxu3 %v1145_v39  ;;  %v1705_v35 = vld [vmem:[%s8063_s3 + $0x80] sm:$0xff]  ;;  %v1210_v22 = vld [vmem:[%s8063_s3 + $0x3b8] sm:$0xff] }
 0x163   : > { %1954 = vmatpush.msrb.mxu0 %v1699_v26  ;;  %1970 = vmatpush.msrb.mxu1 %v1719_v44  ;;  %v1765_v21 = vld [vmem:[%s8063_s3 + $0x260] sm:$0xff]  ;;  %v1088_v39 = vld [vmem:[#allocation2 + $0x37] sm:$0xf] }
 0x164   : > { %1405 = vmatpush.msra.mxu2 %v1124_v37  ;;  %1421 = vmatpush.msra.mxu3 %v1144_v43  ;;  %v1764_v26 = vld [vmem:[%s8063_s3 + $0x258] sm:$0xff]  ;;  %v1189_v37 = vld [vmem:[%s8063_s3 + $0x310] sm:$0xff] }
 0x165   : > { %1955 = vmatpush.msrb.mxu0 %v1698_v48  ;;  %1971 = vmatpush.msrb.mxu1 %v1718_v38  ;;  %v1784_v44 = vld [vmem:[%s8063_s3 + $0x2f8] sm:$0xff]  ;;  %v1209_v43 = vld [vmem:[%s8063_s3 + $0x3b0] sm:$0xff] }
 0x166   : > { %1406 = vmatpush.msra.mxu2 %v1123_v30  ;;  %1422 = vmatpush.msra.mxu3 %v1143_v52  ;;  %v1763_v48 = vld [vmem:[%s8063_s3 + $0x250] sm:$0xff]  ;;  %v1188_v30 = vld [vmem:[%s8063_s3 + $0x308] sm:$0xff] }
 0x167   : > { %1956 = vmatpush.msrb.mxu0 %v1697_v40  ;;  %1972 = vmatpush.msrb.mxu1 %v1717_v46  ;;  %v1783_v38 = vld [vmem:[%s8063_s3 + $0x2f0] sm:$0xff]  ;;  %v1208_v52 = vld [vmem:[%s8063_s3 + $0x3a8] sm:$0xff] }
 0x168   : > { %1407 = vmatmul.f32.vlgmr.msra.gmra.mxu2 %v1077_v33  ;;  %1423 = vmatpush.msra.mxu3 %v1142_v57  ;;  %v1762_v40 = vld [vmem:[%s8063_s3 + $0x248] sm:$0xff]  ;;  %v1187_v57 = vld [vmem:[%s8063_s3 + $0x300] sm:$0xff] }
 0x169   : > { %1471 = vmatpush.msrb.mxu2 %v1202_v49  ;;  %1957 = vmatpush.msrb.mxu0 %v1696_v45  ;;  %v1782_v46 = vld [vmem:[%s8063_s3 + $0x2e8] sm:$0xff]  ;;  %v1207_v49 = vld [vmem:[%s8063_s3 + $0x3a0] sm:$0xff] }
 0x16a   : > { %1973 = vmatpush.msrb.mxu1 %v1716_v53  ;;  %1424 = vmatpush.msra.mxu3 %v1141_v61  ;;  %v1761_v45 = vld [vmem:[%s8063_s3 + $0x240] sm:$0xff]  ;;  %v1206_v53 = vld [vmem:[%s8063_s3 + $0x398] sm:$0xff] }
 0x16b   : > { %1472 = vmatpush.msrb.mxu2 %v1201_v3  ;;  %1958 = vmatpush.msrb.mxu0 %v1695_v56  ;;  %v1781_v33 = vld [vmem:[%s8063_s3 + $0x2e0] sm:$0xff]  ;;  %v1266_v61 = vld [vmem:[%s8063_s3 + $0x578] sm:$0xff] }
 0x16c   : > { %1974 = vmatpush.msrb.mxu1 %v1715_v58  ;;  %1425 = vmatpush.msra.mxu3 %v1140_v7  ;;  %v1760_v3 = vld [vmem:[%s8063_s3 + $0x238] sm:$0xff]  ;;  %v1205_v7 = vld [vmem:[%s8063_s3 + $0x390] sm:$0xff] }
 0x16d   : > { %1473 = vmatpush.msrb.mxu2 %v1200_v60  ;;  %1959 = vmatpush.msrb.mxu0 %v1694_v10  ;;  %v1081_v56 = vld [vmem:[#allocation2 + $0x1f] sm:$0xf]  ;;  %v1265_v60 = vld [vmem:[%s8063_s3 + $0x570] sm:$0xff] }
 0x16e   : > { %1975 = vmatpush.msrb.mxu1 %v1714_v0  ;;  %1426 = vmatpush.msra.mxu3 %v1139_v41  ;;  %v1780_v58 = vld [vmem:[%s8063_s3 + $0x2d8] sm:$0xff]  ;;  %v1759_v10 = vld [vmem:[%s8063_s3 + $0x230] sm:$0xff]  ;;  %v1204_v41 = vld [vmem:[%s8063_s3 + $0x388] sm:$0xff] }
 0x16f   : > { %1474 = vmatpush.msrb.mxu2 %v1199_v14  ;;  %1960 = vmatpush.msrb.mxu0 %v1693_v4  ;;  %v1779_v0 = vld [vmem:[%s8063_s3 + $0x2d0] sm:$0xff]  ;;  %v1264_v14 = vld [vmem:[%s8063_s3 + $0x568] sm:$0xff] }
 0x170   : > { %1976 = vmatpush.msrb.mxu1 %v1713_v51  ;;  %1427 = vmatmul.f32.vlgmr.msra.gmra.mxu3 %v1078_v15  ;;  %v1758_v4 = vld [vmem:[%s8063_s3 + $0x228] sm:$0xff]  ;;  %v1757_v15 = vld [vmem:[%s8063_s3 + $0x220] sm:$0xff] }
 0x171   : > { %1475 = vmatpush.msrb.mxu2 %v1198_v11  ;;  %1491 = vmatpush.msrb.mxu3 %v1218_v19  ;;  %v1778_v51 = vld [vmem:[%s8063_s3 + $0x2c8] sm:$0xff]  ;;  %v1203_v11 = vld [vmem:[%s8063_s3 + $0x380] sm:$0xff] }
 0x172   : > { %1961 = vmatpush.msrb.mxu0 %v1692_v50  ;;  %1977 = vmatpush.msrb.mxu1 %v1712_v18  ;;  %v1263_v19 = vld [vmem:[%s8063_s3 + $0x560] sm:$0xff]  ;;  %v1262_v18 = vld [vmem:[%s8063_s3 + $0x558] sm:$0xff] }
 0x173   : > { %1476 = vmatpush.msrb.mxu2 %v1197_v54  ;;  %1492 = vmatpush.msrb.mxu3 %v1217_v25  ;;  %v1777_v50 = vld [vmem:[%s8063_s3 + $0x2c0] sm:$0xff]  ;;  %v1282_v54 = vld [vmem:[%s8063_s3 + $0x5f8] sm:$0xff] }
 0x174   : > { %1962 = vmatpush.msrb.mxu0 %v1691_v63  ;;  %1978 = vmatpush.msrb.mxu1 %v1711_v29  ;;  %v1082_v25 = vld [vmem:[#allocation2 + $0x24] sm:$0xf]  ;;  %v1756_v63 = vld [vmem:[%s8063_s3 + $0x218] sm:$0xff] }
 0x175   : > { %1477 = vmatpush.msrb.mxu2 %v1196_v2  ;;  %1493 = vmatpush.msrb.mxu3 %v1216_v6  ;;  %v1776_v29 = vld [vmem:[%s8063_s3 + $0x2b8] sm:$0xff]  ;;  %v1261_v2 = vld [vmem:[%s8063_s3 + $0x550] sm:$0xff] }
 0x176   : > { %1963 = vmatpush.msrb.mxu0 %v1690_v8  ;;  %1979 = vmatpush.msrb.mxu1 %v1710_v16  ;;  %v1281_v6 = vld [vmem:[%s8063_s3 + $0x5f0] sm:$0xff] }
 0x177   : > { %1478 = vmatpush.msrb.mxu2 %v1195_v17  ;;  %1494 = vmatpush.msrb.mxu3 %v1215_v55  ;;  %v1755_v8 = vld [vmem:[%s8063_s3 + $0x210] sm:$0xff]  ;;  %v1260_v17 = vld [vmem:[%s8063_s3 + $0x548] sm:$0xff] }
 0x178   : > { %1964 = vmatpush.msrb.mxu0 %v1689_v23  ;;  %1980 = vmatpush.msrb.mxu1 %v1709_v24  ;;  %v1775_v16 = vld [vmem:[%s8063_s3 + $0x2b0] sm:$0xff]  ;;  %v1280_v55 = vld [vmem:[%s8063_s3 + $0x5e8] sm:$0xff] }
 0x179   : > { %1479 = vmatpush.msrb.mxu2 %v1194_v27  ;;  %1495 = vmatpush.msrb.mxu3 %v1214_v28  ;;  %v1754_v23 = vld [vmem:[%s8063_s3 + $0x208] sm:$0xff]  ;;  %v1259_v27 = vld [vmem:[%s8063_s3 + $0x540] sm:$0xff] }
 0x17a   : > { %1607 = vmatmul.f32.vlgmr.msra.gmra.mxu0 %v1087_v1  ;;  %1981 = vmatpush.msrb.mxu1 %v1708_v31  ;;  %v1774_v24 = vld [vmem:[%s8063_s3 + $0x2a8] sm:$0xff]  ;;  %v1279_v28 = vld [vmem:[%s8063_s3 + $0x5e0] sm:$0xff] }
 0x17b   : > { %2029 = vmatpush.msra.mxu0 %v1768_v32  ;;  %1480 = vmatpush.msrb.mxu2 %v1193_v42  ;;  %v1753_v1 = vld [vmem:[%s8063_s3 + $0x200] sm:$0xff]  ;;  %v1258_v32 = vld [vmem:[%s8063_s3 + $0x538] sm:$0xff] }
 0x17c   : > { %1496 = vmatpush.msrb.mxu3 %v1213_v47  ;;  %1982 = vmatpush.msrb.mxu1 %v1707_v13  ;;  %v1773_v31 = vld [vmem:[%s8063_s3 + $0x2a0] sm:$0xff]  ;;  %v1278_v42 = vld [vmem:[%s8063_s3 + $0x5d8] sm:$0xff]  ;;  %v1673_v47 = vld [vmem:[#allocation2 + $0x28] sm:$0xf] }
 0x17d   : > { %2030 = vmatpush.msra.mxu0 %v1767_v9  ;;  %1481 = vmatpush.msrb.mxu2 %v1192_v59  ;;  %v1772_v13 = vld [vmem:[%s8063_s3 + $0x298] sm:$0xff]  ;;  %v1257_v59 = vld [vmem:[%s8063_s3 + $0x530] sm:$0xff] }
 0x17e   : > { %1497 = vmatpush.msrb.mxu3 %v1212_v62  ;;  %1983 = vmatpush.msrb.mxu1 %v1706_v20  ;;  %v1832_v9 = vld [vmem:[%s8063_s3 + $0x478] sm:$0xff]  ;;  %v5623_v62 = vpop.f32.mrf.mxu2  ;;  %v1277_v20 = vld [vmem:[%s8063_s3 + $0x5d0] sm:$0xff] }
 0x17f   : > { %2031 = vmatpush.msra.mxu0 %v1766_v34  ;;  %1482 = vmatpush.msrb.mxu2 %v1191_v5  ;;  %v1674_v34 = vld [vmem:[#allocation2 + $0x2d] sm:$0xf] }
 0x180   : > { %1498 = vmatpush.msrb.mxu3 %v1211_v12  ;;  %1984 = vmatpush.msrb.mxu1 %v1705_v35  ;;  %v1831_v5 = vld [vmem:[%s8063_s3 + $0x470] sm:$0xff]  ;;  %v5634_v35 = vpop.f32.mrf.mxu3 }
 0x181   : > { %2032 = vmatpush.msra.mxu0 %v1765_v21  ;;  %1483 = vmatpush.msrb.mxu2 %v1190_v36  ;;  %v1771_v12 = vld [vmem:[%s8063_s3 + $0x290] sm:$0xff]  ;;  %v1256_v21 = vld [vmem:[%s8063_s3 + $0x528] sm:$0xff] }
 0x182   : > { %1499 = vmatpush.msrb.mxu3 %v1210_v22  ;;  %1627 = vmatmul.f32.vlgmr.msra.gmra.mxu1 %v1088_v39  ;;  %v1276_v36 = vld [vmem:[%s8063_s3 + $0x5c8] sm:$0xff] }
 0x183   : > { %2033 = vmatpush.msra.mxu0 %v1764_v26  ;;  %2049 = vmatpush.msra.mxu1 %v1784_v44  ;;  %v1830_v22 = vld [vmem:[%s8063_s3 + $0x468] sm:$0xff]  ;;  %v1255_v26 = vld [vmem:[%s8063_s3 + $0x520] sm:$0xff] }
 0x184   : > { %1484 = vmatpush.msrb.mxu2 %v1189_v37  ;;  %1500 = vmatpush.msrb.mxu3 %v1209_v43  ;;  %v1770_v39 = vld [vmem:[%s8063_s3 + $0x288] sm:$0xff]  ;;  %v1275_v44 = vld [vmem:[%s8063_s3 + $0x5c0] sm:$0xff] }
 0x185   : > { %2034 = vmatpush.msra.mxu0 %v1763_v48  ;;  %2050 = vmatpush.msra.mxu1 %v1783_v38  ;;  %v1829_v37 = vld [vmem:[%s8063_s3 + $0x460] sm:$0xff]  ;;  %v1254_v48 = vld [vmem:[%s8063_s3 + $0x518] sm:$0xff] }
 0x186   : > { %1485 = vmatpush.msrb.mxu2 %v1188_v30  ;;  %1501 = vmatpush.msrb.mxu3 %v1208_v52  ;;  %v1769_v43 = vld [vmem:[%s8063_s3 + $0x280] sm:$0xff]  ;;  %v1274_v38 = vld [vmem:[%s8063_s3 + $0x5b8] sm:$0xff] }
 0x187   : > { %2035 = vmatpush.msra.mxu0 %v1762_v40  ;;  %2051 = vmatpush.msra.mxu1 %v1782_v46  ;;  %v1828_v30 = vld [vmem:[%s8063_s3 + $0x458] sm:$0xff]  ;;  %v1253_v40 = vld [vmem:[%s8063_s3 + $0x510] sm:$0xff] }
 0x188   : > { %1486 = vmatpush.msrb.mxu2 %v1187_v57  ;;  %1502 = vmatpush.msrb.mxu3 %v1207_v49  ;;  %v1848_v52 = vld [vmem:[%s8063_s3 + $0x4f8] sm:$0xff]  ;;  %v1273_v46 = vld [vmem:[%s8063_s3 + $0x5b0] sm:$0xff] }
 0x189   : > { %2036 = vmatpush.msra.mxu0 %v1761_v45  ;;  %2052 = vmatpush.msra.mxu1 %v1781_v33  ;;  %v1827_v57 = vld [vmem:[%s8063_s3 + $0x450] sm:$0xff]  ;;  %v810_v45 = vpop.f32.mrf.mxu2 }
 0x18a   : > { %1487 = vmatmul.f32.vlgmr.msrb.gmra.mxu2 %v1081_v56  ;;  %1503 = vmatpush.msrb.mxu3 %v1206_v53  ;;  %v1847_v49 = vld [vmem:[%s8063_s3 + $0x4f0] sm:$0xff]  ;;  %v1272_v56 = vld [vmem:[%s8063_s3 + $0x5a8] sm:$0xff] }
 0x18b   : > { %1551 = vmatpush.msra.mxu2 %v1266_v61  ;;  %2037 = vmatpush.msra.mxu0 %v1760_v3  ;;  %v1677_v33 = vld [vmem:[#allocation2 + $0x32] sm:$0xf]  ;;  %v1678_v53 = vld [vmem:[#allocation2 + $0x37] sm:$0xf]  ;;  %v3673_v61 = vld [vmem:[%s8064_s4] ss:$0 sm:$0xff] }
 0x18c   : > { %2053 = vmatpush.msra.mxu1 %v1780_v58  ;;  %1504 = vmatpush.msrb.mxu3 %v1205_v7  ;;  %v1252_v3 = vld [vmem:[%s8063_s3 + $0x508] sm:$0xff]  ;;  %v830_v58 = vpop.f32.mrf.mxu3 }
 0x18d   : > { %1552 = vmatpush.msra.mxu2 %v1265_v60  ;;  %2038 = vmatpush.msra.mxu0 %v1759_v10  ;;  %v1826_v7 = vld [vmem:[%s8063_s3 + $0x448] sm:$0xff]  ;;  %v1251_v10 = vld [vmem:[%s8063_s3 + $0x500] sm:$0xff] }
 0x18e   : > { %2054 = vmatpush.msra.mxu1 %v1779_v0  ;;  %1505 = vmatpush.msrb.mxu3 %v1204_v41  ;;  %v1846_v60 = vld [vmem:[%s8063_s3 + $0x4e8] sm:$0xff]  ;;  %v1271_v0 = vld [vmem:[%s8063_s3 + $0x5a0] sm:$0xff] }
 0x18f   : > { %1553 = vmatpush.msra.mxu2 %v1264_v14  ;;  %2039 = vmatpush.msra.mxu0 %v1758_v4  ;;  %v1825_v41 = vld [vmem:[%s8063_s3 + $0x440] sm:$0xff]  ;;  %v771_v4 = vadd.f32 %v3673_v61, %v5623_v62  ;;  %v1341_v61 = vld [vmem:[%s8063_s3 + $0x7d0] sm:$0xff] }
 0x190   : > { %2055 = vmatpush.msra.mxu1 %v1778_v51  ;;  %1506 = vmatpush.msrb.mxu3 %v1203_v11  ;;  %v1845_v14 = vld [vmem:[%s8063_s3 + $0x4e0] sm:$0xff]  ;;  %v1270_v51 = vld [vmem:[%s8063_s3 + $0x598] sm:$0xff] }
 0x191   : > { %1554 = vmatpush.msra.mxu2 %v1263_v19  ;;  %2040 = vmatpush.msra.mxu0 %v1757_v15  ;;  %v1330_v11 = vld [vmem:[%s8063_s3 + $0x778] sm:$0xff]  ;;  %v791_v15 = vadd.f32 %v5634_v35, %v771_v4  ;;  %v1839_v35 = vld [vmem:[%s8063_s3 + $0x4b0] sm:$0xff] }
 0x192   : > { %2056 = vmatpush.msra.mxu1 %v1777_v50  ;;  %1507 = vmatmul.f32.vlgmr.msrb.gmra.mxu3 %v1082_v25  ;;  %v1824_v19 = vld [vmem:[%s8063_s3 + $0x438] sm:$0xff]  ;;  %v1085_v50 = vld [vmem:[#allocation2 + $0x29] sm:$0xf]  ;;  %v850_v25 = vpop.f32.mrf.mxu2 }
 0x193   : > { %1555 = vmatpush.msra.mxu2 %v1262_v18  ;;  %1571 = vmatpush.msra.mxu3 %v1282_v54  ;;  %v1844_v18 = vld [vmem:[%s8063_s3 + $0x4d8] sm:$0xff]  ;;  %v1269_v54 = vld [vmem:[%s8063_s3 + $0x590] sm:$0xff] }
 0x194   : > { %2041 = vmatpush.msra.mxu0 %v1756_v63  ;;  %2057 = vmatpush.msra.mxu1 %v1776_v29  ;;  %v1329_v63 = vld [vmem:[%s8063_s3 + $0x770] sm:$0xff] }
 0x195   : > { %1556 = vmatpush.msra.mxu2 %v1261_v2  ;;  %1572 = vmatpush.msra.mxu3 %v1281_v6  ;;  %v1823_v29 = vld [vmem:[%s8063_s3 + $0x430] sm:$0xff]  ;;  %v1268_v6 = vld [vmem:[%s8063_s3 + $0x588] sm:$0xff] }
 0x196   : > { %2042 = vmatpush.msra.mxu0 %v1755_v8  ;;  %2058 = vmatpush.msra.mxu1 %v1775_v16  ;;  %v1843_v2 = vld [vmem:[%s8063_s3 + $0x4d0] sm:$0xff]  ;;  %v870_v8 = vpop.f32.mrf.mxu3  ;;  %v1328_v16 = vld [vmem:[%s8063_s3 + $0x768] sm:$0xff] }
 0x197   : > { %1557 = vmatpush.msra.mxu2 %v1260_v17  ;;  %1573 = vmatpush.msra.mxu3 %v1280_v55  ;;  %v1822_v17 = vld [vmem:[%s8063_s3 + $0x428] sm:$0xff]  ;;  %v811_v55 = vadd.f32 %v810_v45, %v791_v15  ;;  %v1321_v45 = vld [vmem:[%s8063_s3 + $0x730] sm:$0xff]  ;;  %v1893_v15 = vld [vmem:[%s8063_s3 + $0x660] sm:$0xff] }
 0x198   : > { %2043 = vmatpush.msra.mxu0 %v1754_v23  ;;  %2059 = vmatpush.msra.mxu1 %v1774_v24  ;;  %v1842_v23 = vld [vmem:[%s8063_s3 + $0x4c8] sm:$0xff]  ;;  %v1267_v24 = vld [vmem:[%s8063_s3 + $0x580] sm:$0xff] }
 0x199   : > { %1558 = vmatpush.msra.mxu2 %v1259_v27  ;;  %1574 = vmatpush.msra.mxu3 %v1279_v28  ;;  %v1327_v27 = vld [vmem:[%s8063_s3 + $0x760] sm:$0xff] }
 0x19a   : > { %2044 = vmatpush.msra.mxu0 %v1753_v1  ;;  %2060 = vmatpush.msra.mxu1 %v1773_v31  ;;  %v1821_v28 = vld [vmem:[%s8063_s3 + $0x420] sm:$0xff]  ;;  %v831_v1 = vadd.f32 %v830_v58, %v811_v55  ;;  %v890_v62 = vpop.f32.mrf.mxu2  ;;  %v1320_v58 = vld [vmem:[%s8063_s3 + $0x728] sm:$0xff] }
 0x19b   : > { %1559 = vmatpush.msra.mxu2 %v1258_v32  ;;  %1575 = vmatpush.msra.mxu3 %v1278_v42  ;;  %v1841_v31 = vld [vmem:[%s8063_s3 + $0x4c0] sm:$0xff]  ;;  %v1326_v32 = vld [vmem:[%s8063_s3 + $0x758] sm:$0xff]  ;;  %v1316_v55 = vld [vmem:[%s8063_s3 + $0x708] sm:$0xff] }
 0x19c   : > { %1965 = vmatmul.f32.vlgmr.msrb.gmra.mxu0 %v1673_v47  ;;  %2061 = vmatpush.msra.mxu1 %v1772_v13  ;;  %v1346_v42 = vld [vmem:[%s8063_s3 + $0x7f8] sm:$0xff]  ;;  %v851_v47 = vadd.f32 %v850_v25, %v831_v1  ;;  %v1086_v13 = vld [vmem:[#allocation2 + $0x2e] sm:$0xf] }
 0x19d   : > { %2109 = vmatpush.msrb.mxu0 %v1832_v9  ;;  %1560 = vmatpush.msra.mxu2 %v1257_v59  ;;  %v1820_v9 = vld [vmem:[%s8063_s3 + $0x418] sm:$0xff] }
 0x19e   : > { %1576 = vmatpush.msra.mxu3 %v1277_v20  ;;  %1985 = vmatmul.f32.vlgmr.msrb.gmra.mxu1 %v1674_v34  ;;  %v1840_v59 = vld [vmem:[%s8063_s3 + $0x4b8] sm:$0xff]  ;;  %v1325_v20 = vld [vmem:[%s8063_s3 + $0x750] sm:$0xff] }
 0x19f   : > { %2110 = vmatpush.msrb.mxu0 %v1831_v5  ;;  %2062 = vmatpush.msra.mxu1 %v1771_v12  ;;  %v1345_v34 = vld [vmem:[%s8063_s3 + $0x7f0] sm:$0xff]  ;;  %v871_v5 = vadd.f32 %v870_v8, %v851_v47  ;;  %v1892_v25 = vld [vmem:[%s8063_s3 + $0x658] sm:$0xff]  ;;  %v1909_v47 = vld [vmem:[%s8063_s3 + $0x6e0] sm:$0xff] }
 0x1a0   : > { %1561 = vmatpush.msra.mxu2 %v1256_v21  ;;  %1577 = vmatpush.msra.mxu3 %v1276_v36  ;;  %v1819_v12 = vld [vmem:[%s8063_s3 + $0x410] sm:$0xff]  ;;  %v910_v21 = vpop.f32.mrf.mxu3  ;;  %v1324_v36 = vld [vmem:[%s8063_s3 + $0x748] sm:$0xff] }
 0x1a1   : > { %2111 = vmatpush.msrb.mxu0 %v1830_v22  ;;  %2063 = vmatpush.msra.mxu1 %v1770_v39  ;;  %v1344_v22 = vld [vmem:[%s8063_s3 + $0x7e8] sm:$0xff]  ;;  %v891_v39 = vadd.f32 %v890_v62, %v871_v5  ;;  %v1337_v8 = vld [vmem:[%s8063_s3 + $0x7b0] sm:$0xff]  ;;  %v1888_v62 = vld [vmem:[%s8063_s3 + $0x638] sm:$0xff] }
 0x1a2   : > { %1562 = vmatpush.msra.mxu2 %v1255_v26  ;;  %1578 = vmatpush.msra.mxu3 %v1275_v44  ;;  %v1818_v26 = vld [vmem:[%s8063_s3 + $0x408] sm:$0xff]  ;;  %v1908_v5 = vld [vmem:[%s8063_s3 + $0x6d8] sm:$0xff] }
 0x1a3   : > { %2112 = vmatpush.msrb.mxu0 %v1829_v37  ;;  %2064 = vmatpush.msra.mxu1 %v1769_v43  ;;  %v1838_v44 = vld [vmem:[%s8063_s3 + $0x4a8] sm:$0xff]  ;;  %v1323_v37 = vld [vmem:[%s8063_s3 + $0x740] sm:$0xff] }
 0x1a4   : > { %1563 = vmatpush.msra.mxu2 %v1254_v48  ;;  %1579 = vmatpush.msra.mxu3 %v1274_v38  ;;  %v1343_v43 = vld [vmem:[%s8063_s3 + $0x7e0] sm:$0xff]  ;;  %v911_v48 = vadd.f32 %v910_v21, %v891_v39  ;;  %v1735_v21 = vld [vmem:[%s8063_s3 + $0x170] sm:$0xff]  ;;  %v1332_v39 = vld [vmem:[%s8063_s3 + $0x788] sm:$0xff] }
 0x1a5   : > { %2113 = vmatpush.msrb.mxu0 %v1828_v30  ;;  %2129 = vmatpush.msrb.mxu1 %v1848_v52  ;;  %v1817_v38 = vld [vmem:[%s8063_s3 + $0x400] sm:$0xff]  ;;  %v1322_v52 = vld [vmem:[%s8063_s3 + $0x738] sm:$0xff] }
 0x1a6   : > { %1564 = vmatpush.msra.mxu2 %v1253_v40  ;;  %1580 = vmatpush.msra.mxu3 %v1273_v46  ;;  %v1837_v30 = vld [vmem:[%s8063_s3 + $0x4a0] sm:$0xff]  ;;  %v1342_v40 = vld [vmem:[%s8063_s3 + $0x7d8] sm:$0xff] }
 0x1a7   : > { %2114 = vmatpush.msrb.mxu0 %v1827_v57  ;;  %2130 = vmatpush.msrb.mxu1 %v1847_v49  ;;  %v1836_v46 = vld [vmem:[%s8063_s3 + $0x498] sm:$0xff]  ;;  %v930_v57 = vpop.f32.mrf.mxu0 }
 0x1a8   : > { %2045 = vmatmul.f32.vlgmr.msra.gmra.mxu0 %v1677_v33  ;;  %2065 = vmatmul.f32.vlgmr.msra.gmra.mxu1 %v1678_v53  ;;  %v1896_v49 = vld [vmem:[%s8063_s3 + $0x678] sm:$0xff]  ;;  %v931_v33 = vadd.f32 %v930_v57, %v911_v48  ;;  %v1906_v48 = vld [vmem:[%s8063_s3 + $0x6c8] sm:$0xff] }
 0x1a9   : > { %1565 = vmatpush.msra.mxu2 %v1252_v3  ;;  %1581 = vmatpush.msra.mxu3 %v1272_v56  ;;  %v1681_v53 = vld [vmem:[#allocation2 + $0x3c] sm:$0xf]  ;;  %v1835_v3 = vld [vmem:[%s8063_s3 + $0x490] sm:$0xff] }
 0x1aa   : > { %2115 = vmatpush.msrb.mxu0 %v1826_v7  ;;  %2131 = vmatpush.msrb.mxu1 %v1846_v60  ;;  %v1895_v56 = vld [vmem:[%s8063_s3 + $0x670] sm:$0xff]  ;;  %v1340_v7 = vld [vmem:[%s8063_s3 + $0x7c8] sm:$0xff] }
 0x1ab   : > { %1566 = vmatpush.msra.mxu2 %v1251_v10  ;;  %1582 = vmatpush.msra.mxu3 %v1271_v0  ;;  %v1834_v60 = vld [vmem:[%s8063_s3 + $0x488] sm:$0xff]  ;;  %v950_v10 = vpop.f32.mrf.mxu1  ;;  %v970_v0 = vpop.f32.mrf.mxu2 }
 0x1ac   : > { %2116 = vmatpush.msrb.mxu0 %v1825_v41  ;;  %2132 = vmatpush.msrb.mxu1 %v1845_v14  ;;  %v1894_v41 = vld [vmem:[%s8063_s3 + $0x668] sm:$0xff]  ;;  %v1319_v14 = vld [vmem:[%s8063_s3 + $0x720] sm:$0xff]  ;;  %v951_v4 = vadd.f32 %v950_v10, %v931_v33  ;;  %v1090_v33 = vld [vmem:[#allocation2 + $0x38] sm:$0xf] }
 0x1ad   : > { %1567 = vmatmul.f32.vlgmr.msra.gmra.mxu2 %v1085_v50  ;;  %1583 = vmatpush.msra.mxu3 %v1270_v51  ;;  %v1339_v51 = vld [vmem:[%s8063_s3 + $0x7c0] sm:$0xff]  ;;  %v1318_v50 = vld [vmem:[%s8063_s3 + $0x718] sm:$0xff]  ;;  %v1750_v10 = vld [vmem:[%s8063_s3 + $0x1e8] sm:$0xff] }
 0x1ae   : > { %1631 = vmatpush.msrb.mxu2 %v1330_v11  ;;  %2117 = vmatpush.msrb.mxu0 %v1824_v19  ;;  %v1833_v11 = vld [vmem:[%s8063_s3 + $0x480] sm:$0xff] }
 0x1af   : > { %2133 = vmatpush.msrb.mxu1 %v1844_v18  ;;  %1584 = vmatpush.msra.mxu3 %v1269_v54  ;;  %v990_v19 = vpop.f32.mrf.mxu3  ;;  %v971_v18 = vadd.f32 %v970_v0, %v951_v4  ;;  %v1338_v54 = vld [vmem:[%s8063_s3 + $0x7b8] sm:$0xff]  ;;  %v1882_v0 = vld [vmem:[%s8063_s3 + $0x608] sm:$0xff]  ;;  %v1749_v4 = vld [vmem:[%s8063_s3 + $0x1e0] sm:$0xff] }
 0x1b0   : > { %1632 = vmatpush.msrb.mxu2 %v1329_v63  ;;  %2118 = vmatpush.msrb.mxu0 %v1823_v29  ;;  %v1912_v63 = vld [vmem:[%s8063_s3 + $0x6f8] sm:$0xff] }
 0x1b1   : > { %2134 = vmatpush.msrb.mxu1 %v1843_v2  ;;  %1585 = vmatpush.msra.mxu3 %v1268_v6  ;;  %v991_v29 = vadd.f32 %v990_v19, %v971_v18  ;;  %v1682_v2 = vld [vmem:[#allocation2 + $0x41] sm:$0xf]  ;;  %v1317_v6 = vld [vmem:[%s8063_s3 + $0x710] sm:$0xff]  ;;  %v1728_v19 = vld [vmem:[%s8063_s3 + $0x138] sm:$0xff] }
 0x1b2   : > { %1633 = vmatpush.msrb.mxu2 %v1328_v16  ;;  %2119 = vmatpush.msrb.mxu0 %v1822_v17  ;;  %v1891_v16 = vld [vmem:[%s8063_s3 + $0x650] sm:$0xff]  ;;  %v2302_v18 = vld [vmem:[%s8063_s3 + $0x78] sm:$0xff] }
 0x1b3   : > { %2135 = vmatpush.msrb.mxu1 %v1842_v23  ;;  %1586 = vmatpush.msra.mxu3 %v1267_v24  ;;  %v1911_v17 = vld [vmem:[%s8063_s3 + $0x6f0] sm:$0xff]  ;;  %v1336_v23 = vld [vmem:[%s8063_s3 + $0x7a8] sm:$0xff]  ;;  %v1010_v24 = vpop.f32.mrf.mxu0 }
 0x1b4   : > { %1634 = vmatpush.msrb.mxu2 %v1327_v27  ;;  %2120 = vmatpush.msrb.mxu0 %v1821_v28  ;;  %v1890_v27 = vld [vmem:[%s8063_s3 + $0x648] sm:$0xff]  ;;  %v1011_v1 = vadd.f32 %v1010_v24, %v991_v29  ;;  %v1899_v29 = vld [vmem:[%s8063_s3 + $0x690] sm:$0xff]  ;;  %v1897_v24 = vld [vmem:[%s8063_s3 + $0x680] sm:$0xff] }
 0x1b5   : > { %2136 = vmatpush.msrb.mxu1 %v1841_v31  ;;  %1587 = vmatmul.f32.vlgmr.msra.gmra.mxu3 %v1086_v13  ;;  %v1910_v28 = vld [vmem:[%s8063_s3 + $0x6e8] sm:$0xff]  ;;  %v1315_v31 = vld [vmem:[%s8063_s3 + $0x700] sm:$0xff]  ;;  %v1334_v13 = vld [vmem:[%s8063_s3 + $0x798] sm:$0xff] }
 0x1b6   : > { %1635 = vmatpush.msrb.mxu2 %v1326_v32  ;;  %1651 = vmatpush.msrb.mxu3 %v1346_v42  ;;  %v1335_v32 = vld [vmem:[%s8063_s3 + $0x7a0] sm:$0xff] }
 0x1b7   : > { %2121 = vmatpush.msrb.mxu0 %v1820_v9  ;;  %2137 = vmatpush.msrb.mxu1 %v1840_v59  ;;  %v1889_v42 = vld [vmem:[%s8063_s3 + $0x640] sm:$0xff]  ;;  %v1030_v9 = vpop.f32.mrf.mxu1  ;;  %v1736_v59 = vld [vmem:[%s8063_s3 + $0x178] sm:$0xff] }
 0x1b8   : > { %1636 = vmatpush.msrb.mxu2 %v1325_v20  ;;  %1652 = vmatpush.msrb.mxu3 %v1345_v34  ;;  %v1089_v34 = vld [vmem:[#allocation2 + $0x33] sm:$0xf] }
 0x1b9   : > { %2122 = vmatpush.msrb.mxu0 %v1819_v12  ;;  %2138 = vmatpush.msrb.mxu1 %v1839_v35  ;;  %v1333_v12 = vld [vmem:[%s8063_s3 + $0x790] sm:$0xff]  ;;  %v1031_v35 = vadd.f32 %v1030_v9, %v1011_v1  ;;  %v1744_v1 = vld [vmem:[%s8063_s3 + $0x1b8] sm:$0xff] }
 0x1ba   : > { %1637 = vmatpush.msrb.mxu2 %v1324_v36  ;;  %1653 = vmatpush.msrb.mxu3 %v1344_v22  ;;  %v1887_v36 = vld [vmem:[%s8063_s3 + $0x630] sm:$0xff] }
 0x1bb   : > { %2123 = vmatpush.msrb.mxu0 %v1818_v26  ;;  %2139 = vmatpush.msrb.mxu1 %v1838_v44  ;;  %v1907_v22 = vld [vmem:[%s8063_s3 + $0x6d0] sm:$0xff]  ;;  %v1734_v44 = vld [vmem:[%s8063_s3 + $0x168] sm:$0xff] }
 0x1bc   : > { %1638 = vmatpush.msrb.mxu2 %v1323_v37  ;;  %1654 = vmatpush.msrb.mxu3 %v1343_v43  ;;  %v1886_v37 = vld [vmem:[%s8063_s3 + $0x628] sm:$0xff]  ;;  %v2297_v9 = vld [vmem:[%s8063_s3 + $0x50] sm:$0xff] }
 0x1bd   : > { %2124 = vmatpush.msrb.mxu0 %v1817_v38  ;;  %2140 = vmatpush.msrb.mxu1 %v1837_v30  ;;  %v1331_v38 = vld [vmem:[%s8063_s3 + $0x780] sm:$0xff] }
 0x1be   : > { %1639 = vmatpush.msrb.mxu2 %v1322_v52  ;;  %1655 = vmatpush.msrb.mxu3 %v1342_v40  ;;  %v1733_v52 = vld [vmem:[%s8063_s3 + $0x160] sm:$0xff] }
 0x1bf   : > { %2125 = vmatmul.f32.vlgmr.msrb.gmra.mxu0 %v1681_v53  ;;  %2141 = vmatpush.msrb.mxu1 %v1836_v46  ;;  %v1885_v40 = vld [vmem:[%s8063_s3 + $0x620] sm:$0xff]  ;;  %v1884_v53 = vld [vmem:[%s8063_s3 + $0x618] sm:$0xff] }
 0x1c0   : > { %2189 = vmatpush.msra.mxu0 %v1896_v49  ;;  %1640 = vmatpush.msrb.mxu2 %v1321_v45  ;;  %v1905_v46 = vld [vmem:[%s8063_s3 + $0x6c0] sm:$0xff]  ;;  %v1732_v49 = vld [vmem:[%s8063_s3 + $0x158] sm:$0xff] }
 0x1c1   : > { %1656 = vmatpush.msrb.mxu3 %v1341_v61  ;;  %2142 = vmatpush.msrb.mxu1 %v1835_v3  ;;  %v1752_v45 = vld [vmem:[%s8063_s3 + $0x1f8] sm:$0xff]  ;;  %v1731_v3 = vld [vmem:[%s8063_s3 + $0x150] sm:$0xff] }
 0x1c2   : > { %2190 = vmatpush.msra.mxu0 %v1895_v56  ;;  %1641 = vmatpush.msrb.mxu2 %v1320_v58  ;;  %v1904_v61 = vld [vmem:[%s8063_s3 + $0x6b8] sm:$0xff]  ;;  %v1751_v56 = vld [vmem:[%s8063_s3 + $0x1f0] sm:$0xff] }
 0x1c3   : > { %1657 = vmatpush.msrb.mxu3 %v1340_v7  ;;  %2143 = vmatpush.msrb.mxu1 %v1834_v60  ;;  %v1883_v58 = vld [vmem:[%s8063_s3 + $0x610] sm:$0xff]  ;;  %v1730_v60 = vld [vmem:[%s8063_s3 + $0x148] sm:$0xff] }
 0x1c4   : > { %2191 = vmatpush.msra.mxu0 %v1894_v41  ;;  %1642 = vmatpush.msrb.mxu2 %v1319_v14  ;;  %v1903_v7 = vld [vmem:[%s8063_s3 + $0x6b0] sm:$0xff]  ;;  %v1902_v41 = vld [vmem:[%s8063_s3 + $0x6a8] sm:$0xff]  ;;  %v1729_v14 = vld [vmem:[%s8063_s3 + $0x140] sm:$0xff] }
 0x1c5   : > { %1658 = vmatpush.msrb.mxu3 %v1339_v51  ;;  %2144 = vmatpush.msrb.mxu1 %v1833_v11  ;;  %v1881_v51 = vld [vmem:[%s8063_s3 + $0x600] sm:$0xff] }
 0x1c6   : > { %2192 = vmatpush.msra.mxu0 %v1893_v15  ;;  %1643 = vmatpush.msrb.mxu2 %v1318_v50  ;;  %v1901_v11 = vld [vmem:[%s8063_s3 + $0x6a0] sm:$0xff]  ;;  %v1748_v15 = vld [vmem:[%s8063_s3 + $0x1d8] sm:$0xff] }
 0x1c7   : > { %1659 = vmatpush.msrb.mxu3 %v1338_v54  ;;  %2145 = vmatmul.f32.vlgmr.msrb.gmra.mxu1 %v1682_v2  ;;  %v1900_v50 = vld [vmem:[%s8063_s3 + $0x698] sm:$0xff]  ;;  %v1727_v54 = vld [vmem:[%s8063_s3 + $0x130] sm:$0xff] }
 0x1c8   : > { %2193 = vmatpush.msra.mxu0 %v1892_v25  ;;  %2209 = vmatpush.msra.mxu1 %v1912_v63  ;;  %v1685_v25 = vld [vmem:[#allocation2 + $0x46] sm:$0xf]  ;;  %v1747_v63 = vld [vmem:[%s8063_s3 + $0x1d0] sm:$0xff] }
 0x1c9   : > { %1644 = vmatpush.msrb.mxu2 %v1317_v6  ;;  %1660 = vmatpush.msrb.mxu3 %v1337_v8  ;;  %v1050_v20 = vpop.f32.mrf.mxu2  ;;  %v2301_v2 = vld [vmem:[%s8063_s3 + $0x70] sm:$0xff]  ;;  %v1726_v6 = vld [vmem:[%s8063_s3 + $0x128] sm:$0xff] }
 0x1ca   : > { %2194 = vmatpush.msra.mxu0 %v1891_v16  ;;  %2210 = vmatpush.msra.mxu1 %v1911_v17  ;;  %v1051_v26 = vadd.f32 %v1050_v20, %v1031_v35  ;;  %v1746_v8 = vld [vmem:[%s8063_s3 + $0x1c8] sm:$0xff]  ;;  %v1741_v35 = vld [vmem:[%s8063_s3 + $0x1a0] sm:$0xff] }
 0x1cb   : > { %1645 = vmatpush.msrb.mxu2 %v1316_v55  ;;  %1661 = vmatpush.msrb.mxu3 %v1336_v23  ;;  %v1898_v16 = vld [vmem:[%s8063_s3 + $0x688] sm:$0xff]  ;;  %v1725_v55 = vld [vmem:[%s8063_s3 + $0x120] sm:$0xff] }
 0x1cc   : > { %2195 = vmatpush.msra.mxu0 %v1890_v27  ;;  %2211 = vmatpush.msra.mxu1 %v1910_v28  ;;  %v2300_v17 = vld [vmem:[%s8063_s3 + $0x68] sm:$0xff]  ;;  %v1745_v23 = vld [vmem:[%s8063_s3 + $0x1c0] sm:$0xff]  ;;  %v1724_v28 = vld [vmem:[%s8063_s3 + $0x118] sm:$0xff] }
 0x1cd   : > { %1646 = vmatpush.msrb.mxu2 %v1315_v31  ;;  %1662 = vmatpush.msrb.mxu3 %v1335_v32  ;;  %v2299_v27 = vld [vmem:[%s8063_s3 + $0x60] sm:$0xff]  ;;  %v2298_v31 = vld [vmem:[%s8063_s3 + $0x58] sm:$0xff]  ;;  %v1742_v20 = vld [vmem:[%s8063_s3 + $0x1a8] sm:$0xff] }
 0x1ce   : > { %2196 = vmatpush.msra.mxu0 %v1889_v42  ;;  %2212 = vmatpush.msra.mxu1 %v1909_v47  ;;  %v2318_v32 = vld [vmem:[%s8063_s3 + $0xf8] sm:$0xff]  ;;  %v1686_v42 = vld [vmem:[#allocation2 + $0x4b] sm:$0xf]  ;;  %v1723_v47 = vld [vmem:[%s8063_s3 + $0x110] sm:$0xff] }
 0x1cf   : > { %1647 = vmatmul.f32.vlgmr.msrb.gmra.mxu2 %v1089_v34  ;;  %1663 = vmatpush.msrb.mxu3 %v1334_v13  ;;  %v1743_v13 = vld [vmem:[%s8063_s3 + $0x1b0] sm:$0xff]  ;;  %v2296_v34 = vld [vmem:[%s8063_s3 + $0x48] sm:$0xff] }
 0x1d0   : > { %1989 = vmatpush.msra.mxu2 %v1736_v59  ;;  %2197 = vmatpush.msra.mxu0 %v1888_v62  ;;  %v2317_v59 = vld [vmem:[%s8063_s3 + $0xf0] sm:$0xff]  ;;  %v1722_v62 = vld [vmem:[%s8063_s3 + $0x108] sm:$0xff] }
 0x1d1   : > { %2213 = vmatpush.msra.mxu1 %v1908_v5  ;;  %1664 = vmatpush.msrb.mxu3 %v1333_v12  ;;  %v1070_v43 = vpop.f32.mrf.mxu3  ;;  %v2316_v5 = vld [vmem:[%s8063_s3 + $0xe8] sm:$0xff]  ;;  %v1721_v12 = vld [vmem:[%s8063_s3 + $0x100] sm:$0xff] }
 0x1d2   : > { %1990 = vmatpush.msra.mxu2 %v1735_v21  ;;  %2198 = vmatpush.msra.mxu0 %v1887_v36  ;;  %v1071_v30 = vadd.f32 %v1070_v43, %v1051_v26  ;;  %v2295_v21 = vld [vmem:[%s8063_s3 + $0x40] sm:$0xff]  ;;  %v2294_v26 = vld [vmem:[%s8063_s3 + $0x38] sm:$0xff]  ;;  %v1739_v43 = vld [vmem:[%s8063_s3 + $0x190] sm:$0xff] }
 0x1d3   : > { %2214 = vmatpush.msra.mxu1 %v1907_v22  ;;  %1665 = vmatpush.msrb.mxu3 %v1332_v39  ;;  %v2315_v36 = vld [vmem:[%s8063_s3 + $0xe0] sm:$0xff]  ;;  %v1740_v22 = vld [vmem:[%s8063_s3 + $0x198] sm:$0xff] }
 0x1d4   : > { %1991 = vmatpush.msra.mxu2 %v1734_v44  ;;  %2199 = vmatpush.msra.mxu0 %v1886_v37  ;;  %v1073_v57 = vmax.f32 %v1071_v30, 0.0  ;;  %v1800_v39 = vld [vmem:[%s8063_s3 + $0x378] sm:$0xff]  ;;  %v1675_v44 = vld [vmem:[#allocation2 + $0x29] sm:$0xf]  ;;  %v2313_v30 = vld [vmem:[%s8063_s3 + $0xd0] sm:$0xff] }
 0x1d5   : > { %2215 = vmatpush.msra.mxu1 %v1906_v48  ;;  %1666 = vmatpush.msrb.mxu3 %v1331_v38  ;;  %v2314_v37 = vld [vmem:[%s8063_s3 + $0xd8] sm:$0xff]  ;;  %v1799_v48 = vld [vmem:[%s8063_s3 + $0x370] sm:$0xff] }
 0x1d6   : > { %1992 = vmatpush.msra.mxu2 %v1733_v52  ;;  %2200 = vmatpush.msra.mxu0 %v1885_v40  ;;  %1074 = vst [vmem:[#allocation3] sm:$0xf] %v1073_v57  ;;  %v2293_v38 = vld [vmem:[%s8063_s3 + $0x30] sm:$0xff]  ;;  %v1738_v52 = vld [vmem:[%s8063_s3 + $0x188] sm:$0xff] }
 0x1d7   : > { %2216 = vmatpush.msra.mxu1 %v1905_v46  ;;  %1667 = vmatmul.f32.vlgmr.msrb.gmra.mxu3 %v1090_v33  ;;  %v1798_v40 = vld [vmem:[%s8063_s3 + $0x368] sm:$0xff]  ;;  %v2291_v33 = vld [vmem:[%s8063_s3 + $0x20] sm:$0xff] }
 0x1d8   : > { %1993 = vmatpush.msra.mxu2 %v1732_v49  ;;  %2009 = vmatpush.msra.mxu3 %v1752_v45  ;;  %v2292_v46 = vld [vmem:[%s8063_s3 + $0x28] sm:$0xff]  ;;  %v1737_v49 = vld [vmem:[%s8063_s3 + $0x180] sm:$0xff] }
 0x1d9   : > { %2201 = vmatpush.msra.mxu0 %v1884_v53  ;;  %2217 = vmatpush.msra.mxu1 %v1904_v61  ;;  %v2312_v57 = vld [vmem:[%s8063_s3 + $0xc8] sm:$0xff]  ;;  %v1797_v45 = vld [vmem:[%s8063_s3 + $0x360] sm:$0xff]  ;;  %v1796_v61 = vld [vmem:[%s8063_s3 + $0x358] sm:$0xff] }
 0x1da   : > { %1994 = vmatpush.msra.mxu2 %v1731_v3  ;;  %2010 = vmatpush.msra.mxu3 %v1751_v56  ;;  %v2311_v53 = vld [vmem:[%s8063_s3 + $0xc0] sm:$0xff]  ;;  %v1816_v3 = vld [vmem:[%s8063_s3 + $0x3f8] sm:$0xff]  ;;  %v1676_v56 = vld [vmem:[#allocation2 + $0x2e] sm:$0xf] }
 0x1db   : > { %2202 = vmatpush.msra.mxu0 %v1883_v58  ;;  %2218 = vmatpush.msra.mxu1 %v1903_v7  ;;  %v2290_v58 = vld [vmem:[%s8063_s3 + $0x18] sm:$0xff] }
 0x1dc   : > { %1995 = vmatpush.msra.mxu2 %v1730_v60  ;;  %2011 = vmatpush.msra.mxu3 %v1750_v10  ;;  %v2310_v7 = vld [vmem:[%s8063_s3 + $0xb8] sm:$0xff]  ;;  %v1795_v60 = vld [vmem:[%s8063_s3 + $0x350] sm:$0xff] }
 0x1dd   : > { %2203 = vmatpush.msra.mxu0 %v1882_v0  ;;  %2219 = vmatpush.msra.mxu1 %v1902_v41  ;;  %v1815_v10 = vld [vmem:[%s8063_s3 + $0x3f0] sm:$0xff] }
 0x1de   : > { %1996 = vmatpush.msra.mxu2 %v1729_v14  ;;  %2012 = vmatpush.msra.mxu3 %v1749_v4  ;;  %v2289_v0 = vld [vmem:[%s8063_s3 + $0x10] sm:$0xff]  ;;  %v1794_v14 = vld [vmem:[%s8063_s3 + $0x348] sm:$0xff] }
 0x1df   : > { %2204 = vmatpush.msra.mxu0 %v1881_v51  ;;  %2220 = vmatpush.msra.mxu1 %v1901_v11  ;;  %v2309_v41 = vld [vmem:[%s8063_s3 + $0xb0] sm:$0xff]  ;;  %v1814_v4 = vld [vmem:[%s8063_s3 + $0x3e8] sm:$0xff] }
 0x1e0   : > { %1997 = vmatpush.msra.mxu2 %v1728_v19  ;;  %2013 = vmatpush.msra.mxu3 %v1748_v15  ;;  %v2288_v51 = vld [vmem:[%s8063_s3 + $0x8] sm:$0xff]  ;;  %v1793_v19 = vld [vmem:[%s8063_s3 + $0x340] sm:$0xff] }
 0x1e1   : > { %2205 = vmatmul.f32.vlgmr.msra.gmra.mxu0 %v1685_v25  ;;  %2221 = vmatpush.msra.mxu1 %v1900_v50  ;;  %v2308_v11 = vld [vmem:[%s8063_s3 + $0xa8] sm:$0xff]  ;;  %v1813_v15 = vld [vmem:[%s8063_s3 + $0x3e0] sm:$0xff]  ;;  %v1812_v25 = vld [vmem:[%s8063_s3 + $0x3d8] sm:$0xff] }
 0x1e2   : > { %2547 = vmatpush.msrb.mxu0 %v2302_v18  ;;  %1998 = vmatpush.msra.mxu2 %v1727_v54  ;;  %v2287_v50 = vld [vmem:[%s8063_s3] sm:$0xff]  ;;  %v1792_v54 = vld [vmem:[%s8063_s3 + $0x338] sm:$0xff] }
 0x1e3   : > { %2014 = vmatpush.msra.mxu3 %v1747_v63  ;;  %2222 = vmatpush.msra.mxu1 %v1899_v29  ;;  %v2307_v18 = vld [vmem:[%s8063_s3 + $0xa0] sm:$0xff]  ;;  %v2306_v63 = vld [vmem:[%s8063_s3 + $0x98] sm:$0xff] }
 0x1e4   : > { %2548 = vmatpush.msrb.mxu0 %v2301_v2  ;;  %1999 = vmatpush.msra.mxu2 %v1726_v6  ;;  %v2366_v29 = vld [vmem:[%s8063_s3 + $0x278] sm:$0xff]  ;;  %v1791_v2 = vld [vmem:[%s8063_s3 + $0x330] sm:$0xff] }
 0x1e5   : > { %2015 = vmatpush.msra.mxu3 %v1746_v8  ;;  %2223 = vmatpush.msra.mxu1 %v1898_v16  ;;  %v2271_v6 = vld [vmem:[#allocation2 + $0x3c] sm:$0xf]  ;;  %v1811_v8 = vld [vmem:[%s8063_s3 + $0x3d0] sm:$0xff] }
 0x1e6   : > { %2549 = vmatpush.msrb.mxu0 %v2300_v17  ;;  %2000 = vmatpush.msra.mxu2 %v1725_v55  ;;  %v2305_v16 = vld [vmem:[%s8063_s3 + $0x90] sm:$0xff]  ;;  %v1790_v55 = vld [vmem:[%s8063_s3 + $0x328] sm:$0xff] }
 0x1e7   : > { %2016 = vmatpush.msra.mxu3 %v1745_v23  ;;  %2224 = vmatpush.msra.mxu1 %v1897_v24  ;;  %v2365_v17 = vld [vmem:[%s8063_s3 + $0x270] sm:$0xff]  ;;  %v1810_v23 = vld [vmem:[%s8063_s3 + $0x3c8] sm:$0xff] }
 0x1e8   : > { %2550 = vmatpush.msrb.mxu0 %v2299_v27  ;;  %2001 = vmatpush.msra.mxu2 %v1724_v28  ;;  %v2304_v24 = vld [vmem:[%s8063_s3 + $0x88] sm:$0xff]  ;;  %v1789_v28 = vld [vmem:[%s8063_s3 + $0x320] sm:$0xff] }
 0x1e9   : > { %2017 = vmatpush.msra.mxu3 %v1744_v1  ;;  %2225 = vmatmul.f32.vlgmr.msra.gmra.mxu1 %v1686_v42  ;;  %v2364_v27 = vld [vmem:[%s8063_s3 + $0x268] sm:$0xff]  ;;  %v1809_v1 = vld [vmem:[%s8063_s3 + $0x3c0] sm:$0xff]  ;;  %v1788_v42 = vld [vmem:[%s8063_s3 + $0x318] sm:$0xff] }
 0x1ea   : > { %2551 = vmatpush.msrb.mxu0 %v2298_v31  ;;  %2567 = vmatpush.msrb.mxu1 %v2318_v32  ;;  %v2303_v31 = vld [vmem:[%s8063_s3 + $0x80] sm:$0xff] }
 0x1eb   : > { %2002 = vmatpush.msra.mxu2 %v1723_v47  ;;  %2018 = vmatpush.msra.mxu3 %v1743_v13  ;;  %v2363_v32 = vld [vmem:[%s8063_s3 + $0x260] sm:$0xff]  ;;  %v1808_v47 = vld [vmem:[%s8063_s3 + $0x3b8] sm:$0xff] }
 0x1ec   : > { %2552 = vmatpush.msrb.mxu0 %v2297_v9  ;;  %2568 = vmatpush.msrb.mxu1 %v2317_v59  ;;  %v2362_v13 = vld [vmem:[%s8063_s3 + $0x258] sm:$0xff]  ;;  %v2272_v59 = vld [vmem:[#allocation2 + $0x41] sm:$0xf] }
 0x1ed   : > { %2003 = vmatpush.msra.mxu2 %v1722_v62  ;;  %2019 = vmatpush.msra.mxu3 %v1742_v20  ;;  %v2382_v9 = vld [vmem:[%s8063_s3 + $0x2f8] sm:$0xff]  ;;  %v1787_v62 = vld [vmem:[%s8063_s3 + $0x310] sm:$0xff] }
 0x1ee   : > { %2553 = vmatpush.msrb.mxu0 %v2296_v34  ;;  %2569 = vmatpush.msrb.mxu1 %v2316_v5  ;;  %v1807_v20 = vld [vmem:[%s8063_s3 + $0x3b0] sm:$0xff] }
 0x1ef   : > { %2004 = vmatpush.msra.mxu2 %v1721_v12  ;;  %2020 = vmatpush.msra.mxu3 %v1741_v35  ;;  %v2361_v34 = vld [vmem:[%s8063_s3 + $0x250] sm:$0xff]  ;;  %v1786_v12 = vld [vmem:[%s8063_s3 + $0x308] sm:$0xff] }
 0x1f0   : > { %2554 = vmatpush.msrb.mxu0 %v2295_v21  ;;  %2570 = vmatpush.msrb.mxu1 %v2315_v36  ;;  %v2381_v5 = vld [vmem:[%s8063_s3 + $0x2f0] sm:$0xff]  ;;  %v1806_v35 = vld [vmem:[%s8063_s3 + $0x3a8] sm:$0xff] }
 0x1f1   : > { %2005 = vmatmul.f32.vlgmr.msra.gmra.mxu2 %v1675_v44  ;;  %2021 = vmatpush.msra.mxu3 %v1740_v22  ;;  %v2360_v21 = vld [vmem:[%s8063_s3 + $0x248] sm:$0xff]  ;;  %v1785_v22 = vld [vmem:[%s8063_s3 + $0x300] sm:$0xff] }
 0x1f2   : > { %2069 = vmatpush.msrb.mxu2 %v1800_v39  ;;  %2555 = vmatpush.msrb.mxu0 %v2294_v26  ;;  %v2380_v36 = vld [vmem:[%s8063_s3 + $0x2e8] sm:$0xff]  ;;  %v1805_v39 = vld [vmem:[%s8063_s3 + $0x3a0] sm:$0xff] }
 0x1f3   : > { %2571 = vmatpush.msrb.mxu1 %v2314_v37  ;;  %2022 = vmatpush.msra.mxu3 %v1739_v43  ;;  %v2359_v26 = vld [vmem:[%s8063_s3 + $0x240] sm:$0xff]  ;;  %v1804_v37 = vld [vmem:[%s8063_s3 + $0x398] sm:$0xff] }
 0x1f4   : > { %2070 = vmatpush.msrb.mxu2 %v1799_v48  ;;  %2556 = vmatpush.msrb.mxu0 %v2293_v38  ;;  %v2379_v44 = vld [vmem:[%s8063_s3 + $0x2e0] sm:$0xff]  ;;  %v1864_v43 = vld [vmem:[%s8063_s3 + $0x578] sm:$0xff]  ;;  %v1679_v38 = vld [vmem:[#allocation2 + $0x33] sm:$0xf] }
 0x1f5   : > { %2572 = vmatpush.msrb.mxu1 %v2313_v30  ;;  %2023 = vmatpush.msra.mxu3 %v1738_v52  ;;  %v2358_v48 = vld [vmem:[%s8063_s3 + $0x238] sm:$0xff]  ;;  %v1803_v52 = vld [vmem:[%s8063_s3 + $0x390] sm:$0xff] }
 0x1f6   : > { %2071 = vmatpush.msrb.mxu2 %v1798_v40  ;;  %2557 = vmatpush.msrb.mxu0 %v2292_v46  ;;  %v2378_v30 = vld [vmem:[%s8063_s3 + $0x2d8] sm:$0xff]  ;;  %v1863_v40 = vld [vmem:[%s8063_s3 + $0x570] sm:$0xff] }
 0x1f7   : > { %2573 = vmatpush.msrb.mxu1 %v2312_v57  ;;  %2024 = vmatpush.msra.mxu3 %v1737_v49  ;;  %v2357_v46 = vld [vmem:[%s8063_s3 + $0x230] sm:$0xff]  ;;  %v1802_v49 = vld [vmem:[%s8063_s3 + $0x388] sm:$0xff] }
 0x1f8   : > { %2072 = vmatpush.msrb.mxu2 %v1797_v45  ;;  %2558 = vmatpush.msrb.mxu0 %v2291_v33  ;;  %v2377_v57 = vld [vmem:[%s8063_s3 + $0x2d0] sm:$0xff]  ;;  %v1862_v45 = vld [vmem:[%s8063_s3 + $0x568] sm:$0xff] }
 0x1f9   : > { %2574 = vmatpush.msrb.mxu1 %v2311_v53  ;;  %2025 = vmatmul.f32.vlgmr.msra.gmra.mxu3 %v1676_v56  ;;  %v2356_v33 = vld [vmem:[%s8063_s3 + $0x228] sm:$0xff]  ;;  %v2355_v56 = vld [vmem:[%s8063_s3 + $0x220] sm:$0xff] }
 0x1fa   : > { %2073 = vmatpush.msrb.mxu2 %v1796_v61  ;;  %2089 = vmatpush.msrb.mxu3 %v1816_v3  ;;  %v2376_v53 = vld [vmem:[%s8063_s3 + $0x2c8] sm:$0xff]  ;;  %v1801_v61 = vld [vmem:[%s8063_s3 + $0x380] sm:$0xff] }
 0x1fb   : > { %2559 = vmatpush.msrb.mxu0 %v2290_v58  ;;  %2575 = vmatpush.msrb.mxu1 %v2310_v7  ;;  %v1861_v3 = vld [vmem:[%s8063_s3 + $0x560] sm:$0xff]  ;;  %v1860_v7 = vld [vmem:[%s8063_s3 + $0x558] sm:$0xff] }
 0x1fc   : > { %2074 = vmatpush.msrb.mxu2 %v1795_v60  ;;  %2090 = vmatpush.msrb.mxu3 %v1815_v10  ;;  %v2375_v58 = vld [vmem:[%s8063_s3 + $0x2c0] sm:$0xff]  ;;  %v1880_v60 = vld [vmem:[%s8063_s3 + $0x5f8] sm:$0xff] }
 0x1fd   : > { %2560 = vmatpush.msrb.mxu0 %v2289_v0  ;;  %2576 = vmatpush.msrb.mxu1 %v2309_v41  ;;  %v1680_v10 = vld [vmem:[#allocation2 + $0x38] sm:$0xf] }
 0x1fe   : > { %2075 = vmatpush.msrb.mxu2 %v1794_v14  ;;  %2091 = vmatpush.msrb.mxu3 %v1814_v4  ;;  %v2354_v0 = vld [vmem:[%s8063_s3 + $0x218] sm:$0xff]  ;;  %v1859_v14 = vld [vmem:[%s8063_s3 + $0x550] sm:$0xff] }
 0x1ff   : > { %2561 = vmatpush.msrb.mxu0 %v2288_v51  ;;  %2577 = vmatpush.msrb.mxu1 %v2308_v11  ;;  %v2374_v41 = vld [vmem:[%s8063_s3 + $0x2b8] sm:$0xff]  ;;  %v1879_v4 = vld [vmem:[%s8063_s3 + $0x5f0] sm:$0xff] }
 0x200   : > { %2076 = vmatpush.msrb.mxu2 %v1793_v19  ;;  %2092 = vmatpush.msrb.mxu3 %v1813_v15  ;;  %v2353_v51 = vld [vmem:[%s8063_s3 + $0x210] sm:$0xff]  ;;  %v1858_v19 = vld [vmem:[%s8063_s3 + $0x548] sm:$0xff] }
 0x201   : > { %2562 = vmatpush.msrb.mxu0 %v2287_v50  ;;  %2578 = vmatpush.msrb.mxu1 %v2307_v18  ;;  %v2373_v11 = vld [vmem:[%s8063_s3 + $0x2b0] sm:$0xff]  ;;  %v1878_v15 = vld [vmem:[%s8063_s3 + $0x5e8] sm:$0xff] }
 0x202   : > { %2077 = vmatpush.msrb.mxu2 %v1792_v54  ;;  %2093 = vmatpush.msrb.mxu3 %v1812_v25  ;;  %v2352_v50 = vld [vmem:[%s8063_s3 + $0x208] sm:$0xff]  ;;  %v1857_v54 = vld [vmem:[%s8063_s3 + $0x540] sm:$0xff] }
 0x203   : > { %2563 = vmatmul.f32.vlgmr.msrb.gmra.mxu0 %v2271_v6  ;;  %2579 = vmatpush.msrb.mxu1 %v2306_v63  ;;  %v2372_v18 = vld [vmem:[%s8063_s3 + $0x2a8] sm:$0xff]  ;;  %v1877_v25 = vld [vmem:[%s8063_s3 + $0x5e0] sm:$0xff]  ;;  %v1876_v6 = vld [vmem:[%s8063_s3 + $0x5d8] sm:$0xff] }
 0x204   : > { %2627 = vmatpush.msra.mxu0 %v2366_v29  ;;  %2078 = vmatpush.msrb.mxu2 %v1791_v2  ;;  %v2351_v63 = vld [vmem:[%s8063_s3 + $0x200] sm:$0xff]  ;;  %v1856_v2 = vld [vmem:[%s8063_s3 + $0x538] sm:$0xff] }
 0x205   : > { %2094 = vmatpush.msrb.mxu3 %v1811_v8  ;;  %2580 = vmatpush.msrb.mxu1 %v2305_v16  ;;  %v2371_v29 = vld [vmem:[%s8063_s3 + $0x2a0] sm:$0xff]  ;;  %v2370_v8 = vld [vmem:[%s8063_s3 + $0x298] sm:$0xff] }
 0x206   : > { %2628 = vmatpush.msra.mxu0 %v2365_v17  ;;  %2079 = vmatpush.msrb.mxu2 %v1790_v55  ;;  %v2430_v16 = vld [vmem:[%s8063_s3 + $0x478] sm:$0xff]  ;;  %v1855_v17 = vld [vmem:[%s8063_s3 + $0x530] sm:$0xff]  ;;  %v2275_v55 = vld [vmem:[#allocation2 + $0x46] sm:$0xf] }
 0x207   : > { %2095 = vmatpush.msrb.mxu3 %v1810_v23  ;;  %2581 = vmatpush.msrb.mxu1 %v2304_v24  ;;  %v1875_v23 = vld [vmem:[%s8063_s3 + $0x5d0] sm:$0xff] }
 0x208   : > { %2629 = vmatpush.msra.mxu0 %v2364_v27  ;;  %2080 = vmatpush.msrb.mxu2 %v1789_v28  ;;  %v2369_v24 = vld [vmem:[%s8063_s3 + $0x290] sm:$0xff]  ;;  %v1854_v28 = vld [vmem:[%s8063_s3 + $0x528] sm:$0xff] }
 0x209   : > { %2096 = vmatpush.msrb.mxu3 %v1809_v1  ;;  %2582 = vmatpush.msrb.mxu1 %v2303_v31  ;;  %v2429_v27 = vld [vmem:[%s8063_s3 + $0x470] sm:$0xff]  ;;  %v1874_v1 = vld [vmem:[%s8063_s3 + $0x5c8] sm:$0xff] }
 0x20a   : > { %2630 = vmatpush.msra.mxu0 %v2363_v32  ;;  %2081 = vmatpush.msrb.mxu2 %v1788_v42  ;;  %v2368_v31 = vld [vmem:[%s8063_s3 + $0x288] sm:$0xff]  ;;  %v1853_v42 = vld [vmem:[%s8063_s3 + $0x520] sm:$0xff] }
 0x20b   : > { %2097 = vmatpush.msrb.mxu3 %v1808_v47  ;;  %2583 = vmatmul.f32.vlgmr.msrb.gmra.mxu1 %v2272_v59  ;;  %v2428_v32 = vld [vmem:[%s8063_s3 + $0x468] sm:$0xff]  ;;  %v1873_v47 = vld [vmem:[%s8063_s3 + $0x5c0] sm:$0xff]  ;;  %v1852_v59 = vld [vmem:[%s8063_s3 + $0x518] sm:$0xff] }
 0x20c   : > { %2631 = vmatpush.msra.mxu0 %v2362_v13  ;;  %2647 = vmatpush.msra.mxu1 %v2382_v9  ;;  %v2367_v13 = vld [vmem:[%s8063_s3 + $0x280] sm:$0xff] }
 0x20d   : > { %2082 = vmatpush.msrb.mxu2 %v1787_v62  ;;  %2098 = vmatpush.msrb.mxu3 %v1807_v20  ;;  %v2427_v9 = vld [vmem:[%s8063_s3 + $0x460] sm:$0xff]  ;;  %v1872_v62 = vld [vmem:[%s8063_s3 + $0x5b8] sm:$0xff] }
 0x20e   : > { %2632 = vmatpush.msra.mxu0 %v2361_v34  ;;  %2648 = vmatpush.msra.mxu1 %v2381_v5  ;;  %v3674_v20 = vld [vmem:[%s8064_s4] ss:$0 sm:$0xff]  ;;  %v2426_v34 = vld [vmem:[%s8063_s3 + $0x458] sm:$0xff] }
 0x20f   : > { %2083 = vmatpush.msrb.mxu2 %v1786_v12  ;;  %2099 = vmatpush.msrb.mxu3 %v1806_v35  ;;  %v2446_v5 = vld [vmem:[%s8063_s3 + $0x4f8] sm:$0xff]  ;;  %v1368_v12 = vpop.f32.mrf.mxu0  ;;  %v2276_v35 = vld [vmem:[#allocation2 + $0x4b] sm:$0xf] }
 0x210   : > { %2633 = vmatpush.msra.mxu0 %v2360_v21  ;;  %2649 = vmatpush.msra.mxu1 %v2380_v36  ;;  %v1851_v21 = vld [vmem:[%s8063_s3 + $0x510] sm:$0xff] }
 0x211   : > { %2084 = vmatpush.msrb.mxu2 %v1785_v22  ;;  %2100 = vmatpush.msrb.mxu3 %v1805_v39  ;;  %v1871_v36 = vld [vmem:[%s8063_s3 + $0x5b0] sm:$0xff] }
 0x212   : > { %2634 = vmatpush.msra.mxu0 %v2359_v26  ;;  %2650 = vmatpush.msra.mxu1 %v2379_v44  ;;  %v2425_v22 = vld [vmem:[%s8063_s3 + $0x450] sm:$0xff]  ;;  %v1850_v26 = vld [vmem:[%s8063_s3 + $0x508] sm:$0xff] }
 0x213   : > { %2085 = vmatmul.f32.vlgmr.msrb.gmra.mxu2 %v1679_v38  ;;  %2101 = vmatpush.msrb.mxu3 %v1804_v37  ;;  %v2445_v39 = vld [vmem:[%s8063_s3 + $0x4f0] sm:$0xff]  ;;  %v1870_v44 = vld [vmem:[%s8063_s3 + $0x5a8] sm:$0xff]  ;;  %v1369_v37 = vadd.f32 %v3674_v20, %v1368_v12  ;;  %v1388_v38 = vpop.f32.mrf.mxu1  ;;  %v2435_v20 = vld [vmem:[%s8063_s3 + $0x4a0] sm:$0xff] }
 0x214   : > { %2149 = vmatpush.msra.mxu2 %v1864_v43  ;;  %2635 = vmatpush.msra.mxu0 %v2358_v48  ;;  %v2424_v43 = vld [vmem:[%s8063_s3 + $0x448] sm:$0xff]  ;;  %v1940_v12 = vld [vmem:[%s8063_s3 + $0x7d8] sm:$0xff] }
 0x215   : > { %2651 = vmatpush.msra.mxu1 %v2378_v30  ;;  %2102 = vmatpush.msrb.mxu3 %v1803_v52  ;;  %v2444_v48 = vld [vmem:[%s8063_s3 + $0x4e8] sm:$0xff]  ;;  %v1849_v30 = vld [vmem:[%s8063_s3 + $0x500] sm:$0xff] }
 0x216   : > { %2150 = vmatpush.msra.mxu2 %v1863_v40  ;;  %2636 = vmatpush.msra.mxu0 %v2357_v46  ;;  %v1869_v52 = vld [vmem:[%s8063_s3 + $0x5a0] sm:$0xff] }
 0x217   : > { %2652 = vmatpush.msra.mxu1 %v2377_v57  ;;  %2103 = vmatpush.msrb.mxu3 %v1802_v49  ;;  %v2423_v40 = vld [vmem:[%s8063_s3 + $0x440] sm:$0xff]  ;;  %v1408_v57 = vpop.f32.mrf.mxu2  ;;  %v1868_v49 = vld [vmem:[%s8063_s3 + $0x598] sm:$0xff] }
 0x218   : > { %2151 = vmatpush.msra.mxu2 %v1862_v45  ;;  %2637 = vmatpush.msra.mxu0 %v2356_v33  ;;  %v2443_v46 = vld [vmem:[%s8063_s3 + $0x4e0] sm:$0xff]  ;;  %v1389_v45 = vadd.f32 %v1388_v38, %v1369_v37  ;;  %v1928_v33 = vld [vmem:[%s8063_s3 + $0x778] sm:$0xff]  ;;  %v1938_v38 = vld [vmem:[%s8063_s3 + $0x7c8] sm:$0xff] }
 0x219   : > { %2653 = vmatpush.msra.mxu1 %v2376_v53  ;;  %2104 = vmatpush.msrb.mxu3 %v1801_v61  ;;  %v2422_v53 = vld [vmem:[%s8063_s3 + $0x438] sm:$0xff]  ;;  %v1428_v61 = vpop.f32.mrf.mxu3 }
 0x21a   : > { %2152 = vmatpush.msra.mxu2 %v1861_v3  ;;  %2638 = vmatpush.msra.mxu0 %v2355_v56  ;;  %v1683_v3 = vld [vmem:[#allocation2 + $0x3d] sm:$0xf] }
 0x21b   : > { %2654 = vmatpush.msra.mxu1 %v2375_v58  ;;  %2105 = vmatmul.f32.vlgmr.msrb.gmra.mxu3 %v1680_v10  ;;  %v2442_v56 = vld [vmem:[%s8063_s3 + $0x4d8] sm:$0xff]  ;;  %v1867_v58 = vld [vmem:[%s8063_s3 + $0x590] sm:$0xff] }
 0x21c   : > { %2153 = vmatpush.msra.mxu2 %v1860_v7  ;;  %2169 = vmatpush.msra.mxu3 %v1880_v60  ;;  %v1409_v7 = vadd.f32 %v1408_v57, %v1389_v45  ;;  %v1927_v60 = vld [vmem:[%s8063_s3 + $0x770] sm:$0xff]  ;;  %v2431_v45 = vld [vmem:[%s8063_s3 + $0x480] sm:$0xff] }
 0x21d   : > { %2639 = vmatpush.msra.mxu0 %v2354_v0  ;;  %2655 = vmatpush.msra.mxu1 %v2374_v41  ;;  %v2421_v10 = vld [vmem:[%s8063_s3 + $0x430] sm:$0xff]  ;;  %v1866_v41 = vld [vmem:[%s8063_s3 + $0x588] sm:$0xff] }
 0x21e   : > { %2154 = vmatpush.msra.mxu2 %v1859_v14  ;;  %2170 = vmatpush.msra.mxu3 %v1879_v4  ;;  %v2441_v0 = vld [vmem:[%s8063_s3 + $0x4d0] sm:$0xff]  ;;  %v1429_v14 = vadd.f32 %v1428_v61, %v1409_v7  ;;  %v1926_v4 = vld [vmem:[%s8063_s3 + $0x768] sm:$0xff]  ;;  %v1916_v61 = vld [vmem:[%s8063_s3 + $0x718] sm:$0xff] }
 0x21f   : > { %2640 = vmatpush.msra.mxu0 %v2353_v51  ;;  %2656 = vmatpush.msra.mxu1 %v2373_v11  ;;  %v2420_v51 = vld [vmem:[%s8063_s3 + $0x428] sm:$0xff]  ;;  %v2490_v7 = vld [vmem:[%s8063_s3 + $0x658] sm:$0xff] }
 0x220   : > { %2155 = vmatpush.msra.mxu2 %v1858_v19  ;;  %2171 = vmatpush.msra.mxu3 %v1878_v15  ;;  %v2440_v11 = vld [vmem:[%s8063_s3 + $0x4c8] sm:$0xff]  ;;  %v1865_v19 = vld [vmem:[%s8063_s3 + $0x580] sm:$0xff] }
 0x221   : > { %2641 = vmatpush.msra.mxu0 %v2352_v50  ;;  %2657 = vmatpush.msra.mxu1 %v2372_v18  ;;  %v1925_v15 = vld [vmem:[%s8063_s3 + $0x760] sm:$0xff]  ;;  %v1448_v18 = vpop.f32.mrf.mxu0 }
 0x222   : > { %2156 = vmatpush.msra.mxu2 %v1857_v54  ;;  %2172 = vmatpush.msra.mxu3 %v1877_v25  ;;  %v2419_v50 = vld [vmem:[%s8063_s3 + $0x420] sm:$0xff]  ;;  %v1449_v25 = vadd.f32 %v1448_v18, %v1429_v14 }
 0x223   : > { %2642 = vmatpush.msra.mxu0 %v2351_v63  ;;  %2658 = vmatpush.msra.mxu1 %v2371_v29  ;;  %v2439_v54 = vld [vmem:[%s8063_s3 + $0x4c0] sm:$0xff]  ;;  %v1924_v63 = vld [vmem:[%s8063_s3 + $0x758] sm:$0xff] }
 0x224   : > { %2157 = vmatpush.msra.mxu2 %v1856_v2  ;;  %2173 = vmatpush.msra.mxu3 %v1876_v6  ;;  %v1944_v29 = vld [vmem:[%s8063_s3 + $0x7f8] sm:$0xff]  ;;  %v1684_v2 = vld [vmem:[#allocation2 + $0x42] sm:$0xf] }
 0x225   : > { %2643 = vmatmul.f32.vlgmr.msra.gmra.mxu0 %v2275_v55  ;;  %2659 = vmatpush.msra.mxu1 %v2370_v8  ;;  %v2418_v6 = vld [vmem:[%s8063_s3 + $0x418] sm:$0xff]  ;;  %v1468_v55 = vpop.f32.mrf.mxu1 }
 0x226   : > { %2707 = vmatpush.msrb.mxu0 %v2430_v16  ;;  %2158 = vmatpush.msra.mxu2 %v1855_v17  ;;  %v2438_v8 = vld [vmem:[%s8063_s3 + $0x4b8] sm:$0xff]  ;;  %v1923_v16 = vld [vmem:[%s8063_s3 + $0x750] sm:$0xff] }
 0x227   : > { %2174 = vmatpush.msra.mxu3 %v1875_v23  ;;  %2660 = vmatpush.msra.mxu1 %v2369_v24  ;;  %v1943_v17 = vld [vmem:[%s8063_s3 + $0x7f0] sm:$0xff]  ;;  %v1488_v23 = vpop.f32.mrf.mxu2 }
 0x228   : > { %2708 = vmatpush.msrb.mxu0 %v2429_v27  ;;  %2159 = vmatpush.msra.mxu2 %v1854_v28  ;;  %v2417_v24 = vld [vmem:[%s8063_s3 + $0x410] sm:$0xff]  ;;  %v1469_v28 = vadd.f32 %v1468_v55, %v1449_v25  ;;  %v1933_v25 = vld [vmem:[%s8063_s3 + $0x7a0] sm:$0xff] }
 0x229   : > { %2175 = vmatpush.msra.mxu3 %v1874_v1  ;;  %2661 = vmatpush.msra.mxu1 %v2368_v31  ;;  %v2437_v27 = vld [vmem:[%s8063_s3 + $0x4b0] sm:$0xff]  ;;  %v1922_v1 = vld [vmem:[%s8063_s3 + $0x748] sm:$0xff] }
 0x22a   : > { %2709 = vmatpush.msrb.mxu0 %v2428_v32  ;;  %2160 = vmatpush.msra.mxu2 %v1853_v42  ;;  %v1942_v31 = vld [vmem:[%s8063_s3 + $0x7e8] sm:$0xff]  ;;  %v1508_v32 = vpop.f32.mrf.mxu3 }
 0x22b   : > { %2176 = vmatpush.msra.mxu3 %v1873_v47  ;;  %2662 = vmatpush.msra.mxu1 %v2367_v13  ;;  %v2416_v42 = vld [vmem:[%s8063_s3 + $0x408] sm:$0xff]  ;;  %v1489_v13 = vadd.f32 %v1488_v23, %v1469_v28  ;;  %v2506_v23 = vld [vmem:[%s8063_s3 + $0x6d8] sm:$0xff]  ;;  %v2333_v28 = vld [vmem:[%s8063_s3 + $0x170] sm:$0xff] }
 0x22c   : > { %2710 = vmatpush.msrb.mxu0 %v2427_v9  ;;  %2161 = vmatpush.msra.mxu2 %v1852_v59  ;;  %v2436_v47 = vld [vmem:[%s8063_s3 + $0x4a8] sm:$0xff]  ;;  %v1921_v9 = vld [vmem:[%s8063_s3 + $0x740] sm:$0xff] }
 0x22d   : > { %2177 = vmatpush.msra.mxu3 %v1872_v62  ;;  %2663 = vmatmul.f32.vlgmr.msra.gmra.mxu1 %v2276_v35  ;;  %v1941_v59 = vld [vmem:[%s8063_s3 + $0x7e0] sm:$0xff]  ;;  %v2434_v35 = vld [vmem:[%s8063_s3 + $0x498] sm:$0xff] }
 0x22e   : > { %2711 = vmatpush.msrb.mxu0 %v2426_v34  ;;  %2727 = vmatpush.msrb.mxu1 %v2446_v5  ;;  %v2415_v62 = vld [vmem:[%s8063_s3 + $0x400] sm:$0xff]  ;;  %v1509_v34 = vadd.f32 %v1508_v32, %v1489_v13  ;;  %v1920_v5 = vld [vmem:[%s8063_s3 + $0x738] sm:$0xff]  ;;  %v2505_v32 = vld [vmem:[%s8063_s3 + $0x6d0] sm:$0xff] }
 0x22f   : > { %2162 = vmatpush.msra.mxu2 %v1851_v21  ;;  %2178 = vmatpush.msra.mxu3 %v1871_v36  ;;  %v2494_v21 = vld [vmem:[%s8063_s3 + $0x678] sm:$0xff]  ;;  %v1919_v36 = vld [vmem:[%s8063_s3 + $0x730] sm:$0xff]  ;;  %v1687_v55 = vld [vmem:[#allocation2 + $0x47] sm:$0xf] }
 0x230   : > { %2712 = vmatpush.msrb.mxu0 %v2425_v22  ;;  %2728 = vmatpush.msrb.mxu1 %v2445_v39  ;;  %v1528_v22 = vpop.f32.mrf.mxu0  ;;  %v2279_v39 = vld [vmem:[#allocation2 + $0x50] sm:$0xf]  ;;  %v1568_v57 = vpop.f32.mrf.mxu2  ;;  %v2484_v13 = vld [vmem:[%s8063_s3 + $0x628] sm:$0xff] }
 0x231   : > { %2163 = vmatpush.msra.mxu2 %v1850_v26  ;;  %2179 = vmatpush.msra.mxu3 %v1870_v44  ;;  %v1939_v26 = vld [vmem:[%s8063_s3 + $0x7d0] sm:$0xff]  ;;  %v1529_v37 = vadd.f32 %v1528_v22, %v1509_v34  ;;  %v2331_v34 = vld [vmem:[%s8063_s3 + $0x160] sm:$0xff] }
 0x232   : > { %2713 = vmatpush.msrb.mxu0 %v2424_v43  ;;  %2729 = vmatpush.msrb.mxu1 %v2444_v48  ;;  %v2433_v44 = vld [vmem:[%s8063_s3 + $0x490] sm:$0xff]  ;;  %v1918_v48 = vld [vmem:[%s8063_s3 + $0x728] sm:$0xff] }
 0x233   : > { %2164 = vmatpush.msra.mxu2 %v1849_v30  ;;  %2180 = vmatpush.msra.mxu3 %v1869_v52  ;;  %v2493_v43 = vld [vmem:[%s8063_s3 + $0x670] sm:$0xff]  ;;  %v2432_v30 = vld [vmem:[%s8063_s3 + $0x488] sm:$0xff] }
 0x234   : > { %2714 = vmatpush.msrb.mxu0 %v2423_v40  ;;  %2730 = vmatpush.msrb.mxu1 %v2443_v46  ;;  %v2492_v52 = vld [vmem:[%s8063_s3 + $0x668] sm:$0xff]  ;;  %v1917_v40 = vld [vmem:[%s8063_s3 + $0x720] sm:$0xff]  ;;  %v1548_v46 = vpop.f32.mrf.mxu1 }
 0x235   : > { %2165 = vmatmul.f32.vlgmr.msra.gmra.mxu2 %v1683_v3  ;;  %2181 = vmatpush.msra.mxu3 %v1868_v49  ;;  %v1937_v49 = vld [vmem:[%s8063_s3 + $0x7c0] sm:$0xff] }
 0x236   : > { %2229 = vmatpush.msrb.mxu2 %v1928_v33  ;;  %2715 = vmatpush.msrb.mxu0 %v2422_v53  ;;  %v1549_v33 = vadd.f32 %v1548_v46, %v1529_v37  ;;  %v2491_v53 = vld [vmem:[%s8063_s3 + $0x660] sm:$0xff]  ;;  %v2329_v37 = vld [vmem:[%s8063_s3 + $0x150] sm:$0xff]  ;;  %v2500_v46 = vld [vmem:[%s8063_s3 + $0x6a8] sm:$0xff] }
 0x237   : > { %2731 = vmatpush.msrb.mxu1 %v2442_v56  ;;  %2182 = vmatpush.msra.mxu3 %v1867_v58  ;;  %v1936_v56 = vld [vmem:[%s8063_s3 + $0x7b8] sm:$0xff] }
 0x238   : > { %2230 = vmatpush.msrb.mxu2 %v1927_v60  ;;  %2716 = vmatpush.msrb.mxu0 %v2421_v10  ;;  %v1588_v3 = vpop.f32.mrf.mxu3  ;;  %v1569_v58 = vadd.f32 %v1568_v57, %v1549_v33  ;;  %v2510_v60 = vld [vmem:[%s8063_s3 + $0x6f8] sm:$0xff]  ;;  %v1608_v18 = vpop.f32.mrf.mxu0  ;;  %v2327_v57 = vld [vmem:[%s8063_s3 + $0x140] sm:$0xff] }
 0x239   : > { %2732 = vmatpush.msrb.mxu1 %v2441_v0  ;;  %2183 = vmatpush.msra.mxu3 %v1866_v41  ;;  %v2280_v10 = vld [vmem:[#allocation2 + $0x55] sm:$0xf]  ;;  %v2499_v33 = vld [vmem:[%s8063_s3 + $0x6a0] sm:$0xff] }
 0x23a   : > { %2231 = vmatpush.msrb.mxu2 %v1926_v4  ;;  %2717 = vmatpush.msrb.mxu0 %v2420_v51  ;;  %v1915_v0 = vld [vmem:[%s8063_s3 + $0x710] sm:$0xff]  ;;  %v1589_v14 = vadd.f32 %v1588_v3, %v1569_v58  ;;  %v2498_v3 = vld [vmem:[%s8063_s3 + $0x698] sm:$0xff] }
 0x23b   : > { %2733 = vmatpush.msrb.mxu1 %v2440_v11  ;;  %2184 = vmatpush.msra.mxu3 %v1865_v19  ;;  %v1935_v41 = vld [vmem:[%s8063_s3 + $0x7b0] sm:$0xff]  ;;  %v1914_v11 = vld [vmem:[%s8063_s3 + $0x708] sm:$0xff] }
 0x23c   : > { %2232 = vmatpush.msrb.mxu2 %v1925_v15  ;;  %2718 = vmatpush.msrb.mxu0 %v2419_v50  ;;  %v2489_v4 = vld [vmem:[%s8063_s3 + $0x650] sm:$0xff]  ;;  %v1934_v19 = vld [vmem:[%s8063_s3 + $0x7a8] sm:$0xff] }
 0x23d   : > { %2734 = vmatpush.msrb.mxu1 %v2439_v54  ;;  %2185 = vmatmul.f32.vlgmr.msra.gmra.mxu3 %v1684_v2  ;;  %v2509_v51 = vld [vmem:[%s8063_s3 + $0x6f0] sm:$0xff]  ;;  %v2488_v15 = vld [vmem:[%s8063_s3 + $0x648] sm:$0xff]  ;;  %v1913_v54 = vld [vmem:[%s8063_s3 + $0x700] sm:$0xff] }
 0x23e   : > { %2233 = vmatpush.msrb.mxu2 %v1924_v63  ;;  %2249 = vmatpush.msrb.mxu3 %v1944_v29  ;;  %v2508_v50 = vld [vmem:[%s8063_s3 + $0x6e8] sm:$0xff]  ;;  %v1609_v63 = vadd.f32 %v1608_v18, %v1589_v14  ;;  %v2487_v29 = vld [vmem:[%s8063_s3 + $0x640] sm:$0xff]  ;;  %v2325_v58 = vld [vmem:[%s8063_s3 + $0x130] sm:$0xff] }
 0x23f   : > { %2719 = vmatpush.msrb.mxu0 %v2418_v6  ;;  %2735 = vmatpush.msrb.mxu1 %v2438_v8  ;;  %v2507_v2 = vld [vmem:[%s8063_s3 + $0x6e0] sm:$0xff]  ;;  %v1932_v6 = vld [vmem:[%s8063_s3 + $0x798] sm:$0xff]  ;;  %v2344_v14 = vld [vmem:[%s8063_s3 + $0x1c8] sm:$0xff] }
 0x240   : > { %2234 = vmatpush.msrb.mxu2 %v1923_v16  ;;  %2250 = vmatpush.msrb.mxu3 %v1943_v17  ;;  %v2334_v8 = vld [vmem:[%s8063_s3 + $0x178] sm:$0xff]  ;;  %v1628_v17 = vpop.f32.mrf.mxu1 }
 0x241   : > { %2720 = vmatpush.msrb.mxu0 %v2417_v24  ;;  %2736 = vmatpush.msrb.mxu1 %v2437_v27  ;;  %v2486_v16 = vld [vmem:[%s8063_s3 + $0x638] sm:$0xff]  ;;  %v1931_v24 = vld [vmem:[%s8063_s3 + $0x790] sm:$0xff] }
 0x242   : > { %2235 = vmatpush.msrb.mxu2 %v1922_v1  ;;  %2251 = vmatpush.msrb.mxu3 %v1942_v31  ;;  %v2485_v1 = vld [vmem:[%s8063_s3 + $0x630] sm:$0xff]  ;;  %v1629_v31 = vadd.f32 %v1628_v17, %v1609_v63  ;;  %v2322_v18 = vld [vmem:[%s8063_s3 + $0x118] sm:$0xff]  ;;  %v2320_v17 = vld [vmem:[%s8063_s3 + $0x108] sm:$0xff] }
 0x243   : > { %2721 = vmatpush.msrb.mxu0 %v2416_v42  ;;  %2737 = vmatpush.msrb.mxu1 %v2436_v47  ;;  %v1930_v42 = vld [vmem:[%s8063_s3 + $0x788] sm:$0xff]  ;;  %v2909_v63 = vld [vmem:[%s8065_s5 + $0xf8] sm:$0xff] }
 0x244   : > { %2236 = vmatpush.msrb.mxu2 %v1921_v9  ;;  %2252 = vmatpush.msrb.mxu3 %v1941_v59  ;;  %v2332_v47 = vld [vmem:[%s8063_s3 + $0x168] sm:$0xff] }
 0x245   : > { %2722 = vmatpush.msrb.mxu0 %v2415_v62  ;;  %2738 = vmatpush.msrb.mxu1 %v2435_v20  ;;  %v2504_v59 = vld [vmem:[%s8063_s3 + $0x6c8] sm:$0xff]  ;;  %v1929_v62 = vld [vmem:[%s8063_s3 + $0x780] sm:$0xff] }
 0x246   : > { %2237 = vmatpush.msrb.mxu2 %v1920_v5  ;;  %2253 = vmatpush.msrb.mxu3 %v1940_v12  ;;  %v2483_v5 = vld [vmem:[%s8063_s3 + $0x620] sm:$0xff] }
 0x247   : > { %2723 = vmatmul.f32.vlgmr.msrb.gmra.mxu0 %v2279_v39  ;;  %2739 = vmatpush.msrb.mxu1 %v2434_v35  ;;  %v2503_v35 = vld [vmem:[%s8063_s3 + $0x6c0] sm:$0xff]  ;;  %v1688_v39 = vld [vmem:[#allocation2 + $0x4c] sm:$0xf] }
 0x248   : > { %2787 = vmatpush.msra.mxu0 %v2494_v21  ;;  %2238 = vmatpush.msrb.mxu2 %v1919_v36  ;;  %v2330_v21 = vld [vmem:[%s8063_s3 + $0x158] sm:$0xff] }
 0x249   : > { %2254 = vmatpush.msrb.mxu3 %v1939_v26  ;;  %2740 = vmatpush.msrb.mxu1 %v2433_v44  ;;  %v2350_v36 = vld [vmem:[%s8063_s3 + $0x1f8] sm:$0xff] }
 0x24a   : > { %2788 = vmatpush.msra.mxu0 %v2493_v43  ;;  %2239 = vmatpush.msrb.mxu2 %v1918_v48  ;;  %v2482_v26 = vld [vmem:[%s8063_s3 + $0x618] sm:$0xff]  ;;  %v2349_v43 = vld [vmem:[%s8063_s3 + $0x1f0] sm:$0xff] }
 0x24b   : > { %2255 = vmatpush.msrb.mxu3 %v1938_v38  ;;  %2741 = vmatpush.msrb.mxu1 %v2432_v30  ;;  %v2502_v44 = vld [vmem:[%s8063_s3 + $0x6b8] sm:$0xff]  ;;  %v2481_v48 = vld [vmem:[%s8063_s3 + $0x610] sm:$0xff]  ;;  %v2328_v30 = vld [vmem:[%s8063_s3 + $0x148] sm:$0xff] }
 0x24c   : > { %2789 = vmatpush.msra.mxu0 %v2492_v52  ;;  %2240 = vmatpush.msrb.mxu2 %v1917_v40  ;;  %v2501_v38 = vld [vmem:[%s8063_s3 + $0x6b0] sm:$0xff]  ;;  %v2348_v52 = vld [vmem:[%s8063_s3 + $0x1e8] sm:$0xff] }
 0x24d   : > { %2256 = vmatpush.msrb.mxu3 %v1937_v49  ;;  %2742 = vmatpush.msrb.mxu1 %v2431_v45  ;;  %v2480_v40 = vld [vmem:[%s8063_s3 + $0x608] sm:$0xff]  ;;  %v2347_v49 = vld [vmem:[%s8063_s3 + $0x1e0] sm:$0xff] }
 0x24e   : > { %2790 = vmatpush.msra.mxu0 %v2491_v53  ;;  %2241 = vmatpush.msrb.mxu2 %v1916_v61  ;;  %v2479_v45 = vld [vmem:[%s8063_s3 + $0x600] sm:$0xff]  ;;  %v2326_v53 = vld [vmem:[%s8063_s3 + $0x138] sm:$0xff] }
 0x24f   : > { %2257 = vmatpush.msrb.mxu3 %v1936_v56  ;;  %2743 = vmatmul.f32.vlgmr.msrb.gmra.mxu1 %v2280_v10  ;;  %v2346_v61 = vld [vmem:[%s8063_s3 + $0x1d8] sm:$0xff]  ;;  %v2497_v10 = vld [vmem:[%s8063_s3 + $0x690] sm:$0xff] }
 0x250   : > { %2791 = vmatpush.msra.mxu0 %v2490_v7  ;;  %2807 = vmatpush.msra.mxu1 %v2510_v60  ;;  %v6784_v56 = vld [vmem:[%s8065_s5 + $0x78] sm:$0xff]  ;;  %v2345_v60 = vld [vmem:[%s8063_s3 + $0x1d0] sm:$0xff] }
 0x251   : > { %2242 = vmatpush.msrb.mxu2 %v1915_v0  ;;  %2258 = vmatpush.msrb.mxu3 %v1935_v41  ;;  %v2283_v7 = vld [vmem:[#allocation2 + $0x5a] sm:$0xf]  ;;  %v6798_v0 = vld [vmem:[%s8065_s5 + $0x70] sm:$0xff]  ;;  %v2324_v41 = vld [vmem:[%s8063_s3 + $0x128] sm:$0xff] }
 0x252   : > { %2792 = vmatpush.msra.mxu0 %v2489_v4  ;;  %2808 = vmatpush.msra.mxu1 %v2509_v51  ;;  %v1648_v27 = vpop.f32.mrf.mxu2  ;;  %v2496_v4 = vld [vmem:[%s8063_s3 + $0x688] sm:$0xff] }
 0x253   : > { %2243 = vmatpush.msrb.mxu2 %v1914_v11  ;;  %2259 = vmatpush.msrb.mxu3 %v1934_v19  ;;  %v1649_v9 = vadd.f32 %v1648_v27, %v1629_v31  ;;  %v6813_v51 = vld [vmem:[%s8065_s5 + $0x68] sm:$0xff]  ;;  %v2323_v11 = vld [vmem:[%s8063_s3 + $0x120] sm:$0xff] }
 0x254   : > { %2793 = vmatpush.msra.mxu0 %v2488_v15  ;;  %2809 = vmatpush.msra.mxu1 %v2508_v50  ;;  %v2343_v19 = vld [vmem:[%s8063_s3 + $0x1c0] sm:$0xff] }
 0x255   : > { %2244 = vmatpush.msrb.mxu2 %v1913_v54  ;;  %2260 = vmatpush.msrb.mxu3 %v1933_v25  ;;  %v2495_v15 = vld [vmem:[%s8063_s3 + $0x680] sm:$0xff]  ;;  %v2342_v54 = vld [vmem:[%s8063_s3 + $0x1b8] sm:$0xff] }
 0x256   : > { %2794 = vmatpush.msra.mxu0 %v2487_v29  ;;  %2810 = vmatpush.msra.mxu1 %v2507_v2  ;;  %v6828_v50 = vld [vmem:[%s8065_s5 + $0x60] sm:$0xff]  ;;  %v6840_v25 = vld [vmem:[%s8065_s5 + $0x58] sm:$0xff]  ;;  %v2321_v2 = vld [vmem:[%s8063_s3 + $0x110] sm:$0xff] }
 0x257   : > { %2245 = vmatmul.f32.vlgmr.msrb.gmra.mxu2 %v1687_v55  ;;  %2261 = vmatpush.msrb.mxu3 %v1932_v6  ;;  %v2284_v29 = vld [vmem:[#allocation2 + $0x5f] sm:$0xf]  ;;  %v2341_v6 = vld [vmem:[%s8063_s3 + $0x1b0] sm:$0xff]  ;;  %v2340_v55 = vld [vmem:[%s8063_s3 + $0x1a8] sm:$0xff] }
 0x258   : > { %2587 = vmatpush.msra.mxu2 %v2334_v8  ;;  %2795 = vmatpush.msra.mxu0 %v2486_v16  ;;  %v6855_v8 = vld [vmem:[%s8065_s5 + $0x50] sm:$0xff]  ;;  %v2319_v27 = vld [vmem:[%s8063_s3 + $0x100] sm:$0xff] }
 0x259   : > { %2811 = vmatpush.msra.mxu1 %v2506_v23  ;;  %2262 = vmatpush.msrb.mxu3 %v1931_v24  ;;  %v2908_v16 = vld [vmem:[%s8065_s5 + $0xf0] sm:$0xff]  ;;  %v6870_v23 = vld [vmem:[%s8065_s5 + $0x48] sm:$0xff]  ;;  %v2906_v31 = vld [vmem:[%s8065_s5 + $0xe0] sm:$0xff] }
 0x25a   : > { %2588 = vmatpush.msra.mxu2 %v2333_v28  ;;  %2796 = vmatpush.msra.mxu0 %v2485_v1  ;;  %v1668_v20 = vpop.f32.mrf.mxu3  ;;  %v2907_v24 = vld [vmem:[%s8065_s5 + $0xe8] sm:$0xff]  ;;  %v2339_v28 = vld [vmem:[%s8063_s3 + $0x1a0] sm:$0xff] }
 0x25b   : > { %2812 = vmatpush.msra.mxu1 %v2505_v32  ;;  %2263 = vmatpush.msrb.mxu3 %v1930_v42  ;;  %v1669_v12 = vadd.f32 %v1668_v20, %v1649_v9  ;;  %v6885_v1 = vld [vmem:[%s8065_s5 + $0x40] sm:$0xff]  ;;  %v2338_v32 = vld [vmem:[%s8063_s3 + $0x198] sm:$0xff]  ;;  %v6915_v20 = vld [vmem:[%s8065_s5 + $0x30] sm:$0xff] }
 0x25c   : > { %2589 = vmatpush.msra.mxu2 %v2332_v47  ;;  %2797 = vmatpush.msra.mxu0 %v2484_v13  ;;  %v2398_v42 = vld [vmem:[%s8063_s3 + $0x378] sm:$0xff] }
 0x25d   : > { %2813 = vmatpush.msra.mxu1 %v2504_v59  ;;  %2264 = vmatpush.msrb.mxu3 %v1929_v62  ;;  %v1671_v22 = vmax.f32 %v1669_v12, 0.0  ;;  %v6900_v47 = vld [vmem:[%s8065_s5 + $0x38] sm:$0xff]  ;;  %v2337_v59 = vld [vmem:[%s8063_s3 + $0x190] sm:$0xff]  ;;  %v2396_v12 = vld [vmem:[%s8063_s3 + $0x368] sm:$0xff] }
 0x25e   : > { %2590 = vmatpush.msra.mxu2 %v2331_v34  ;;  %2798 = vmatpush.msra.mxu0 %v2483_v5  ;;  %v2273_v13 = vld [vmem:[#allocation2 + $0x3d] sm:$0xf]  ;;  %v2397_v62 = vld [vmem:[%s8063_s3 + $0x370] sm:$0xff]  ;;  %v2336_v5 = vld [vmem:[%s8063_s3 + $0x188] sm:$0xff] }
 0x25f   : > { %2814 = vmatpush.msra.mxu1 %v2503_v35  ;;  %2265 = vmatmul.f32.vlgmr.msrb.gmra.mxu3 %v1688_v39  ;;  %1672 = vst [vmem:[#allocation3 + $0x4] sm:$0xf] %v1671_v22  ;;  %v2905_v9 = vld [vmem:[%s8065_s5 + $0xd8] sm:$0xff]  ;;  %v2904_v34 = vld [vmem:[%s8065_s5 + $0xd0] sm:$0xff]  ;;  %v6930_v35 = vld [vmem:[%s8065_s5 + $0x28] sm:$0xff] }
 0x260   : > { %2591 = vmatpush.msra.mxu2 %v2330_v21  ;;  %2607 = vmatpush.msra.mxu3 %v2350_v36  ;;  %v2903_v21 = vld [vmem:[%s8065_s5 + $0xc8] sm:$0xff]  ;;  %v2335_v36 = vld [vmem:[%s8063_s3 + $0x180] sm:$0xff] }
 0x261   : > { %2799 = vmatpush.msra.mxu0 %v2482_v26  ;;  %2815 = vmatpush.msra.mxu1 %v2502_v44  ;;  %v2395_v22 = vld [vmem:[%s8063_s3 + $0x360] sm:$0xff]  ;;  %v2394_v44 = vld [vmem:[%s8063_s3 + $0x358] sm:$0xff] }
 0x262   : > { %2592 = vmatpush.msra.mxu2 %v2329_v37  ;;  %2608 = vmatpush.msra.mxu3 %v2349_v43  ;;  %v6945_v39 = vld [vmem:[%s8065_s5 + $0x20] sm:$0xff]  ;;  %v2414_v37 = vld [vmem:[%s8063_s3 + $0x3f8] sm:$0xff] }
 0x263   : > { %2800 = vmatpush.msra.mxu0 %v2481_v48  ;;  %2816 = vmatpush.msra.mxu1 %v2501_v38  ;;  %v2902_v26 = vld [vmem:[%s8065_s5 + $0xc0] sm:$0xff]  ;;  %v6961_v48 = vld [vmem:[%s8065_s5 + $0x18] sm:$0xff] }
 0x264   : > { %2593 = vmatpush.msra.mxu2 %v2328_v30  ;;  %2609 = vmatpush.msra.mxu3 %v2348_v52  ;;  %v2274_v43 = vld [vmem:[#allocation2 + $0x42] sm:$0xf]  ;;  %v2901_v38 = vld [vmem:[%s8065_s5 + $0xb8] sm:$0xff]  ;;  %v2393_v30 = vld [vmem:[%s8063_s3 + $0x350] sm:$0xff] }
 0x265   : > { %2801 = vmatpush.msra.mxu0 %v2480_v40  ;;  %2817 = vmatpush.msra.mxu1 %v2500_v46  ;;  %v2413_v52 = vld [vmem:[%s8063_s3 + $0x3f0] sm:$0xff] }
 0x266   : > { %2594 = vmatpush.msra.mxu2 %v2327_v57  ;;  %2610 = vmatpush.msra.mxu3 %v2347_v49  ;;  %v6975_v40 = vld [vmem:[%s8065_s5 + $0x10] sm:$0xff]  ;;  %v2392_v57 = vld [vmem:[%s8063_s3 + $0x348] sm:$0xff] }
 0x267   : > { %2802 = vmatpush.msra.mxu0 %v2479_v45  ;;  %2818 = vmatpush.msra.mxu1 %v2499_v33  ;;  %v2900_v46 = vld [vmem:[%s8065_s5 + $0xb0] sm:$0xff]  ;;  %v2412_v49 = vld [vmem:[%s8063_s3 + $0x3e8] sm:$0xff] }
 0x268   : > { %2595 = vmatpush.msra.mxu2 %v2326_v53  ;;  %2611 = vmatpush.msra.mxu3 %v2346_v61  ;;  %v6990_v45 = vld [vmem:[%s8065_s5 + $0x8] sm:$0xff]  ;;  %v2391_v53 = vld [vmem:[%s8063_s3 + $0x340] sm:$0xff] }
 0x269   : > { %2803 = vmatmul.f32.vlgmr.msra.gmra.mxu0 %v2283_v7  ;;  %2819 = vmatpush.msra.mxu1 %v2498_v3  ;;  %v2899_v33 = vld [vmem:[%s8065_s5 + $0xa8] sm:$0xff]  ;;  %v2411_v61 = vld [vmem:[%s8063_s3 + $0x3e0] sm:$0xff]  ;;  %v2390_v7 = vld [vmem:[%s8063_s3 + $0x338] sm:$0xff] }
 0x26a   : > { %3026 = vmatpush.msrb.mxu0 %v6784_v56  ;;  %2596 = vmatpush.msra.mxu2 %v2325_v58  ;;  %v7005_v3 = vld [vmem:[%s8065_s5] sm:$0xff] }
 0x26b   : > { %2612 = vmatpush.msra.mxu3 %v2345_v60  ;;  %2820 = vmatpush.msra.mxu1 %v2497_v10  ;;  %v2898_v58 = vld [vmem:[%s8065_s5 + $0xa0] sm:$0xff]  ;;  %v2410_v60 = vld [vmem:[%s8063_s3 + $0x3d8] sm:$0xff] }
 0x26c   : > { %3027 = vmatpush.msrb.mxu0 %v6798_v0  ;;  %2597 = vmatpush.msra.mxu2 %v2324_v41  ;;  %v2897_v10 = vld [vmem:[%s8065_s5 + $0x98] sm:$0xff] }
 0x26d   : > { %2613 = vmatpush.msra.mxu3 %v2344_v14  ;;  %2821 = vmatpush.msra.mxu1 %v2496_v4  ;;  %v7024_v41 = vld [vmem:[%s8065_s5 + $0x278] sm:$0xff]  ;;  %v2389_v14 = vld [vmem:[%s8063_s3 + $0x330] sm:$0xff]  ;;  %v2869_v4 = vld [vmem:[#allocation3] sm:$0x3] }
 0x26e   : > { %3028 = vmatpush.msrb.mxu0 %v6813_v51  ;;  %2598 = vmatpush.msra.mxu2 %v2323_v11  ;;  %v2409_v11 = vld [vmem:[%s8063_s3 + $0x3d0] sm:$0xff] }
 0x26f   : > { %2614 = vmatpush.msra.mxu3 %v2343_v19  ;;  %2822 = vmatpush.msra.mxu1 %v2495_v15  ;;  %v2896_v19 = vld [vmem:[%s8065_s5 + $0x90] sm:$0xff] }
 0x270   : > { %3029 = vmatpush.msrb.mxu0 %v6828_v50  ;;  %2599 = vmatpush.msra.mxu2 %v2322_v18  ;;  %v7038_v15 = vld [vmem:[%s8065_s5 + $0x270] sm:$0xff]  ;;  %v2388_v18 = vld [vmem:[%s8063_s3 + $0x328] sm:$0xff] }
 0x271   : > { %2615 = vmatpush.msra.mxu3 %v2342_v54  ;;  %2823 = vmatmul.f32.vlgmr.msra.gmra.mxu1 %v2284_v29  ;;  %v2408_v54 = vld [vmem:[%s8063_s3 + $0x3c8] sm:$0xff] }
 0x272   : > { %3030 = vmatpush.msrb.mxu0 %v6840_v25  ;;  %3046 = vmatpush.msrb.mxu1 %v2909_v63  ;;  %v2895_v63 = vld [vmem:[%s8065_s5 + $0x88] sm:$0xff] }
 0x273   : > { %2600 = vmatpush.msra.mxu2 %v2321_v2  ;;  %2616 = vmatpush.msra.mxu3 %v2341_v6  ;;  %v7053_v29 = vld [vmem:[%s8065_s5 + $0x268] sm:$0xff]  ;;  %v2387_v2 = vld [vmem:[%s8063_s3 + $0x320] sm:$0xff] }
 0x274   : > { %3031 = vmatpush.msrb.mxu0 %v6855_v8  ;;  %3047 = vmatpush.msrb.mxu1 %v2908_v16  ;;  %v2407_v6 = vld [vmem:[%s8063_s3 + $0x3c0] sm:$0xff] }
 0x275   : > { %2601 = vmatpush.msra.mxu2 %v2320_v17  ;;  %2617 = vmatpush.msra.mxu3 %v2340_v55  ;;  %v2894_v16 = vld [vmem:[%s8065_s5 + $0x80] sm:$0xff]  ;;  %v2386_v55 = vld [vmem:[%s8063_s3 + $0x318] sm:$0xff] }
 0x276   : > { %3032 = vmatpush.msrb.mxu0 %v6870_v23  ;;  %3048 = vmatpush.msrb.mxu1 %v2907_v24  ;;  %v7068_v17 = vld [vmem:[%s8065_s5 + $0x260] sm:$0xff]  ;;  %v2406_v24 = vld [vmem:[%s8063_s3 + $0x3b8] sm:$0xff] }
 0x277   : > { %2602 = vmatpush.msra.mxu2 %v2319_v27  ;;  %2618 = vmatpush.msra.mxu3 %v2339_v28  ;;  %v7080_v27 = vld [vmem:[%s8065_s5 + $0x258] sm:$0xff] }
 0x278   : > { %3033 = vmatpush.msrb.mxu0 %v6885_v1  ;;  %3049 = vmatpush.msrb.mxu1 %v2906_v31  ;;  %v2973_v28 = vld [vmem:[%s8065_s5 + $0x2f8] sm:$0xff]  ;;  %v2870_v31 = vld [vmem:[#allocation3 + $0x1] sm:$0x3] }
 0x279   : > { %2603 = vmatmul.f32.vlgmr.msra.gmra.mxu2 %v2273_v13  ;;  %2619 = vmatpush.msra.mxu3 %v2338_v32  ;;  %v2385_v32 = vld [vmem:[%s8063_s3 + $0x310] sm:$0xff] }
 0x27a   : > { %2667 = vmatpush.msrb.mxu2 %v2398_v42  ;;  %3034 = vmatpush.msrb.mxu0 %v6900_v47  ;;  %v2405_v42 = vld [vmem:[%s8063_s3 + $0x3b0] sm:$0xff] }
 0x27b   : > { %3050 = vmatpush.msrb.mxu1 %v2905_v9  ;;  %2620 = vmatpush.msra.mxu3 %v2337_v59  ;;  %v7095_v13 = vld [vmem:[%s8065_s5 + $0x250] sm:$0xff]  ;;  %v2384_v59 = vld [vmem:[%s8063_s3 + $0x308] sm:$0xff] }
 0x27c   : > { %2668 = vmatpush.msrb.mxu2 %v2397_v62  ;;  %3035 = vmatpush.msrb.mxu0 %v6915_v20  ;;  %v2972_v9 = vld [vmem:[%s8065_s5 + $0x2f0] sm:$0xff]  ;;  %v2404_v62 = vld [vmem:[%s8063_s3 + $0x3a8] sm:$0xff] }
 0x27d   : > { %3051 = vmatpush.msrb.mxu1 %v2904_v34  ;;  %2621 = vmatpush.msra.mxu3 %v2336_v5  ;;  %v7110_v34 = vld [vmem:[%s8065_s5 + $0x248] sm:$0xff] }
 0x27e   : > { %2669 = vmatpush.msrb.mxu2 %v2396_v12  ;;  %3036 = vmatpush.msrb.mxu0 %v6930_v35  ;;  %v2971_v5 = vld [vmem:[%s8065_s5 + $0x2e8] sm:$0xff]  ;;  %v2383_v12 = vld [vmem:[%s8063_s3 + $0x300] sm:$0xff] }
 0x27f   : > { %3052 = vmatpush.msrb.mxu1 %v2903_v21  ;;  %2622 = vmatpush.msra.mxu3 %v2335_v36  ;;  %v2403_v21 = vld [vmem:[%s8063_s3 + $0x3a0] sm:$0xff] }
 0x280   : > { %2670 = vmatpush.msrb.mxu2 %v2395_v22  ;;  %3037 = vmatpush.msrb.mxu0 %v6945_v39  ;;  %v7125_v36 = vld [vmem:[%s8065_s5 + $0x240] sm:$0xff] }
 0x281   : > { %3053 = vmatpush.msrb.mxu1 %v2902_v26  ;;  %2623 = vmatmul.f32.vlgmr.msra.gmra.mxu3 %v2274_v43  ;;  %v2970_v22 = vld [vmem:[%s8065_s5 + $0x2e0] sm:$0xff]  ;;  %v2402_v26 = vld [vmem:[%s8063_s3 + $0x398] sm:$0xff] }
 0x282   : > { %2671 = vmatpush.msrb.mxu2 %v2394_v44  ;;  %2687 = vmatpush.msrb.mxu3 %v2414_v37  ;;  %v2462_v44 = vld [vmem:[%s8063_s3 + $0x578] sm:$0xff]  ;;  %v2277_v43 = vld [vmem:[#allocation2 + $0x47] sm:$0xf] }
 0x283   : > { %3038 = vmatpush.msrb.mxu0 %v6961_v48  ;;  %3054 = vmatpush.msrb.mxu1 %v2901_v38  ;;  %v7140_v37 = vld [vmem:[%s8065_s5 + $0x238] sm:$0xff] }
 0x284   : > { %2672 = vmatpush.msrb.mxu2 %v2393_v30  ;;  %2688 = vmatpush.msrb.mxu3 %v2413_v52  ;;  %v2969_v38 = vld [vmem:[%s8065_s5 + $0x2d8] sm:$0xff]  ;;  %v2401_v30 = vld [vmem:[%s8063_s3 + $0x390] sm:$0xff] }
 0x285   : > { %3039 = vmatpush.msrb.mxu0 %v6975_v40  ;;  %3055 = vmatpush.msrb.mxu1 %v2900_v46  ;;  %v2461_v52 = vld [vmem:[%s8063_s3 + $0x570] sm:$0xff] }
 0x286   : > { %2673 = vmatpush.msrb.mxu2 %v2392_v57  ;;  %2689 = vmatpush.msrb.mxu3 %v2412_v49  ;;  %v7155_v46 = vld [vmem:[%s8065_s5 + $0x230] sm:$0xff]  ;;  %v2400_v49 = vld [vmem:[%s8063_s3 + $0x388] sm:$0xff] }
 0x287   : > { %3040 = vmatpush.msrb.mxu0 %v6990_v45  ;;  %3056 = vmatpush.msrb.mxu1 %v2899_v33  ;;  %v2968_v57 = vld [vmem:[%s8065_s5 + $0x2d0] sm:$0xff]  ;;  %v2460_v33 = vld [vmem:[%s8063_s3 + $0x568] sm:$0xff] }
 0x288   : > { %2674 = vmatpush.msrb.mxu2 %v2391_v53  ;;  %2690 = vmatpush.msrb.mxu3 %v2411_v61  ;;  %v7170_v53 = vld [vmem:[%s8065_s5 + $0x228] sm:$0xff] }
 0x289   : > { %3041 = vmatpush.msrb.mxu0 %v7005_v3  ;;  %3057 = vmatpush.msrb.mxu1 %v2898_v58  ;;  %v2967_v61 = vld [vmem:[%s8065_s5 + $0x2c8] sm:$0xff]  ;;  %v2399_v58 = vld [vmem:[%s8063_s3 + $0x380] sm:$0xff] }
 0x28a   : > { %2675 = vmatpush.msrb.mxu2 %v2390_v7  ;;  %2691 = vmatpush.msrb.mxu3 %v2410_v60  ;;  %v2459_v7 = vld [vmem:[%s8063_s3 + $0x560] sm:$0xff] }
 0x28b   : > { %3042 = vmatmul.f32.vlgmr.msrb.gmra.mxu0 %v2869_v4  ;;  %3058 = vmatpush.msrb.mxu1 %v2897_v10  ;;  %v7185_v60 = vld [vmem:[%s8065_s5 + $0x220] sm:$0xff]  ;;  %v2478_v4 = vld [vmem:[%s8063_s3 + $0x5f8] sm:$0xff] }
 0x28c   : > { %3106 = vmatpush.msra.mxu0 %v7024_v41  ;;  %2676 = vmatpush.msrb.mxu2 %v2389_v14  ;;  %v2966_v10 = vld [vmem:[%s8065_s5 + $0x2c0] sm:$0xff]  ;;  %v2458_v14 = vld [vmem:[%s8063_s3 + $0x558] sm:$0xff] }
 0x28d   : > { %2692 = vmatpush.msrb.mxu3 %v2409_v11  ;;  %3059 = vmatpush.msrb.mxu1 %v2896_v19  ;;  %v2278_v11 = vld [vmem:[#allocation2 + $0x4c] sm:$0xf]  ;;  %v7201_v19 = vld [vmem:[%s8065_s5 + $0x218] sm:$0xff] }
 0x28e   : > { %3107 = vmatpush.msra.mxu0 %v7038_v15  ;;  %2677 = vmatpush.msrb.mxu2 %v2388_v18  ;;  %v2965_v18 = vld [vmem:[%s8065_s5 + $0x2b8] sm:$0xff] }
 0x28f   : > { %2693 = vmatpush.msrb.mxu3 %v2408_v54  ;;  %3060 = vmatpush.msrb.mxu1 %v2895_v63  ;;  %v2457_v54 = vld [vmem:[%s8063_s3 + $0x550] sm:$0xff] }
 0x290   : > { %3108 = vmatpush.msra.mxu0 %v7053_v29  ;;  %2678 = vmatpush.msrb.mxu2 %v2387_v2  ;;  %v2477_v63 = vld [vmem:[%s8063_s3 + $0x5f0] sm:$0xff] }
 0x291   : > { %2694 = vmatpush.msrb.mxu3 %v2407_v6  ;;  %3061 = vmatpush.msrb.mxu1 %v2894_v16  ;;  %v7215_v2 = vld [vmem:[%s8065_s5 + $0x210] sm:$0xff]  ;;  %v2456_v16 = vld [vmem:[%s8063_s3 + $0x548] sm:$0xff] }
 0x292   : > { %3109 = vmatpush.msra.mxu0 %v7068_v17  ;;  %2679 = vmatpush.msrb.mxu2 %v2386_v55  ;;  %v2964_v6 = vld [vmem:[%s8065_s5 + $0x2b0] sm:$0xff]  ;;  %v2476_v55 = vld [vmem:[%s8063_s3 + $0x5e8] sm:$0xff] }
 0x293   : > { %2695 = vmatpush.msrb.mxu3 %v2406_v24  ;;  %3062 = vmatmul.f32.vlgmr.msrb.gmra.mxu1 %v2870_v31  ;;  %v7230_v24 = vld [vmem:[%s8065_s5 + $0x208] sm:$0xff]  ;;  %v2455_v31 = vld [vmem:[%s8063_s3 + $0x540] sm:$0xff] }
 0x294   : > { %3110 = vmatpush.msra.mxu0 %v7080_v27  ;;  %3126 = vmatpush.msra.mxu1 %v2973_v28  ;;  %v2963_v28 = vld [vmem:[%s8065_s5 + $0x2a8] sm:$0xff] }
 0x295   : > { %2680 = vmatpush.msrb.mxu2 %v2385_v32  ;;  %2696 = vmatpush.msrb.mxu3 %v2405_v42  ;;  %v2475_v32 = vld [vmem:[%s8063_s3 + $0x5e0] sm:$0xff] }
 0x296   : > { %3111 = vmatpush.msra.mxu0 %v7095_v13  ;;  %3127 = vmatpush.msra.mxu1 %v2972_v9  ;;  %v7245_v42 = vld [vmem:[%s8065_s5 + $0x200] sm:$0xff] }
 0x297   : > { %2681 = vmatpush.msrb.mxu2 %v2384_v59  ;;  %2697 = vmatpush.msrb.mxu3 %v2404_v62  ;;  %v2962_v9 = vld [vmem:[%s8065_s5 + $0x2a0] sm:$0xff]  ;;  %v2454_v59 = vld [vmem:[%s8063_s3 + $0x538] sm:$0xff] }
 0x298   : > { %3112 = vmatpush.msra.mxu0 %v7110_v34  ;;  %3128 = vmatpush.msra.mxu1 %v2971_v5  ;;  %v2474_v62 = vld [vmem:[%s8063_s3 + $0x5d8] sm:$0xff] }
 0x299   : > { %2682 = vmatpush.msrb.mxu2 %v2383_v12  ;;  %2698 = vmatpush.msrb.mxu3 %v2403_v21  ;;  %v2961_v5 = vld [vmem:[%s8065_s5 + $0x298] sm:$0xff]  ;;  %v2453_v12 = vld [vmem:[%s8063_s3 + $0x530] sm:$0xff] }
 0x29a   : > { %3113 = vmatpush.msra.mxu0 %v7125_v36  ;;  %3129 = vmatpush.msra.mxu1 %v2970_v22  ;;  %v2473_v21 = vld [vmem:[%s8063_s3 + $0x5d0] sm:$0xff]  ;;  %v2873_v22 = vld [vmem:[#allocation3 + $0x5] sm:$0x3] }
 0x29b   : > { %2683 = vmatmul.f32.vlgmr.msrb.gmra.mxu2 %v2277_v43  ;;  %2699 = vmatpush.msrb.mxu3 %v2402_v26  ;;  %v2960_v26 = vld [vmem:[%s8065_s5 + $0x290] sm:$0xff]  ;;  %v2452_v43 = vld [vmem:[%s8063_s3 + $0x528] sm:$0xff] }
 0x29c   : > { %2747 = vmatpush.msra.mxu2 %v2462_v44  ;;  %3114 = vmatpush.msra.mxu0 %v7140_v37  ;;  %v7273_v44 = vld [vmem:[%s8065_s5 + $0x478] sm:$0xff] }
 0x29d   : > { %3130 = vmatpush.msra.mxu1 %v2969_v38  ;;  %2700 = vmatpush.msrb.mxu3 %v2401_v30  ;;  %v2472_v38 = vld [vmem:[%s8063_s3 + $0x5c8] sm:$0xff] }
 0x29e   : > { %2748 = vmatpush.msra.mxu2 %v2461_v52  ;;  %3115 = vmatpush.msra.mxu0 %v7155_v46  ;;  %v2959_v30 = vld [vmem:[%s8065_s5 + $0x288] sm:$0xff]  ;;  %v7287_v52 = vld [vmem:[%s8065_s5 + $0x470] sm:$0xff] }
 0x29f   : > { %3131 = vmatpush.msra.mxu1 %v2968_v57  ;;  %2701 = vmatpush.msrb.mxu3 %v2400_v49  ;;  %v2451_v57 = vld [vmem:[%s8063_s3 + $0x520] sm:$0xff] }
 0x2a0   : > { %2749 = vmatpush.msra.mxu2 %v2460_v33  ;;  %3116 = vmatpush.msra.mxu0 %v7170_v53  ;;  %v2471_v49 = vld [vmem:[%s8063_s3 + $0x5c0] sm:$0xff] }
 0x2a1   : > { %3132 = vmatpush.msra.mxu1 %v2967_v61  ;;  %2702 = vmatpush.msrb.mxu3 %v2399_v58  ;;  %v2958_v33 = vld [vmem:[%s8065_s5 + $0x280] sm:$0xff]  ;;  %v7302_v61 = vld [vmem:[%s8065_s5 + $0x468] sm:$0xff]  ;;  %v2450_v58 = vld [vmem:[%s8063_s3 + $0x518] sm:$0xff] }
 0x2a2   : > { %2750 = vmatpush.msra.mxu2 %v2459_v7  ;;  %3117 = vmatpush.msra.mxu0 %v7185_v60  ;;  %v2470_v7 = vld [vmem:[%s8063_s3 + $0x5b8] sm:$0xff] }
 0x2a3   : > { %3133 = vmatpush.msra.mxu1 %v2966_v10  ;;  %2703 = vmatmul.f32.vlgmr.msrb.gmra.mxu3 %v2278_v11  ;;  %v7314_v10 = vld [vmem:[%s8065_s5 + $0x460] sm:$0xff]  ;;  %v1966_v11 = vpop.f32.mrf.mxu0 }
 0x2a4   : > { %2751 = vmatpush.msra.mxu2 %v2458_v14  ;;  %2767 = vmatpush.msra.mxu3 %v2478_v4  ;;  %v3675_v14 = vld [vmem:[%s8064_s4] ss:$0 sm:$0xff]  ;;  %v2449_v4 = vld [vmem:[%s8063_s3 + $0x510] sm:$0xff] }
 0x2a5   : > { %3118 = vmatpush.msra.mxu0 %v7201_v19  ;;  %3134 = vmatpush.msra.mxu1 %v2965_v18  ;;  %v2874_v18 = vld [vmem:[#allocation3 + $0x6] sm:$0x3] }
 0x2a6   : > { %2752 = vmatpush.msra.mxu2 %v2457_v54  ;;  %2768 = vmatpush.msra.mxu3 %v2477_v63  ;;  %v2469_v54 = vld [vmem:[%s8063_s3 + $0x5b0] sm:$0xff]  ;;  %v7329_v63 = vld [vmem:[%s8065_s5 + $0x458] sm:$0xff] }
 0x2a7   : > { %3119 = vmatpush.msra.mxu0 %v7215_v2  ;;  %3135 = vmatpush.msra.mxu1 %v2964_v6  ;;  %v2448_v6 = vld [vmem:[%s8063_s3 + $0x508] sm:$0xff] }
 0x2a8   : > { %2753 = vmatpush.msra.mxu2 %v2456_v16  ;;  %2769 = vmatpush.msra.mxu3 %v2476_v55  ;;  %v2468_v16 = vld [vmem:[%s8063_s3 + $0x5a8] sm:$0xff]  ;;  %v7342_v55 = vld [vmem:[%s8065_s5 + $0x450] sm:$0xff] }
 0x2a9   : > { %3120 = vmatpush.msra.mxu0 %v7230_v24  ;;  %3136 = vmatpush.msra.mxu1 %v2963_v28  ;;  %v1967_v28 = vadd.f32 %v3675_v14, %v1966_v11  ;;  %v7415_v11 = vld [vmem:[%s8065_s5 + $0x428] sm:$0xff] }
 0x2aa   : > { %2754 = vmatpush.msra.mxu2 %v2455_v31  ;;  %2770 = vmatpush.msra.mxu3 %v2475_v32  ;;  %v2447_v31 = vld [vmem:[%s8063_s3 + $0x500] sm:$0xff]  ;;  %v1986_v32 = vpop.f32.mrf.mxu1 }
 0x2ab   : > { %3121 = vmatpush.msra.mxu0 %v7245_v42  ;;  %3137 = vmatpush.msra.mxu1 %v2962_v9  ;;  %v2526_v9 = vld [vmem:[%s8063_s3 + $0x778] sm:$0xff] }
 0x2ac   : > { %2755 = vmatpush.msra.mxu2 %v2454_v59  ;;  %2771 = vmatpush.msra.mxu3 %v2474_v62  ;;  %v2006_v59 = vpop.f32.mrf.mxu2  ;;  %v2281_v62 = vld [vmem:[#allocation2 + $0x51] sm:$0xf] }
 0x2ad   : > { %3122 = vmatmul.f32.vlgmr.msra.gmra.mxu0 %v2873_v22  ;;  %3138 = vmatpush.msra.mxu1 %v2961_v5  ;;  %v7363_v5 = vld [vmem:[%s8065_s5 + $0x448] sm:$0xff]  ;;  %v2026_v22 = vpop.f32.mrf.mxu3 }
 0x2ae   : > { %2756 = vmatpush.msra.mxu2 %v2453_v12  ;;  %2772 = vmatpush.msra.mxu3 %v2473_v21  ;;  %v1987_v12 = vadd.f32 %v1986_v32, %v1967_v28  ;;  %v2525_v21 = vld [vmem:[%s8063_s3 + $0x770] sm:$0xff]  ;;  %v2540_v28 = vld [vmem:[%s8063_s3 + $0x7e8] sm:$0xff]  ;;  %v7440_v32 = vld [vmem:[%s8065_s5 + $0x418] sm:$0xff] }
 0x2af   : > { %3139 = vmatpush.msra.mxu1 %v2960_v26  ;;  %3186 = vmatpush.msrb.mxu0 %v7273_v44  ;;  %v7375_v26 = vld [vmem:[%s8065_s5 + $0x440] sm:$0xff] }
 0x2b0   : > { %2757 = vmatpush.msra.mxu2 %v2452_v43  ;;  %2773 = vmatpush.msra.mxu3 %v2472_v38  ;;  %v2007_v43 = vadd.f32 %v2006_v59, %v1987_v12  ;;  %v2524_v38 = vld [vmem:[%s8063_s3 + $0x768] sm:$0xff] }
 0x2b1   : > { %3140 = vmatpush.msra.mxu1 %v2959_v30  ;;  %3187 = vmatpush.msrb.mxu0 %v7287_v52  ;;  %v7388_v30 = vld [vmem:[%s8065_s5 + $0x438] sm:$0xff] }
 0x2b2   : > { %2758 = vmatpush.msra.mxu2 %v2451_v57  ;;  %2774 = vmatpush.msra.mxu3 %v2471_v49  ;;  %v2027_v57 = vadd.f32 %v2026_v22, %v2007_v43  ;;  %v2523_v49 = vld [vmem:[%s8063_s3 + $0x760] sm:$0xff]  ;;  %v2537_v22 = vld [vmem:[%s8063_s3 + $0x7d0] sm:$0xff] }
 0x2b3   : > { %3141 = vmatpush.msra.mxu1 %v2958_v33  ;;  %3188 = vmatpush.msrb.mxu0 %v7302_v61  ;;  %v7401_v33 = vld [vmem:[%s8065_s5 + $0x430] sm:$0xff] }
 0x2b4   : > { %2759 = vmatpush.msra.mxu2 %v2450_v58  ;;  %2775 = vmatpush.msra.mxu3 %v2470_v7  ;;  %v2046_v58 = vpop.f32.mrf.mxu0  ;;  %v2542_v7 = vld [vmem:[%s8063_s3 + $0x7f8] sm:$0xff] }
 0x2b5   : > { %3142 = vmatmul.f32.vlgmr.msra.gmra.mxu1 %v2874_v18  ;;  %3189 = vmatpush.msrb.mxu0 %v7314_v10  ;;  %v2047_v14 = vadd.f32 %v2046_v58, %v2027_v57  ;;  %v2541_v18 = vld [vmem:[%s8063_s3 + $0x7f0] sm:$0xff]  ;;  %v7492_v57 = vld [vmem:[%s8065_s5 + $0x1f8] sm:$0xff] }
 0x2b6   : > { %3365 = vmatpush.msrb.mxu1 %v6784_v56  ;;  %2760 = vmatpush.msra.mxu2 %v2449_v4  ;;  %v2467_v56 = vld [vmem:[%s8063_s3 + $0x5a0] sm:$0xff]  ;;  %v2282_v4 = vld [vmem:[#allocation2 + $0x56] sm:$0xf] }
 0x2b7   : > { %2776 = vmatpush.msra.mxu3 %v2469_v54  ;;  %3190 = vmatpush.msrb.mxu0 %v7329_v63  ;;  %v7427_v54 = vld [vmem:[%s8065_s5 + $0x420] sm:$0xff] }
 0x2b8   : > { %3366 = vmatpush.msrb.mxu1 %v6798_v0  ;;  %2761 = vmatpush.msra.mxu2 %v2448_v6  ;;  %v2466_v0 = vld [vmem:[%s8063_s3 + $0x598] sm:$0xff]  ;;  %v2066_v6 = vpop.f32.mrf.mxu1 }
 0x2b9   : > { %2777 = vmatpush.msra.mxu3 %v2468_v16  ;;  %3191 = vmatpush.msrb.mxu0 %v7342_v55  ;;  %v2086_v16 = vpop.f32.mrf.mxu2 }
 0x2ba   : > { %3367 = vmatpush.msrb.mxu1 %v6813_v51  ;;  %2762 = vmatpush.msra.mxu2 %v2447_v31  ;;  %v2465_v51 = vld [vmem:[%s8063_s3 + $0x590] sm:$0xff]  ;;  %v2067_v31 = vadd.f32 %v2066_v6, %v2047_v14 }
 0x2bb   : > { %2778 = vmatpush.msra.mxu3 %v2467_v56  ;;  %2763 = vmatmul.f32.vlgmr.msra.gmra.mxu2 %v2281_v62  ;;  %v2106_v56 = vpop.f32.mrf.mxu3  ;;  %v7453_v62 = vld [vmem:[%s8065_s5 + $0x410] sm:$0xff] }
 0x2bc   : > { %3368 = vmatpush.msrb.mxu1 %v6828_v50  ;;  %2827 = vmatpush.msrb.mxu2 %v2526_v9  ;;  %v2464_v50 = vld [vmem:[%s8063_s3 + $0x588] sm:$0xff]  ;;  %v2539_v9 = vld [vmem:[%s8063_s3 + $0x7e0] sm:$0xff]  ;;  %v2087_v59 = vadd.f32 %v2086_v16, %v2067_v31  ;;  %v2126_v43 = vpop.f32.mrf.mxu0 }
 0x2bd   : > { %2779 = vmatpush.msra.mxu3 %v2466_v0  ;;  %3192 = vmatpush.msrb.mxu0 %v7363_v5  ;;  %v2538_v0 = vld [vmem:[%s8063_s3 + $0x7d8] sm:$0xff]  ;;  %v3208_v16 = vld [vmem:[#allocation3 + $0x4] sm:$0x3] }
 0x2be   : > { %3369 = vmatpush.msrb.mxu1 %v6840_v25  ;;  %2828 = vmatpush.msrb.mxu2 %v2525_v21  ;;  %v2463_v25 = vld [vmem:[%s8063_s3 + $0x580] sm:$0xff]  ;;  %v2107_v12 = vadd.f32 %v2106_v56, %v2087_v59  ;;  %v7466_v21 = vld [vmem:[%s8065_s5 + $0x408] sm:$0xff]  ;;  %v7543_v56 = vld [vmem:[%s8065_s5 + $0x1d8] sm:$0xff] }
 0x2bf   : > { %2780 = vmatpush.msra.mxu3 %v2465_v51  ;;  %3193 = vmatpush.msrb.mxu0 %v7375_v26  ;;  %v7479_v51 = vld [vmem:[%s8065_s5 + $0x400] sm:$0xff] }
 0x2c0   : > { %3370 = vmatpush.msrb.mxu1 %v6855_v8  ;;  %2829 = vmatpush.msrb.mxu2 %v2524_v38  ;;  %v2522_v8 = vld [vmem:[%s8063_s3 + $0x758] sm:$0xff]  ;;  %v2536_v38 = vld [vmem:[%s8063_s3 + $0x7c8] sm:$0xff]  ;;  %v2146_v58 = vpop.f32.mrf.mxu1 }
 0x2c1   : > { %2781 = vmatpush.msra.mxu3 %v2464_v50  ;;  %3194 = vmatpush.msrb.mxu0 %v7388_v30  ;;  %v2127_v50 = vadd.f32 %v2126_v43, %v2107_v12  ;;  %v2285_v12 = vld [vmem:[#allocation2 + $0x5b] sm:$0xf]  ;;  %v7581_v43 = vld [vmem:[%s8065_s5 + $0x1c8] sm:$0xff] }
 0x2c2   : > { %3371 = vmatpush.msrb.mxu1 %v6870_v23  ;;  %2830 = vmatpush.msrb.mxu2 %v2523_v49  ;;  %v2521_v23 = vld [vmem:[%s8063_s3 + $0x750] sm:$0xff]  ;;  %v2535_v49 = vld [vmem:[%s8063_s3 + $0x7c0] sm:$0xff] }
 0x2c3   : > { %2782 = vmatpush.msra.mxu3 %v2463_v25  ;;  %3195 = vmatpush.msrb.mxu0 %v7401_v33  ;;  %v7505_v25 = vld [vmem:[%s8065_s5 + $0x1f0] sm:$0xff]  ;;  %v2147_v14 = vadd.f32 %v2146_v58, %v2127_v50  ;;  %v2527_v58 = vld [vmem:[%s8063_s3 + $0x780] sm:$0xff] }
 0x2c4   : > { %3372 = vmatpush.msrb.mxu1 %v6885_v1  ;;  %2783 = vmatmul.f32.vlgmr.msra.gmra.mxu3 %v2282_v4  ;;  %v2520_v1 = vld [vmem:[%s8063_s3 + $0x748] sm:$0xff]  ;;  %v2206_v59 = vpop.f32.mrf.mxu0 }
 0x2c5   : > { %2831 = vmatpush.msrb.mxu2 %v2522_v8  ;;  %2847 = vmatpush.msrb.mxu3 %v2542_v7  ;;  %v2166_v8 = vpop.f32.mrf.mxu2  ;;  %v2534_v7 = vld [vmem:[%s8063_s3 + $0x7b8] sm:$0xff]  ;;  %v7518_v4 = vld [vmem:[%s8065_s5 + $0x1e8] sm:$0xff] }
 0x2c6   : > { %3373 = vmatpush.msrb.mxu1 %v6900_v47  ;;  %3196 = vmatpush.msrb.mxu0 %v7415_v11  ;;  %v2519_v47 = vld [vmem:[%s8063_s3 + $0x740] sm:$0xff]  ;;  %v2167_v6 = vadd.f32 %v2166_v8, %v2147_v14 }
 0x2c7   : > { %2832 = vmatpush.msrb.mxu2 %v2521_v23  ;;  %2848 = vmatpush.msrb.mxu3 %v2541_v18  ;;  %v2186_v23 = vpop.f32.mrf.mxu3  ;;  %v2533_v18 = vld [vmem:[%s8063_s3 + $0x7b0] sm:$0xff] }
 0x2c8   : > { %3374 = vmatpush.msrb.mxu1 %v6915_v20  ;;  %3197 = vmatpush.msrb.mxu0 %v7427_v54  ;;  %v2518_v20 = vld [vmem:[%s8063_s3 + $0x738] sm:$0xff]  ;;  %v2187_v31 = vadd.f32 %v2186_v23, %v2167_v6  ;;  %v7677_v6 = vld [vmem:[%s8065_s5 + $0x128] sm:$0xff] }
 0x2c9   : > { %2833 = vmatpush.msrb.mxu2 %v2520_v1  ;;  %2849 = vmatpush.msrb.mxu3 %v2540_v28  ;;  %v7531_v1 = vld [vmem:[%s8065_s5 + $0x1e0] sm:$0xff]  ;;  %v2532_v28 = vld [vmem:[%s8063_s3 + $0x7a8] sm:$0xff]  ;;  %v3272_v23 = vld [vmem:[%s8065_s5 + $0x1b8] sm:$0xff] }
 0x2ca   : > { %3375 = vmatpush.msrb.mxu1 %v6930_v35  ;;  %3198 = vmatpush.msrb.mxu0 %v7440_v32  ;;  %v2517_v35 = vld [vmem:[%s8063_s3 + $0x730] sm:$0xff] }
 0x2cb   : > { %2834 = vmatpush.msrb.mxu2 %v2519_v47  ;;  %2850 = vmatpush.msrb.mxu3 %v2539_v9  ;;  %v2511_v47 = vld [vmem:[%s8063_s3 + $0x700] sm:$0xff] }
 0x2cc   : > { %3376 = vmatpush.msrb.mxu1 %v6945_v39  ;;  %3199 = vmatpush.msrb.mxu0 %v7453_v62  ;;  %v2516_v39 = vld [vmem:[%s8063_s3 + $0x728] sm:$0xff]  ;;  %v2531_v9 = vld [vmem:[%s8063_s3 + $0x7a0] sm:$0xff] }
 0x2cd   : > { %2835 = vmatpush.msrb.mxu2 %v2518_v20  ;;  %2851 = vmatpush.msrb.mxu3 %v2538_v0  ;;  %v7557_v20 = vld [vmem:[%s8065_s5 + $0x178] sm:$0xff]  ;;  %v2207_v0 = vadd.f32 %v2206_v59, %v2187_v31  ;;  %v7717_v31 = vld [vmem:[%s8065_s5 + $0x108] sm:$0xff]  ;;  %v3004_v59 = vld [vmem:[%s8065_s5 + $0x3f0] sm:$0xff] }
 0x2ce   : > { %3377 = vmatpush.msrb.mxu1 %v6961_v48  ;;  %3200 = vmatpush.msrb.mxu0 %v7466_v21  ;;  %v2515_v48 = vld [vmem:[%s8063_s3 + $0x720] sm:$0xff] }
 0x2cf   : > { %2836 = vmatpush.msrb.mxu2 %v2517_v35  ;;  %2852 = vmatpush.msrb.mxu3 %v2537_v22  ;;  %v7566_v35 = vld [vmem:[%s8065_s5 + $0x1d0] sm:$0xff] }
 0x2d0   : > { %3378 = vmatpush.msrb.mxu1 %v6975_v40  ;;  %3201 = vmatpush.msrb.mxu0 %v7479_v51  ;;  %v2514_v40 = vld [vmem:[%s8063_s3 + $0x718] sm:$0xff]  ;;  %v2529_v22 = vld [vmem:[%s8063_s3 + $0x790] sm:$0xff] }
 0x2d1   : > { %2837 = vmatpush.msrb.mxu2 %v2516_v39  ;;  %2853 = vmatpush.msrb.mxu3 %v2536_v38  ;;  %v2226_v39 = vpop.f32.mrf.mxu1  ;;  %v2528_v38 = vld [vmem:[%s8063_s3 + $0x788] sm:$0xff] }
 0x2d2   : > { %3379 = vmatpush.msrb.mxu1 %v6990_v45  ;;  %3425 = vmatpush.msra.mxu0 %v7492_v57  ;;  %v2513_v45 = vld [vmem:[%s8063_s3 + $0x710] sm:$0xff] }
 0x2d3   : > { %2838 = vmatpush.msrb.mxu2 %v2515_v48  ;;  %2854 = vmatpush.msrb.mxu3 %v2535_v49  ;;  %v2227_v48 = vadd.f32 %v2226_v39, %v2207_v0  ;;  %v7603_v49 = vld [vmem:[%s8065_s5 + $0x160] sm:$0xff]  ;;  %v7751_v0 = vld [vmem:[%s8065_s5 + $0x368] sm:$0xff] }
 0x2d4   : > { %3380 = vmatpush.msrb.mxu1 %v7005_v3  ;;  %3426 = vmatpush.msra.mxu0 %v7505_v25  ;;  %v2512_v3 = vld [vmem:[%s8063_s3 + $0x708] sm:$0xff] }
 0x2d5   : > { %2839 = vmatpush.msrb.mxu2 %v2514_v40  ;;  %2855 = vmatpush.msrb.mxu3 %v2534_v7  ;;  %v2286_v7 = vld [vmem:[#allocation2 + $0x60] sm:$0xf]  ;;  %v7788_v39 = vld [vmem:[%s8065_s5 + $0x348] sm:$0xff] }
 0x2d6   : > { %3381 = vmatmul.f32.vlgmr.msrb.gmra.mxu1 %v3208_v16  ;;  %3427 = vmatpush.msra.mxu0 %v7518_v4 }
 0x2d7   : > { %2840 = vmatpush.msrb.mxu2 %v2513_v45  ;;  %2856 = vmatpush.msrb.mxu3 %v2533_v18  ;;  %v3271_v18 = vld [vmem:[%s8065_s5 + $0x1b0] sm:$0xff] }
 0x2d8   : > { %3445 = vmatpush.msra.mxu1 %v7024_v41  ;;  %3428 = vmatpush.msra.mxu0 %v7531_v1  ;;  %v2530_v41 = vld [vmem:[%s8063_s3 + $0x798] sm:$0xff] }
 0x2d9   : > { %2841 = vmatpush.msrb.mxu2 %v2512_v3  ;;  %2857 = vmatpush.msrb.mxu3 %v2532_v28  ;;  %v3265_v3 = vld [vmem:[%s8065_s5 + $0x180] sm:$0xff] }
 0x2da   : > { %3446 = vmatpush.msra.mxu1 %v7038_v15  ;;  %3429 = vmatpush.msra.mxu0 %v7543_v56  ;;  %v7572_v15 = vld [vmem:[%s8065_s5 + $0x170] sm:$0xff]  ;;  %v2246_v50 = vpop.f32.mrf.mxu2 }
 0x2db   : > { %2842 = vmatpush.msrb.mxu2 %v2511_v47  ;;  %2858 = vmatpush.msrb.mxu3 %v2531_v9  ;;  %v2247_v8 = vadd.f32 %v2246_v50, %v2227_v48  ;;  %v7732_v47 = vld [vmem:[%s8065_s5 + $0x378] sm:$0xff]  ;;  %v2871_v9 = vld [vmem:[#allocation3 + $0x2] sm:$0x3]  ;;  %v7818_v48 = vld [vmem:[%s8065_s5 + $0x330] sm:$0xff] }
 0x2dc   : > { %2843 = vmatmul.f32.vlgmr.msrb.gmra.mxu2 %v2285_v12  ;;  %3447 = vmatpush.msra.mxu1 %v7053_v29  ;;  %v7587_v29 = vld [vmem:[%s8065_s5 + $0x168] sm:$0xff]  ;;  %v3002_v12 = vld [vmem:[%s8065_s5 + $0x3e0] sm:$0xff]  ;;  %v7808_v50 = vld [vmem:[%s8065_s5 + $0x338] sm:$0xff] }
 0x2dd   : > { %3066 = vmatpush.msra.mxu2 %v7557_v20  ;;  %2859 = vmatpush.msrb.mxu3 %v2530_v41  ;;  %v7742_v41 = vld [vmem:[%s8065_s5 + $0x370] sm:$0xff] }
 0x2de   : > { %3448 = vmatpush.msra.mxu1 %v7068_v17  ;;  %3430 = vmatpush.msra.mxu0 %v7566_v35  ;;  %v7597_v17 = vld [vmem:[%s8065_s5 + $0x1c0] sm:$0xff] }
 0x2df   : > { %3067 = vmatpush.msra.mxu2 %v7572_v15  ;;  %2860 = vmatpush.msrb.mxu3 %v2529_v22  ;;  %v7771_v22 = vld [vmem:[%s8065_s5 + $0x358] sm:$0xff] }
 0x2e0   : > { %3449 = vmatpush.msra.mxu1 %v7080_v27  ;;  %3431 = vmatpush.msra.mxu0 %v7581_v43  ;;  %v7614_v27 = vld [vmem:[%s8065_s5 + $0x158] sm:$0xff] }
 0x2e1   : > { %3068 = vmatpush.msra.mxu2 %v7587_v29  ;;  %2861 = vmatpush.msrb.mxu3 %v2528_v38  ;;  %v7798_v38 = vld [vmem:[%s8065_s5 + $0x340] sm:$0xff] }
 0x2e2   : > { %3450 = vmatpush.msra.mxu1 %v7095_v13  ;;  %v2266_v40 = vpop.f32.mrf.mxu3  ;;  %3432 = vmatpush.msra.mxu0 %v7597_v17  ;;  %v7625_v13 = vld [vmem:[%s8065_s5 + $0x150] sm:$0xff] }
 0x2e3   : > { %3069 = vmatpush.msra.mxu2 %v7603_v49  ;;  %2862 = vmatpush.msrb.mxu3 %v2527_v58  ;;  %v2267_v14 = vadd.f32 %v2266_v40, %v2247_v8  ;;  %v7838_v58 = vld [vmem:[%s8065_s5 + $0x320] sm:$0xff]  ;;  %v7848_v8 = vld [vmem:[%s8065_s5 + $0x318] sm:$0xff]  ;;  %v7858_v40 = vld [vmem:[%s8065_s5 + $0x310] sm:$0xff] }
 0x2e4   : > { %2863 = vmatmul.f32.vlgmr.msrb.gmra.mxu3 %v2286_v7  ;;  %3451 = vmatpush.msra.mxu1 %v7110_v34  ;;  %v7636_v34 = vld [vmem:[%s8065_s5 + $0x148] sm:$0xff] }
 0x2e5   : > { %3070 = vmatpush.msra.mxu2 %v7614_v27  ;;  %3086 = vmatpush.msra.mxu3 %v7492_v57  ;;  %v2269_v45 = vmax.f32 %v2267_v14, 0.0  ;;  %v3270_v57 = vld [vmem:[%s8065_s5 + $0x1a8] sm:$0xff]  ;;  %v7878_v14 = vld [vmem:[%s8065_s5 + $0x300] sm:$0xff] }
 0x2e6   : > { %3452 = vmatpush.msra.mxu1 %v7125_v36  ;;  %3433 = vmatpush.msra.mxu0 %v3272_v23  ;;  %v7647_v36 = vld [vmem:[%s8065_s5 + $0x140] sm:$0xff]  ;;  %v7868_v7 = vld [vmem:[%s8065_s5 + $0x308] sm:$0xff] }
 0x2e7   : > { %3071 = vmatpush.msra.mxu2 %v7625_v13  ;;  %3087 = vmatpush.msra.mxu3 %v7505_v25  ;;  %2270 = vst [vmem:[#allocation3 + $0x8] sm:$0xf] %v2269_v45  ;;  %v3269_v25 = vld [vmem:[%s8065_s5 + $0x1a0] sm:$0xff] }
 0x2e8   : > { %3453 = vmatpush.msra.mxu1 %v7140_v37  ;;  %3434 = vmatpush.msra.mxu0 %v3271_v18  ;;  %v7658_v37 = vld [vmem:[%s8065_s5 + $0x138] sm:$0xff] }
 0x2e9   : > { %3072 = vmatpush.msra.mxu2 %v7636_v34  ;;  %3088 = vmatpush.msra.mxu3 %v7518_v4  ;;  %v3268_v4 = vld [vmem:[%s8065_s5 + $0x198] sm:$0xff] }
 0x2ea   : > { %3454 = vmatpush.msra.mxu1 %v7155_v46  ;;  %3435 = vmatpush.msra.mxu0 %v3270_v57  ;;  %v7669_v46 = vld [vmem:[%s8065_s5 + $0x130] sm:$0xff] }
 0x2eb   : > { %3073 = vmatpush.msra.mxu2 %v7647_v36  ;;  %3089 = vmatpush.msra.mxu3 %v7531_v1  ;;  %v3266_v1 = vld [vmem:[%s8065_s5 + $0x188] sm:$0xff] }
 0x2ec   : > { %3455 = vmatpush.msra.mxu1 %v7170_v53  ;;  %3436 = vmatpush.msra.mxu0 %v3269_v25  ;;  %v3267_v53 = vld [vmem:[%s8065_s5 + $0x190] sm:$0xff] }
 0x2ed   : > { %3074 = vmatpush.msra.mxu2 %v7658_v37  ;;  %3090 = vmatpush.msra.mxu3 %v7543_v56  ;;  %v7723_v56 = vld [vmem:[%s8065_s5 + $0x100] sm:$0xff] }
 0x2ee   : > { %3456 = vmatpush.msra.mxu1 %v7185_v60  ;;  %v2877_v16 = vld [vmem:[#allocation3 + $0xa] sm:$0x3]  ;;  %3437 = vmatpush.msra.mxu0 %v3268_v4  ;;  %v7688_v60 = vld [vmem:[%s8065_s5 + $0x120] sm:$0xff]  ;;  %v2875_v45 = vld [vmem:[#allocation3 + $0x8] sm:$0x3] }
 0x2ef   : > { %3075 = vmatpush.msra.mxu2 %v7669_v46  ;;  %3091 = vmatpush.msra.mxu3 %v7566_v35  ;;  %v3212_v28 = vld [vmem:[#allocation3 + $0x9] sm:$0x3]  ;;  %v7761_v35 = vld [vmem:[%s8065_s5 + $0x360] sm:$0xff] }
 0x2f0   : > { %3457 = vmatpush.msra.mxu1 %v7201_v19  ;;  %3202 = vmatmul.f32.vlgmr.msrb.gmra.mxu0 %v2877_v16  ;;  %v7699_v19 = vld [vmem:[%s8065_s5 + $0x118] sm:$0xff]  ;;  %v3242_v16 = vld [vmem:[%s8065_s5 + $0xc8] sm:$0xff] }
 0x2f1   : > { %3076 = vmatpush.msra.mxu2 %v7677_v6  ;;  %3092 = vmatpush.msra.mxu3 %v7581_v43  ;;  %v7778_v43 = vld [vmem:[%s8065_s5 + $0x350] sm:$0xff] }
 0x2f2   : > { %3458 = vmatpush.msra.mxu1 %v7215_v2  ;;  %3438 = vmatpush.msra.mxu0 %v3267_v53  ;;  %v7710_v2 = vld [vmem:[%s8065_s5 + $0x110] sm:$0xff] }
 0x2f3   : > { %3077 = vmatpush.msra.mxu2 %v7688_v60  ;;  %3093 = vmatpush.msra.mxu3 %v7597_v17  ;;  %v7828_v17 = vld [vmem:[%s8065_s5 + $0x328] sm:$0xff] }
 0x2f4   : > { %3459 = vmatpush.msra.mxu1 %v7230_v24  ;;  %3439 = vmatpush.msra.mxu0 %v3266_v1  ;;  %v3211_v24 = vld [vmem:[#allocation3 + $0x8] sm:$0x3] }
 0x2f5   : > { %3078 = vmatpush.msra.mxu2 %v7699_v19  ;;  %3094 = vmatpush.msra.mxu3 %v3272_v23  ;;  %v3248_v23 = vld [vmem:[%s8065_s5 + $0xf8] sm:$0xff] }
 0x2f6   : > { %3460 = vmatpush.msra.mxu1 %v7245_v42  ;;  %3440 = vmatpush.msra.mxu0 %v3265_v3  ;;  %v3005_v42 = vld [vmem:[%s8065_s5 + $0x3f8] sm:$0xff] }
 0x2f7   : > { %3079 = vmatpush.msra.mxu2 %v7710_v2  ;;  %3095 = vmatpush.msra.mxu3 %v3271_v18  ;;  %v3246_v18 = vld [vmem:[%s8065_s5 + $0xe8] sm:$0xff] }
 0x2f8   : > { %3461 = vmatmul.f32.vlgmr.msra.gmra.mxu1 %v3212_v28  ;;  %3441 = vmatmul.f32.vlgmr.msra.gmra.mxu0 %v3211_v24  ;;  %v3311_v28 = vld [vmem:[%s8065_s5 + $0x2f0] sm:$0xff]  ;;  %v2584_v24 = vpop.f32.mrf.mxu1 }
 0x2f9   : > { %3080 = vmatpush.msra.mxu2 %v7717_v31  ;;  %3096 = vmatpush.msra.mxu3 %v3270_v57  ;;  %v3244_v57 = vld [vmem:[%s8065_s5 + $0xd8] sm:$0xff] }
 0x2fa   : > { %3505 = vmatpush.msrb.mxu0 %v3005_v42  ;;  %3525 = vmatpush.msrb.mxu1 %v7273_v44  ;;  %v3003_v44 = vld [vmem:[%s8065_s5 + $0x3e8] sm:$0xff] }
 0x2fb   : > { %3081 = vmatpush.msra.mxu2 %v7723_v56  ;;  %3097 = vmatpush.msra.mxu3 %v3269_v25  ;;  %v2876_v25 = vld [vmem:[#allocation3 + $0x9] sm:$0x3] }
 0x2fc   : > { %3082 = vmatmul.f32.vlgmr.msra.gmra.mxu2 %v2871_v9  ;;  %3506 = vmatpush.msrb.mxu0 %v3004_v59  ;;  %v2604_v9 = vpop.f32.mrf.mxu2 }
 0x2fd   : > { %3146 = vmatpush.msrb.mxu2 %v7732_v47  ;;  %3098 = vmatpush.msra.mxu3 %v3268_v4  ;;  %v3243_v4 = vld [vmem:[%s8065_s5 + $0xd0] sm:$0xff] }
 0x2fe   : > { %3526 = vmatpush.msrb.mxu1 %v7287_v52  ;;  %3507 = vmatpush.msrb.mxu0 %v3003_v44  ;;  %v3001_v52 = vld [vmem:[%s8065_s5 + $0x3d8] sm:$0xff] }
 0x2ff   : > { %3147 = vmatpush.msrb.mxu2 %v7742_v41  ;;  %3099 = vmatpush.msra.mxu3 %v3267_v53  ;;  %v3241_v53 = vld [vmem:[%s8065_s5 + $0xc0] sm:$0xff] }
 0x300   : > { %3527 = vmatpush.msrb.mxu1 %v7302_v61  ;;  %3508 = vmatpush.msrb.mxu0 %v3002_v12  ;;  %v2872_v61 = vld [vmem:[#allocation3 + $0x4] sm:$0x3] }
 0x301   : > { %3148 = vmatpush.msrb.mxu2 %v7751_v0  ;;  %3100 = vmatpush.msra.mxu3 %v3266_v1  ;;  %v3240_v1 = vld [vmem:[%s8065_s5 + $0xb8] sm:$0xff] }
 0x302   : > { %3528 = vmatpush.msrb.mxu1 %v7314_v10  ;;  %3509 = vmatpush.msrb.mxu0 %v3001_v52  ;;  %v3000_v10 = vld [vmem:[%s8065_s5 + $0x3d0] sm:$0xff] }
 0x303   : > { %3149 = vmatpush.msrb.mxu2 %v7761_v35  ;;  %3101 = vmatpush.msra.mxu3 %v3265_v3  ;;  %v2564_v3 = vpop.f32.mrf.mxu0 }
 0x304   : > { %3102 = vmatmul.f32.vlgmr.msra.gmra.mxu3 %v2872_v61  ;;  %3529 = vmatpush.msrb.mxu1 %v7329_v63  ;;  %v2999_v63 = vld [vmem:[%s8065_s5 + $0x3c8] sm:$0xff] }
 0x305   : > { %3150 = vmatpush.msrb.mxu2 %v7771_v22  ;;  %3166 = vmatpush.msrb.mxu3 %v3005_v42  ;;  %v3310_v42 = vld [vmem:[%s8065_s5 + $0x2e8] sm:$0xff] }
 0x306   : > { %3510 = vmatpush.msrb.mxu0 %v3000_v10  ;;  %3530 = vmatpush.msrb.mxu1 %v7342_v55  ;;  %v2998_v55 = vld [vmem:[%s8065_s5 + $0x3c0] sm:$0xff] }
 0x307   : > { %3151 = vmatpush.msrb.mxu2 %v7778_v43  ;;  %3167 = vmatpush.msrb.mxu3 %v3004_v59  ;;  %v3309_v59 = vld [vmem:[%s8065_s5 + $0x2e0] sm:$0xff] }
 0x308   : > { %3511 = vmatpush.msrb.mxu0 %v2999_v63  ;;  %3531 = vmatpush.msrb.mxu1 %v7363_v5  ;;  %v2997_v5 = vld [vmem:[%s8065_s5 + $0x3b8] sm:$0xff] }
 0x309   : > { %3152 = vmatpush.msrb.mxu2 %v7788_v39  ;;  %3168 = vmatpush.msrb.mxu3 %v3003_v44  ;;  %v2624_v44 = vpop.f32.mrf.mxu3 }
 0x30a   : > { %3512 = vmatpush.msrb.mxu0 %v2998_v55  ;;  %3532 = vmatpush.msrb.mxu1 %v7375_v26  ;;  %v2996_v26 = vld [vmem:[%s8065_s5 + $0x3b0] sm:$0xff] }
 0x30b   : > { %3153 = vmatpush.msrb.mxu2 %v7798_v38  ;;  %3169 = vmatpush.msrb.mxu3 %v3002_v12 }
 0x30c   : > { %3513 = vmatpush.msrb.mxu0 %v2997_v5  ;;  %3533 = vmatpush.msrb.mxu1 %v7388_v30  ;;  %v2995_v30 = vld [vmem:[%s8065_s5 + $0x3a8] sm:$0xff] }
 0x30d   : > { %3154 = vmatpush.msrb.mxu2 %v7808_v50  ;;  %3170 = vmatpush.msrb.mxu3 %v3001_v52  ;;  %v3210_v52 = vld [vmem:[#allocation3 + $0x6] sm:$0x3] }
 0x30e   : > { %3514 = vmatpush.msrb.mxu0 %v2996_v26  ;;  %3534 = vmatpush.msrb.mxu1 %v7401_v33  ;;  %v2994_v33 = vld [vmem:[%s8065_s5 + $0x3a0] sm:$0xff] }
 0x30f   : > { %3155 = vmatpush.msrb.mxu2 %v7818_v48  ;;  %3171 = vmatpush.msrb.mxu3 %v3000_v10  ;;  %v2644_v10 = vpop.f32.mrf.mxu0 }
 0x310   : > { %3515 = vmatpush.msrb.mxu0 %v2995_v30  ;;  %3535 = vmatpush.msrb.mxu1 %v7415_v11  ;;  %v2993_v11 = vld [vmem:[%s8065_s5 + $0x398] sm:$0xff] }
 0x311   : > { %3156 = vmatpush.msrb.mxu2 %v7828_v17  ;;  %3172 = vmatpush.msrb.mxu3 %v2999_v63 }
 0x312   : > { %3516 = vmatpush.msrb.mxu0 %v2994_v33  ;;  %3536 = vmatpush.msrb.mxu1 %v7427_v54  ;;  %v2992_v54 = vld [vmem:[%s8065_s5 + $0x390] sm:$0xff] }
 0x313   : > { %3157 = vmatpush.msrb.mxu2 %v7838_v58  ;;  %3173 = vmatpush.msrb.mxu3 %v2998_v55  ;;  %v2664_v55 = vpop.f32.mrf.mxu1 }
 0x314   : > { %3517 = vmatpush.msrb.mxu0 %v2993_v11  ;;  %3537 = vmatpush.msrb.mxu1 %v7440_v32  ;;  %v2991_v32 = vld [vmem:[%s8065_s5 + $0x388] sm:$0xff] }
 0x315   : > { %3158 = vmatpush.msrb.mxu2 %v7848_v8  ;;  %3174 = vmatpush.msrb.mxu3 %v2997_v5 }
 0x316   : > { %3518 = vmatpush.msrb.mxu0 %v2992_v54  ;;  %3538 = vmatpush.msrb.mxu1 %v7453_v62  ;;  %v2990_v62 = vld [vmem:[%s8065_s5 + $0x380] sm:$0xff] }
 0x317   : > { %3159 = vmatpush.msrb.mxu2 %v7858_v40  ;;  %3175 = vmatpush.msrb.mxu3 %v2996_v26 }
 0x318   : > { %3519 = vmatpush.msrb.mxu0 %v2991_v32  ;;  %3539 = vmatpush.msrb.mxu1 %v7466_v21  ;;  %v3247_v21 = vld [vmem:[%s8065_s5 + $0xf0] sm:$0xff] }
 0x319   : > { %3160 = vmatpush.msrb.mxu2 %v7868_v7  ;;  %3176 = vmatpush.msrb.mxu3 %v2995_v30 }
 0x31a   : > { %3520 = vmatpush.msrb.mxu0 %v2990_v62  ;;  %3540 = vmatpush.msrb.mxu1 %v7479_v51  ;;  %v3245_v51 = vld [vmem:[%s8065_s5 + $0xe0] sm:$0xff] }
 0x31b   : > { %3161 = vmatpush.msrb.mxu2 %v7878_v14  ;;  %3177 = vmatpush.msrb.mxu3 %v2994_v33 }
 0x31c   : > { %3162 = vmatmul.f32.vlgmr.msrb.gmra.mxu2 %v2875_v45 }
 0x31d   : > { %3385 = vmatpush.msra.mxu2 %v3248_v23  ;;  %3178 = vmatpush.msrb.mxu3 %v2993_v11 }
 0x31e   : > { %v2684_v5 = vpop.f32.mrf.mxu2 }
 0x31f   : > { %3386 = vmatpush.msra.mxu2 %v3247_v21  ;;  %3179 = vmatpush.msrb.mxu3 %v2992_v54  ;;  %v2724_v54 = vpop.f32.mrf.mxu0 }
 0x321   : > { %3387 = vmatpush.msra.mxu2 %v3246_v18  ;;  %3180 = vmatpush.msrb.mxu3 %v2991_v32 }
 0x323   : > { %3388 = vmatpush.msra.mxu2 %v3245_v51  ;;  %3181 = vmatpush.msrb.mxu3 %v2990_v62  ;;  %v2744_v62 = vpop.f32.mrf.mxu1 }
 0x324   : > { %3182 = vmatmul.f32.vlgmr.msrb.gmra.mxu3 %v2876_v25 }
 0x325   : > { %3389 = vmatpush.msra.mxu2 %v3244_v57  ;;  %3405 = vmatpush.msra.mxu3 %v7557_v20  ;;  %v3239_v20 = vld [vmem:[%s8065_s5 + $0xb0] sm:$0xff] }
 0x326   : > { %v2704_v30 = vpop.f32.mrf.mxu3 }
 0x327   : > { %3390 = vmatpush.msra.mxu2 %v3243_v4  ;;  %3406 = vmatpush.msra.mxu3 %v7572_v15  ;;  %v3238_v15 = vld [vmem:[%s8065_s5 + $0xa8] sm:$0xff]  ;;  %v2804_v57 = vpop.f32.mrf.mxu0 }
 0x329   : > { %3391 = vmatpush.msra.mxu2 %v3242_v16  ;;  %3407 = vmatpush.msra.mxu3 %v7587_v29  ;;  %v3237_v29 = vld [vmem:[%s8065_s5 + $0xa0] sm:$0xff] }
 0x32b   : > { %3392 = vmatpush.msra.mxu2 %v3241_v53  ;;  %3408 = vmatpush.msra.mxu3 %v7603_v49  ;;  %v3236_v49 = vld [vmem:[%s8065_s5 + $0x98] sm:$0xff]  ;;  %v2824_v25 = vpop.f32.mrf.mxu1 }
 0x32d   : > { %3393 = vmatpush.msra.mxu2 %v3240_v1  ;;  %3409 = vmatpush.msra.mxu3 %v7614_v27  ;;  %v3235_v27 = vld [vmem:[%s8065_s5 + $0x90] sm:$0xff] }
 0x32f   : > { %3394 = vmatpush.msra.mxu2 %v3239_v20  ;;  %3410 = vmatpush.msra.mxu3 %v7625_v13  ;;  %v3234_v13 = vld [vmem:[%s8065_s5 + $0x88] sm:$0xff] }
 0x331   : > { %3395 = vmatpush.msra.mxu2 %v3238_v15  ;;  %3411 = vmatpush.msra.mxu3 %v7636_v34  ;;  %v3233_v34 = vld [vmem:[%s8065_s5 + $0x80] sm:$0xff] }
 0x333   : > { %3396 = vmatpush.msra.mxu2 %v3237_v29  ;;  %3412 = vmatpush.msra.mxu3 %v7647_v36  ;;  %v3676_v36 = vld [vmem:[%s8064_s4] ss:$0 sm:$0xff] }
 0x335   : > { %3397 = vmatpush.msra.mxu2 %v3236_v49  ;;  %3413 = vmatpush.msra.mxu3 %v7658_v37  ;;  %v3312_v37 = vld [vmem:[%s8065_s5 + $0x2f8] sm:$0xff] }
 0x337   : > { %3398 = vmatpush.msra.mxu2 %v3235_v27  ;;  %3414 = vmatpush.msra.mxu3 %v7669_v46  ;;  %v3209_v46 = vld [vmem:[#allocation3 + $0x5] sm:$0x3] }
 0x339   : > { %3399 = vmatpush.msra.mxu2 %v3234_v13  ;;  %3415 = vmatpush.msra.mxu3 %v7677_v6  ;;  %v2565_v6 = vadd.f32 %v3676_v36, %v2564_v3 }
 0x33b   : > { %3400 = vmatpush.msra.mxu2 %v3233_v34  ;;  %3416 = vmatpush.msra.mxu3 %v7688_v60  ;;  %v2585_v60 = vadd.f32 %v2584_v24, %v2565_v6 }
 0x33c   : > { %3401 = vmatmul.f32.vlgmr.msra.gmra.mxu2 %v3209_v46 }
 0x33d   : > { %3465 = vmatpush.msrb.mxu2 %v3312_v37  ;;  %3417 = vmatpush.msra.mxu3 %v7699_v19  ;;  %v2605_v12 = vadd.f32 %v2604_v9, %v2585_v60  ;;  %v3308_v19 = vld [vmem:[%s8065_s5 + $0x2d8] sm:$0xff] }
 0x33e   : > { %v2764_v23 = vpop.f32.mrf.mxu2 }
 0x33f   : > { %3466 = vmatpush.msrb.mxu2 %v3311_v28  ;;  %3418 = vmatpush.msra.mxu3 %v7710_v2  ;;  %v2625_v61 = vadd.f32 %v2624_v44, %v2605_v12  ;;  %v3307_v2 = vld [vmem:[%s8065_s5 + $0x2d0] sm:$0xff]  ;;  %v3678_v12 = vld [vmem:[%s8066_s6] ss:$0 sm:$0xff] }
 0x341   : > { %3467 = vmatpush.msrb.mxu2 %v3310_v42  ;;  %3419 = vmatpush.msra.mxu3 %v7717_v31  ;;  %v3306_v31 = vld [vmem:[%s8065_s5 + $0x2c8] sm:$0xff]  ;;  %v2645_v63 = vadd.f32 %v2644_v10, %v2625_v61 }
 0x343   : > { %3468 = vmatpush.msrb.mxu2 %v3309_v59  ;;  %3420 = vmatpush.msra.mxu3 %v7723_v56  ;;  %v3305_v56 = vld [vmem:[%s8065_s5 + $0x2c0] sm:$0xff]  ;;  %v2665_v26 = vadd.f32 %v2664_v55, %v2645_v63 }
 0x344   : > { %3421 = vmatmul.f32.vlgmr.msra.gmra.mxu3 %v3210_v52 }
 0x345   : > { %3469 = vmatpush.msrb.mxu2 %v3308_v19  ;;  %3485 = vmatpush.msrb.mxu3 %v7732_v47  ;;  %v3304_v47 = vld [vmem:[%s8065_s5 + $0x2b8] sm:$0xff]  ;;  %v2685_v33 = vadd.f32 %v2684_v5, %v2665_v26 }
 0x347   : > { %3470 = vmatpush.msrb.mxu2 %v3307_v2  ;;  %3486 = vmatpush.msrb.mxu3 %v7742_v41  ;;  %v3303_v41 = vld [vmem:[%s8065_s5 + $0x2b0] sm:$0xff]  ;;  %v2705_v11 = vadd.f32 %v2704_v30, %v2685_v33  ;;  %v2784_v21 = vpop.f32.mrf.mxu3 }
 0x349   : > { %3471 = vmatpush.msrb.mxu2 %v3306_v31  ;;  %3487 = vmatpush.msrb.mxu3 %v7751_v0  ;;  %v3302_v0 = vld [vmem:[%s8065_s5 + $0x2a8] sm:$0xff]  ;;  %v2725_v32 = vadd.f32 %v2724_v54, %v2705_v11 }
 0x34b   : > { %3472 = vmatpush.msrb.mxu2 %v3305_v56  ;;  %3488 = vmatpush.msrb.mxu3 %v7761_v35  ;;  %v3301_v35 = vld [vmem:[%s8065_s5 + $0x2a0] sm:$0xff]  ;;  %v2745_v45 = vadd.f32 %v2744_v62, %v2725_v32 }
 0x34d   : > { %3473 = vmatpush.msrb.mxu2 %v3304_v47  ;;  %3489 = vmatpush.msrb.mxu3 %v7771_v22  ;;  %v3300_v22 = vld [vmem:[%s8065_s5 + $0x298] sm:$0xff]  ;;  %v2765_v18 = vadd.f32 %v2764_v23, %v2745_v45 }
 0x34f   : > { %3474 = vmatpush.msrb.mxu2 %v3303_v41  ;;  %3490 = vmatpush.msrb.mxu3 %v7778_v43  ;;  %v3299_v43 = vld [vmem:[%s8065_s5 + $0x290] sm:$0xff]  ;;  %v2785_v51 = vadd.f32 %v2784_v21, %v2765_v18 }
 0x351   : > { %3475 = vmatpush.msrb.mxu2 %v3302_v0  ;;  %3491 = vmatpush.msrb.mxu3 %v7788_v39  ;;  %v3298_v39 = vld [vmem:[%s8065_s5 + $0x288] sm:$0xff] }
 0x353   : > { %3476 = vmatpush.msrb.mxu2 %v3301_v35  ;;  %3492 = vmatpush.msrb.mxu3 %v7798_v38  ;;  %v3297_v38 = vld [vmem:[%s8065_s5 + $0x280] sm:$0xff] }
 0x355   : > { %3477 = vmatpush.msrb.mxu2 %v3300_v22  ;;  %3493 = vmatpush.msrb.mxu3 %v7808_v50  ;;  %v3213_v50 = vld [vmem:[#allocation3 + $0xa] sm:$0x3] }
 0x357   : > { %3478 = vmatpush.msrb.mxu2 %v3299_v43  ;;  %3494 = vmatpush.msrb.mxu3 %v7818_v48  ;;  %v2805_v48 = vadd.f32 %v2804_v57, %v2785_v51 }
 0x359   : > { %3479 = vmatpush.msrb.mxu2 %v3298_v39  ;;  %3495 = vmatpush.msrb.mxu3 %v7828_v17  ;;  %v2825_v17 = vadd.f32 %v2824_v25, %v2805_v48 }
 0x35b   : > { %3480 = vmatpush.msrb.mxu2 %v3297_v38  ;;  %3496 = vmatpush.msrb.mxu3 %v7838_v58 }
 0x35c   : > { %3481 = vmatmul.f32.vlgmr.msrb.gmra.mxu2 %v3213_v50 }
 0x35d   : > { %3497 = vmatpush.msrb.mxu3 %v7848_v8  ;;  %v3677_v8 = vld [vmem:[%s8066_s6] ss:$0 sm:$0xff] }
 0x35f   : > { %3498 = vmatpush.msrb.mxu3 %v7858_v40  ;;  %v2844_v4 = vpop.f32.mrf.mxu2  ;;  %v3043_v40 = vpop.f32.mrf.mxu0 }
 0x360   : > { %v2845_v16 = vadd.f32 %v2844_v4, %v2825_v17 }
 0x361   : > { %3499 = vmatpush.msrb.mxu3 %v7868_v7  ;;  %v3063_v7 = vpop.f32.mrf.mxu1 }
 0x363   : > { %3500 = vmatpush.msrb.mxu3 %v7878_v14  ;;  %v3044_v14 = vadd.f32 %v3677_v8, %v3043_v40 }
 0x365   : > { %v3064_v27 = vadd.f32 %v3063_v7, %v3044_v14 }
 0x367   : > { %v2864_v53 = vpop.f32.mrf.mxu3  ;;  %v3123_v37 = vpop.f32.mrf.mxu0 }
 0x368   : > { %v2865_v1 = vadd.f32 %v2864_v53, %v2845_v16 }
 0x369   : > { %v3143_v46 = vpop.f32.mrf.mxu1 }
 0x36a   : > { %v2867_v20 = vmax.f32 %v2865_v1, 0.0 }
 0x36c   : > { %2868 = vst [vmem:[#allocation3 + $0xc] sm:$0xf] %v2867_v20 }
 0x36f   : > { %v3203_v60 = vpop.f32.mrf.mxu0 }
 0x371   : > { %v3382_v19 = vpop.f32.mrf.mxu1 }
 0x372   : > { %v3383_v61 = vadd.f32 %v3678_v12, %v3382_v19 }
 0x373   : > { %v3214_v58 = vld [vmem:[#allocation3 + $0xc] sm:$0x3]  ;;  %v3216_v29 = vld [vmem:[#allocation3 + $0xe] sm:$0x3] }
 0x374   : > { %v3215_v15 = vld [vmem:[#allocation3 + $0xd] sm:$0x3]  ;;  %3501 = vmatmul.f32.vlgmr.msrb.gmra.mxu3 %v3214_v58  ;;  %3541 = vmatmul.f32.vlgmr.msrb.gmra.mxu1 %v3216_v29 }
 0x375   : > { %3521 = vmatmul.f32.vlgmr.msrb.gmra.mxu0 %v3215_v15 }
 0x377   : > { %v3442_v63 = vpop.f32.mrf.mxu0 }
 0x379   : > { %v3462_v47 = vpop.f32.mrf.mxu1 }
 0x37f   : > { %v3083_v49 = vpop.f32.mrf.mxu2 }
 0x380   : > { %v3084_v34 = vadd.f32 %v3083_v49, %v3064_v27 }
 0x387   : > { %v3103_v13 = vpop.f32.mrf.mxu3 }
 0x388   : > { %v3104_v36 = vadd.f32 %v3103_v13, %v3084_v34 }
 0x38a   : > { %v3124_v3 = vadd.f32 %v3123_v37, %v3104_v36 }
 0x38c   : > { %v3144_v24 = vadd.f32 %v3143_v46, %v3124_v3 }
 0x39f   : > { %v3163_v28 = vpop.f32.mrf.mxu2 }
 0x3a0   : > { %v3164_v6 = vadd.f32 %v3163_v28, %v3144_v24 }
 0x3a7   : > { %v3183_v42 = vpop.f32.mrf.mxu3 }
 0x3a8   : > { %v3184_v9 = vadd.f32 %v3183_v42, %v3164_v6 }
 0x3aa   : > { %v3204_v59 = vadd.f32 %v3203_v60, %v3184_v9 }
 0x3ac   : > { %v3206_v44 = vmax.f32 %v3204_v59, 0.0 }
 0x3ae   : > { %3207 = vst [vmem:[%s271_s23] sm:$0x3] %v3206_v44 }
 0x3bf   : > { %v3402_v52 = vpop.f32.mrf.mxu2 }
 0x3c0   : > { %v3403_v31 = vadd.f32 %v3402_v52, %v3383_v61 }
 0x3c7   : > { %v3422_v2 = vpop.f32.mrf.mxu3 }
 0x3c8   : > { %v3423_v10 = vadd.f32 %v3422_v2, %v3403_v31 }
 0x3ca   : > { %v3443_v56 = vadd.f32 %v3442_v63, %v3423_v10 }
 0x3cc   : > { %v3463_v5 = vadd.f32 %v3462_v47, %v3443_v56 }
 0x3df   : > { %v3482_v55 = vpop.f32.mrf.mxu2 }
 0x3e0   : > { %v3483_v26 = vadd.f32 %v3482_v55, %v3463_v5 }
 0x3f1   : > { %v3542_v11 = vpop.f32.mrf.mxu1 }
 0x3f2   : > { %v3522_v33 = vpop.f32.mrf.mxu0 }
 0x3f7   : > { %v3502_v41 = vpop.f32.mrf.mxu3 }
 0x3f8   : > { %v3503_v30 = vadd.f32 %v3502_v41, %v3483_v26 }
 0x3fa   : > { %v3523_v0 = vadd.f32 %v3522_v33, %v3503_v30 }
 0x3fc   : > { %v3543_v35 = vadd.f32 %v3542_v11, %v3523_v0 }
 0x3fe   : > { %v3545_v22 = vmax.f32 %v3543_v35, 0.0 }
 0x400   : > { %3546 = vst [vmem:[%s271_s23 + $0x2] sm:$0x3] %v3545_v22 }
 0x401   : > { %3707 = shalt.err (!%p3704_p3)
}
 0x402   : > { %3633 = dma.vmem_to_hbm [thread:$0]  (%p3822_p5), %s3561_s17, 64, %s3563_s18, %s3548_s28  }
 0x403 PF: > { %p3639_p4 = scmp.ge.s32.totalorder %s3742_s27, 2  ;;  %s3574_s20 = sand.u32 1, %s3730_s24  }
 0x404   : > { %s3575_s23 = scalar_lea.sflag [#allocation5], %s3574_s20 }
 0x405   : > { %p3636_p7 = pnand %p3639_p4, %p3826_p6 }
 0x407   : > { %p3637_p8 = pneg %p3636_p7 }
 0x409   : > { %3725 = dma.done.wait (%p3637_p8), %s3575_s23, 64  }
 0x40a   : > { %3727 = vsyncadd (%p3637_p8), %s3575_s23, 4294967232  ;;  %p17_p9 = scmp.ge.s32.totalorder %s3809_s30, 4   ;;  %s8070_s24 = smov %s3734_s25 }
 0x40b   : > { %s8071_s25 = smov %s3738_s26  ;;  %s8072_s26 = smov %s3820_s10 }
 0x40c   : > { %s8073_s27 = smov %s3809_s30  ;;  %19 = sbr.rel (!%p17_p9) target bundleno = 3 (0x3), region = 83 }
 0x411   :  { %3581 = vsyncpa [#allocation5], 1 }
 0x412   :  { %3583 = vsyncpa [#allocation5 + $0x1], 1 }

</bundles_post_ra>
